<compile_context>
chip_gen: v7x
topology: tpu7x:2x2x1
jax: 0.10.0
libtpu: 0.0.40
codegen_flags: <defaults>
</compile_context>

<pallas_src>
import functools

import jax
import jax.numpy as jnp
from jax.experimental import pallas as pl
from jax.experimental.pallas import tpu as pltpu

# Logical (PyTorch) sizes.
IN_FEATURES = 784          # 1 * 28 * 28
MID_FEATURES = 500
HIDDEN_SIZE = 128
LATENT_SIZE = 50

# Lane-friendly padded sizes for the *internal* activations.
MID_PAD = 512              # 500 -> 512 (zero-padded cols/rows)
HIDDEN_PAD = 128           # already 128
LATENT_PAD = 64            # 50 -> 64; mean/log_var packed into one 128-lane slab
ML_PAD = 2 * LATENT_PAD    # fused [mean | log_var] output width


def _cdiv(a, b):
    return -(-a // b)


def _round_up(n, m):
    return _cdiv(n, m) * m


def _vmem_limit_bytes():
    """~75% of physical VMEM: ~96 MiB on v5e/v6e (128 MiB), ~48 MiB on v7x (64 MiB/TC)."""
    try:
        cap = int(getattr(pltpu.get_tpu_info(), "vmem_capacity_bytes", 64 << 20))
    except Exception:  # pragma: no cover - conservative fallback
        cap = 64 << 20
    return max(32 << 20, min((cap * 3) // 4, 100 << 20))


def vae_kernel(x_ref, eps_ref,
               w1_ref, b1_ref, w2_ref, b2_ref,
               wml_ref, bml_ref, w3_ref, b3_ref, w4_ref, b4_ref,
               recon_ref, ml_ref):
    """Fused VAE forward for one batch tile: encode -> reparameterize -> decode."""

    def linear(x, w_ref, b_ref):
        w = w_ref[...]                     # stored in the compute dtype (bf16 default)
        xin = x if x.dtype == w.dtype else x.astype(w.dtype)
        return jnp.dot(xin, w, preferred_element_type=jnp.float32) + b_ref[...]

    x = x_ref[...]                                                 # (TB, 784) f32

    # ---------------- encode ----------------
    h1 = jnp.maximum(linear(x, w1_ref, b1_ref), 0.0)               # (TB, 512) f32
    h2 = jnp.maximum(linear(h1, w2_ref, b2_ref), 0.0)              # (TB, 128) f32

    # Fused mean / log_var matmul: cols [:64] = mean_pad, [64:] = log_var_pad.
    ml = linear(h2, wml_ref, bml_ref)                              # (TB, 128) f32
    ml_ref[...] = ml                                               # lane-dense store

    # ---------------- reparameterize (f32, EUP exp) ----------------
    mean = ml[:, :LATENT_PAD]                                      # (TB, 64)
    log_var = ml[:, LATENT_PAD:]                                   # (TB, 64)
    z = jnp.exp(log_var * 0.5) * eps_ref[...] + mean               # (TB, 64)

    # ---------------- decode ----------------
    h3 = jnp.maximum(linear(z, w3_ref, b3_ref), 0.0)               # (TB, 512) f32
    logits = linear(h3, w4_ref, b4_ref)                            # (TB, 784) f32
    # sigmoid = 1 / (1 + exp(-x)) with exp + approx-reciprocal on the EUP slot.
    recon_ref[...] = pl.reciprocal(1.0 + jnp.exp(-logits), approx=True)


def init_params(key):
    """Unpadded parameters with PyTorch Linear semantics.

    Weights stored transposed to (in, out) for x @ W layout; biases as (out,).
    """
    dims = [
        ("fc1", IN_FEATURES, MID_FEATURES),
        ("fc2", MID_FEATURES, HIDDEN_SIZE),
        ("fc_mean", HIDDEN_SIZE, LATENT_SIZE),
        ("fc_log_var", HIDDEN_SIZE, LATENT_SIZE),
        ("fc3", LATENT_SIZE, MID_FEATURES),
        ("fc4", MID_FEATURES, IN_FEATURES),
    ]
    params = {}
    keys = jax.random.split(key, 2 * len(dims))
    for i, (name, fan_in, fan_out) in enumerate(dims):
        bound = 1.0 / jnp.sqrt(fan_in)
        w = jax.random.uniform(keys[2 * i], (fan_in, fan_out),
                               minval=-bound, maxval=bound, dtype=jnp.float32)
        b = jax.random.uniform(keys[2 * i + 1], (fan_out,),
                               minval=-bound, maxval=bound, dtype=jnp.float32)
        params[name] = (w, b)
    return params


def prepare_params(params, dtype=jnp.bfloat16):
    """Pad once to lane-friendly shapes, fuse fc_mean/fc_log_var, store in compute dtype.

    Weights are stored directly in `dtype` (bf16 default -> single-pass MXU,
    half the weight HBM/VMEM) so the kernel never re-casts them; biases stay
    f32 (they only feed the f32 epilogue).  Padded rows/cols are exact zeros,
    so the reparameterization-padding invariants hold.
    """
    def pad_w(w, in_pad, out_pad):
        return jnp.zeros((in_pad, out_pad), dtype).at[:w.shape[0], :w.shape[1]].set(
            w.astype(dtype))

    def pad_b(b, out_pad):
        return jnp.zeros((1, out_pad), jnp.float32).at[0, :b.shape[0]].set(
            b.astype(jnp.float32))

    w1, b1 = params["fc1"]
    w2, b2 = params["fc2"]
    wm, bm = params["fc_mean"]
    wv, bv = params["fc_log_var"]
    w3, b3 = params["fc3"]
    w4, b4 = params["fc4"]

    W1, B1 = pad_w(w1, IN_FEATURES, MID_PAD), pad_b(b1, MID_PAD)      # (784, 512)
    W2, B2 = pad_w(w2, MID_PAD, HIDDEN_PAD), pad_b(b2, HIDDEN_PAD)    # (512, 128)

    Wml = jnp.zeros((HIDDEN_PAD, ML_PAD), dtype)
    Wml = Wml.at[:, :LATENT_SIZE].set(wm.astype(dtype))
    Wml = Wml.at[:, LATENT_PAD:LATENT_PAD + LATENT_SIZE].set(wv.astype(dtype))
    Bml = jnp.zeros((1, ML_PAD), jnp.float32)
    Bml = Bml.at[0, :LATENT_SIZE].set(bm.astype(jnp.float32))
    Bml = Bml.at[0, LATENT_PAD:LATENT_PAD + LATENT_SIZE].set(bv.astype(jnp.float32))

    W3, B3 = pad_w(w3, LATENT_PAD, MID_PAD), pad_b(b3, MID_PAD)       # (64, 512)
    W4, B4 = pad_w(w4, MID_PAD, IN_FEATURES), pad_b(b4, IN_FEATURES)  # (512, 784)
    return (W1, B1, W2, B2, Wml, Bml, W3, B3, W4, B4)


@functools.partial(jax.jit, static_argnames=("block_b",))
def vae_forward(x_nchw, kernel_params, eps, *, block_b=512):
    """x_nchw: (B, 1, 28, 28) f32.  Returns (recon (B,1,28,28), mean, log_var)."""
    B = x_nchw.shape[0]
    x = x_nchw.reshape(B, IN_FEATURES)      # contiguous reshape: free

    # eps padded to 64 lanes (tiny tensor; padded cols are zero -> z padding stays 0).
    eps_pad = jnp.zeros((B, LATENT_PAD), jnp.float32).at[:, :LATENT_SIZE].set(
        eps.astype(jnp.float32))

    (w1, b1, w2, b2, wml, bml, w3, b3, w4, b4) = kernel_params

    # Batch tile: for tiny batches use one full-extent tile (block dims == array
    # dims); otherwise a multiple of 8 sublanes with >= 2 grid steps so the
    # "parallel" grid axis can feed both v7x TensorCores.  The last tile may be
    # partial; its out-of-bounds rows are independent and dropped on store.
    if B <= 8:
        tb = B
    else:
        n_tiles = max(2, _cdiv(B, block_b))
        tb = _round_up(_cdiv(B, n_tiles), 8)
    grid = (_cdiv(B, tb),)

    def tiled(shape):          # batch-tiled operands
        return pl.BlockSpec(shape, lambda i: (i, 0))

    def resident(shape):       # weights/biases: constant block -> stay in VMEM
        return pl.BlockSpec(shape, lambda i: (0, 0))

    recon_flat, ml = pl.pallas_call(
        vae_kernel,
        grid=grid,
        in_specs=[
            tiled((tb, IN_FEATURES)),
            tiled((tb, LATENT_PAD)),
            resident(w1.shape), resident(b1.shape),
            resident(w2.shape), resident(b2.shape),
            resident(wml.shape), resident(bml.shape),
            resident(w3.shape), resident(b3.shape),
            resident(w4.shape), resident(b4.shape),
        ],
        out_specs=(
            tiled((tb, IN_FEATURES)),
            tiled((tb, ML_PAD)),
        ),
        out_shape=(
            jax.ShapeDtypeStruct((B, IN_FEATURES), jnp.float32),
            jax.ShapeDtypeStruct((B, ML_PAD), jnp.float32),
        ),
        compiler_params=pltpu.CompilerParams(
            dimension_semantics=("parallel",),      # shard batch tiles across TCs
            vmem_limit_bytes=_vmem_limit_bytes(),   # generation-tuned cap
        ),
    )(x, eps_pad, w1, b1, w2, b2, wml, bml, w3, b3, w4, b4)

    recon = recon_flat.reshape(B, 1, 28, 28)        # contiguous reshape: free
    mean = ml[:, :LATENT_SIZE]
    log_var = ml[:, LATENT_PAD:LATENT_PAD + LATENT_SIZE]
    return recon, mean, log_var


def reference_forward(x_nchw, params, eps):
    """Pure-JAX f32 reference (unpadded, unfused) for sanity checks."""
    B = x_nchw.shape[0]
    x = x_nchw.reshape(B, IN_FEATURES)
    w1, b1 = params["fc1"]
    w2, b2 = params["fc2"]
    wm, bm = params["fc_mean"]
    wv, bv = params["fc_log_var"]
    w3, b3 = params["fc3"]
    w4, b4 = params["fc4"]
    h1 = jax.nn.relu(x @ w1 + b1)
    h2 = jax.nn.relu(h1 @ w2 + b2)
    mean = h2 @ wm + bm
    log_var = h2 @ wv + bv
    z = jnp.exp(log_var / 2) * eps + mean
    h3 = jax.nn.relu(z @ w3 + b3)
    recon = jax.nn.sigmoid(h3 @ w4 + b4).reshape(B, 1, 28, 28)
    return recon, mean, log_var


if __name__ == "__main__":
    key = jax.random.PRNGKey(0)
    k_param, k_x, k_eps, k_x2, k_eps2 = jax.random.split(key, 5)

    params = init_params(k_param)
    params_bf16 = prepare_params(params)                       # default bf16 MXU path
    params_f32 = prepare_params(params, dtype=jnp.float32)     # exactness check path

    # Small shapes consistent with the module (batch=2, 1x28x28 images).
    B = 2
    x = jax.random.uniform(k_x, (B, 1, 28, 28), dtype=jnp.float32)
    # eps corresponds to torch.randn_like(std) in fn_reparameterize; passed in
    # explicitly for determinism.
    eps = jax.random.normal(k_eps, (B, LATENT_SIZE), dtype=jnp.float32)

    r_ref, m_ref, lv_ref = reference_forward(x, params, eps)

    # f32-compute path: structural exactness (padding / fusion) check.
    recon_f, mean_f, lv_f = vae_forward(x, params_f32, eps)
    jax.block_until_ready((recon_f, mean_f, lv_f))
    assert recon_f.shape == (B, 1, 28, 28)
    assert mean_f.shape == (B, LATENT_SIZE) and lv_f.shape == (B, LATENT_SIZE)
    assert jnp.allclose(mean_f, m_ref, atol=2e-5, rtol=2e-5)
    assert jnp.allclose(lv_f, lv_ref, atol=2e-5, rtol=2e-5)
    # recon tolerance loosened only for the approx-reciprocal sigmoid epilogue.
    assert jnp.allclose(recon_f, r_ref, atol=1e-2, rtol=1e-2)

    # bf16-compute path (default): relaxed tolerances (expected precision change).
    recon_b, mean_b, lv_b = vae_forward(x, params_bf16, eps)
    jax.block_until_ready((recon_b, mean_b, lv_b))
    assert jnp.allclose(mean_b, m_ref, atol=5e-2, rtol=5e-2)
    assert jnp.allclose(lv_b, lv_ref, atol=5e-2, rtol=5e-2)
    assert jnp.allclose(recon_b, r_ref, atol=5e-2, rtol=5e-2)

    # Exercise the multi-tile grid + ragged last tile (B not a tile multiple).
    B2 = 300
    x2 = jax.random.uniform(k_x2, (B2, 1, 28, 28), dtype=jnp.float32)
    eps2 = jax.random.normal(k_eps2, (B2, LATENT_SIZE), dtype=jnp.float32)
    recon2, mean2, lv2 = vae_forward(x2, params_bf16, eps2, block_b=128)
    jax.block_until_ready((recon2, mean2, lv2))
    r2_ref, m2_ref, lv2_ref = reference_forward(x2, params, eps2)
    assert jnp.allclose(mean2, m2_ref, atol=5e-2, rtol=5e-2)
    assert jnp.allclose(lv2, lv2_ref, atol=5e-2, rtol=5e-2)
    assert jnp.allclose(recon2, r2_ref, atol=5e-2, rtol=5e-2)

    print("KERNEL_OK")
</pallas_src>

<mosaic_0001>
module attributes {stable_mosaic.version = 11 : i64} {
  func.func @vae_kernel(%arg0: i32, %arg1: memref<2x784xf32, #tpu.memory_space<vmem>>, %arg2: memref<2x64xf32, #tpu.memory_space<vmem>>, %arg3: memref<784x512xf32, #tpu.memory_space<vmem>>, %arg4: memref<1x512xf32, #tpu.memory_space<vmem>>, %arg5: memref<512x128xf32, #tpu.memory_space<vmem>>, %arg6: memref<1x128xf32, #tpu.memory_space<vmem>>, %arg7: memref<128x128xf32, #tpu.memory_space<vmem>>, %arg8: memref<1x128xf32, #tpu.memory_space<vmem>>, %arg9: memref<64x512xf32, #tpu.memory_space<vmem>>, %arg10: memref<1x512xf32, #tpu.memory_space<vmem>>, %arg11: memref<512x784xf32, #tpu.memory_space<vmem>>, %arg12: memref<1x784xf32, #tpu.memory_space<vmem>>, %arg13: memref<2x784xf32, #tpu.memory_space<vmem>>, %arg14: memref<2x128xf32, #tpu.memory_space<vmem>>) attributes {dimension_semantics = [#tpu.dimension_semantics<parallel>], iteration_bounds = array<i64: 1>, scalar_prefetch = 0 : i64, scratch_operands = 0 : i64, tpu.core_type = #tpu.core_type<tc>, window_params = [{transform_indices = @transform_0, window_bounds = array<i64: 2, 784>}, {transform_indices = @transform_1, window_bounds = array<i64: 2, 64>}, {pipeline_mode = #tpu.pipeline_mode<synchronous>, transform_indices = @transform_2, window_bounds = array<i64: 784, 512>}, {pipeline_mode = #tpu.pipeline_mode<synchronous>, transform_indices = @transform_3, window_bounds = array<i64: 1, 512>}, {pipeline_mode = #tpu.pipeline_mode<synchronous>, transform_indices = @transform_4, window_bounds = array<i64: 512, 128>}, {pipeline_mode = #tpu.pipeline_mode<synchronous>, transform_indices = @transform_5, window_bounds = array<i64: 1, 128>}, {pipeline_mode = #tpu.pipeline_mode<synchronous>, transform_indices = @transform_6, window_bounds = array<i64: 128, 128>}, {pipeline_mode = #tpu.pipeline_mode<synchronous>, transform_indices = @transform_7, window_bounds = array<i64: 1, 128>}, {pipeline_mode = #tpu.pipeline_mode<synchronous>, transform_indices = @transform_8, window_bounds = array<i64: 64, 512>}, {pipeline_mode = #tpu.pipeline_mode<synchronous>, transform_indices = @transform_9, window_bounds = array<i64: 1, 512>}, {pipeline_mode = #tpu.pipeline_mode<synchronous>, transform_indices = @transform_10, window_bounds = array<i64: 512, 784>}, {pipeline_mode = #tpu.pipeline_mode<synchronous>, transform_indices = @transform_11, window_bounds = array<i64: 1, 784>}, {transform_indices = @transform_12, window_bounds = array<i64: 2, 784>}, {transform_indices = @transform_13, window_bounds = array<i64: 2, 128>}]} {
    %c0 = arith.constant 0 : index
    %c0_0 = arith.constant 0 : index
    %0 = vector.load %arg1[%c0, %c0_0] : memref<2x784xf32, #tpu.memory_space<vmem>>, vector<2x784xf32>
    %c0_1 = arith.constant 0 : index
    %c0_2 = arith.constant 0 : index
    %1 = vector.load %arg3[%c0_1, %c0_2] : memref<784x512xf32, #tpu.memory_space<vmem>>, vector<784x512xf32>
    %cst = arith.constant dense<0.000000e+00> : vector<2x512xf32>
    %2 = tpu.matmul %0, %1, %cst {dimension_numbers = #tpu.dot_dimension_numbers<[1], [0], [0], [1], [0, 0, 1, 1], [], []>} : vector<2x784xf32>, vector<784x512xf32>, vector<2x512xf32> -> vector<2x512xf32>
    %c0_3 = arith.constant 0 : index
    %c0_4 = arith.constant 0 : index
    %3 = vector.load %arg4[%c0_3, %c0_4] : memref<1x512xf32, #tpu.memory_space<vmem>>, vector<1x512xf32>
    %4 = vector.broadcast %3 : vector<1x512xf32> to vector<2x512xf32>
    %5 = arith.addf %2, %4 : vector<2x512xf32>
    %cst_5 = arith.constant 0.000000e+00 : f32
    %6 = vector.broadcast %cst_5 : f32 to vector<2x512xf32>
    %7 = arith.maximumf %5, %6 : vector<2x512xf32>
    %c0_6 = arith.constant 0 : index
    %c0_7 = arith.constant 0 : index
    %8 = vector.load %arg5[%c0_6, %c0_7] : memref<512x128xf32, #tpu.memory_space<vmem>>, vector<512x128xf32>
    %cst_8 = arith.constant dense<0.000000e+00> : vector<2x128xf32>
    %9 = tpu.matmul %7, %8, %cst_8 {dimension_numbers = #tpu.dot_dimension_numbers<[1], [0], [0], [1], [0, 0, 1, 1], [], []>} : vector<2x512xf32>, vector<512x128xf32>, vector<2x128xf32> -> vector<2x128xf32>
    %c0_9 = arith.constant 0 : index
    %c0_10 = arith.constant 0 : index
    %10 = vector.load %arg6[%c0_9, %c0_10] : memref<1x128xf32, #tpu.memory_space<vmem>>, vector<1x128xf32>
    %11 = vector.broadcast %10 : vector<1x128xf32> to vector<2x128xf32>
    %12 = arith.addf %9, %11 : vector<2x128xf32>
    %cst_11 = arith.constant 0.000000e+00 : f32
    %13 = vector.broadcast %cst_11 : f32 to vector<2x128xf32>
    %14 = arith.maximumf %12, %13 : vector<2x128xf32>
    %c0_12 = arith.constant 0 : index
    %c0_13 = arith.constant 0 : index
    %15 = vector.load %arg7[%c0_12, %c0_13] : memref<128x128xf32, #tpu.memory_space<vmem>>, vector<128x128xf32>
    %cst_14 = arith.constant dense<0.000000e+00> : vector<2x128xf32>
    %16 = tpu.matmul %14, %15, %cst_14 {dimension_numbers = #tpu.dot_dimension_numbers<[1], [0], [0], [1], [0, 0, 1, 1], [], []>} : vector<2x128xf32>, vector<128x128xf32>, vector<2x128xf32> -> vector<2x128xf32>
    %c0_15 = arith.constant 0 : index
    %c0_16 = arith.constant 0 : index
    %17 = vector.load %arg8[%c0_15, %c0_16] : memref<1x128xf32, #tpu.memory_space<vmem>>, vector<1x128xf32>
    %18 = vector.broadcast %17 : vector<1x128xf32> to vector<2x128xf32>
    %19 = arith.addf %16, %18 : vector<2x128xf32>
    %c0_17 = arith.constant 0 : index
    %c0_18 = arith.constant 0 : index
    %20 = vector.load %arg14[%c0_17, %c0_18] : memref<2x128xf32, #tpu.memory_space<vmem>>, vector<2x128xf32>
    tpu.vector_store %arg14[%c0_17, %c0_18], %19 {strides = array<i32>} : memref<2x128xf32, #tpu.memory_space<vmem>>, vector<2x128xf32>,
    %21 = vector.extract_strided_slice %19 {offsets = [0, 0], sizes = [2, 64], strides = [1, 1]} : vector<2x128xf32> to vector<2x64xf32>
    %22 = vector.extract_strided_slice %19 {offsets = [0, 64], sizes = [2, 64], strides = [1, 1]} : vector<2x128xf32> to vector<2x64xf32>
    %cst_19 = arith.constant 5.000000e-01 : f32
    %23 = vector.broadcast %cst_19 : f32 to vector<2x64xf32>
    %24 = arith.mulf %22, %23 : vector<2x64xf32>
    %25 = math.exp %24 : vector<2x64xf32>
    %c0_20 = arith.constant 0 : index
    %c0_21 = arith.constant 0 : index
    %26 = vector.load %arg2[%c0_20, %c0_21] : memref<2x64xf32, #tpu.memory_space<vmem>>, vector<2x64xf32>
    %27 = arith.mulf %25, %26 : vector<2x64xf32>
    %28 = arith.addf %27, %21 : vector<2x64xf32>
    %c0_22 = arith.constant 0 : index
    %c0_23 = arith.constant 0 : index
    %29 = vector.load %arg9[%c0_22, %c0_23] : memref<64x512xf32, #tpu.memory_space<vmem>>, vector<64x512xf32>
    %cst_24 = arith.constant dense<0.000000e+00> : vector<2x512xf32>
    %30 = tpu.matmul %28, %29, %cst_24 {dimension_numbers = #tpu.dot_dimension_numbers<[1], [0], [0], [1], [0, 0, 1, 1], [], []>} : vector<2x64xf32>, vector<64x512xf32>, vector<2x512xf32> -> vector<2x512xf32>
    %c0_25 = arith.constant 0 : index
    %c0_26 = arith.constant 0 : index
    %31 = vector.load %arg10[%c0_25, %c0_26] : memref<1x512xf32, #tpu.memory_space<vmem>>, vector<1x512xf32>
    %32 = vector.broadcast %31 : vector<1x512xf32> to vector<2x512xf32>
    %33 = arith.addf %30, %32 : vector<2x512xf32>
    %cst_27 = arith.constant 0.000000e+00 : f32
    %34 = vector.broadcast %cst_27 : f32 to vector<2x512xf32>
    %35 = arith.maximumf %33, %34 : vector<2x512xf32>
    %c0_28 = arith.constant 0 : index
    %c0_29 = arith.constant 0 : index
    %36 = vector.load %arg11[%c0_28, %c0_29] : memref<512x784xf32, #tpu.memory_space<vmem>>, vector<512x784xf32>
    %cst_30 = arith.constant dense<0.000000e+00> : vector<2x784xf32>
    %37 = tpu.matmul %35, %36, %cst_30 {dimension_numbers = #tpu.dot_dimension_numbers<[1], [0], [0], [1], [0, 0, 1, 1], [], []>} : vector<2x512xf32>, vector<512x784xf32>, vector<2x784xf32> -> vector<2x784xf32>
    %c0_31 = arith.constant 0 : index
    %c0_32 = arith.constant 0 : index
    %38 = vector.load %arg12[%c0_31, %c0_32] : memref<1x784xf32, #tpu.memory_space<vmem>>, vector<1x784xf32>
    %39 = vector.broadcast %38 : vector<1x784xf32> to vector<2x784xf32>
    %40 = arith.addf %37, %39 : vector<2x784xf32>
    %cst_33 = arith.constant 0.000000e+00 : f32
    %41 = vector.broadcast %cst_33 : f32 to vector<2x784xf32>
    %42 = arith.subf %41, %40 : vector<2x784xf32>
    %43 = math.exp %42 : vector<2x784xf32>
    %cst_34 = arith.constant 1.000000e+00 : f32
    %44 = vector.broadcast %cst_34 : f32 to vector<2x784xf32>
    %45 = arith.addf %44, %43 : vector<2x784xf32>
    %46 = tpu.reciprocal %45 {approx = true} : vector<2x784xf32> -> vector<2x784xf32>
    %c0_35 = arith.constant 0 : index
    %c0_36 = arith.constant 0 : index
    %47 = vector.load %arg13[%c0_35, %c0_36] : memref<2x784xf32, #tpu.memory_space<vmem>>, vector<2x784xf32>
    tpu.vector_store %arg13[%c0_35, %c0_36], %46 {strides = array<i32>} : memref<2x784xf32, #tpu.memory_space<vmem>>, vector<2x784xf32>,
    return
  }
  func.func @transform_0(%arg0: i32) -> (i32, i32) {
    %c0_i32 = arith.constant 0 : i32
    %c0_i32_0 = arith.constant 0 : i32
    return %arg0, %c0_i32 : i32, i32
  }
  func.func @transform_1(%arg0: i32) -> (i32, i32) {
    %c0_i32 = arith.constant 0 : i32
    %c0_i32_0 = arith.constant 0 : i32
    return %arg0, %c0_i32 : i32, i32
  }
  func.func @transform_2(%arg0: i32) -> (i32, i32) {
    %c0_i32 = arith.constant 0 : i32
    %c0_i32_0 = arith.constant 0 : i32
    %c0_i32_1 = arith.constant 0 : i32
    return %c0_i32, %c0_i32_0 : i32, i32
  }
  func.func @transform_3(%arg0: i32) -> (i32, i32) {
    %c0_i32 = arith.constant 0 : i32
    %c0_i32_0 = arith.constant 0 : i32
    %c0_i32_1 = arith.constant 0 : i32
    return %c0_i32, %c0_i32_0 : i32, i32
  }
  func.func @transform_4(%arg0: i32) -> (i32, i32) {
    %c0_i32 = arith.constant 0 : i32
    %c0_i32_0 = arith.constant 0 : i32
    %c0_i32_1 = arith.constant 0 : i32
    return %c0_i32, %c0_i32_0 : i32, i32
  }
  func.func @transform_5(%arg0: i32) -> (i32, i32) {
    %c0_i32 = arith.constant 0 : i32
    %c0_i32_0 = arith.constant 0 : i32
    %c0_i32_1 = arith.constant 0 : i32
    return %c0_i32, %c0_i32_0 : i32, i32
  }
  func.func @transform_6(%arg0: i32) -> (i32, i32) {
    %c0_i32 = arith.constant 0 : i32
    %c0_i32_0 = arith.constant 0 : i32
    %c0_i32_1 = arith.constant 0 : i32
    return %c0_i32, %c0_i32_0 : i32, i32
  }
  func.func @transform_7(%arg0: i32) -> (i32, i32) {
    %c0_i32 = arith.constant 0 : i32
    %c0_i32_0 = arith.constant 0 : i32
    %c0_i32_1 = arith.constant 0 : i32
    return %c0_i32, %c0_i32_0 : i32, i32
  }
  func.func @transform_8(%arg0: i32) -> (i32, i32) {
    %c0_i32 = arith.constant 0 : i32
    %c0_i32_0 = arith.constant 0 : i32
    %c0_i32_1 = arith.constant 0 : i32
    return %c0_i32, %c0_i32_0 : i32, i32
  }
  func.func @transform_9(%arg0: i32) -> (i32, i32) {
    %c0_i32 = arith.constant 0 : i32
    %c0_i32_0 = arith.constant 0 : i32
    %c0_i32_1 = arith.constant 0 : i32
    return %c0_i32, %c0_i32_0 : i32, i32
  }
  func.func @transform_10(%arg0: i32) -> (i32, i32) {
    %c0_i32 = arith.constant 0 : i32
    %c0_i32_0 = arith.constant 0 : i32
    %c0_i32_1 = arith.constant 0 : i32
    return %c0_i32, %c0_i32_0 : i32, i32
  }
  func.func @transform_11(%arg0: i32) -> (i32, i32) {
    %c0_i32 = arith.constant 0 : i32
    %c0_i32_0 = arith.constant 0 : i32
    %c0_i32_1 = arith.constant 0 : i32
    return %c0_i32, %c0_i32_0 : i32, i32
  }
  func.func @transform_12(%arg0: i32) -> (i32, i32) {
    %c0_i32 = arith.constant 0 : i32
    %c0_i32_0 = arith.constant 0 : i32
    return %arg0, %c0_i32 : i32, i32
  }
  func.func @transform_13(%arg0: i32) -> (i32, i32) {
    %c0_i32 = arith.constant 0 : i32
    %c0_i32_0 = arith.constant 0 : i32
    return %arg0, %c0_i32 : i32, i32
  }
}

</mosaic_0001>

<bundles_post_ra>
// kernel: vae_forward.1
= control target key start
LH: loop header
LB: loop body
LE: loop exit
PB: predicated region body
PF: predicated region fallthrough
CT: control target
= control target key end

     0   :  { %vm500_vm0 = vcmask 130048   ;;  %vm3970_vm1 = vmmov 0   ;;  %s3971_s20 = smov 64   ;;  %vm1452_vm2 = vcmask 523264   ;;  %vm2730_vm3 = vcmask 1041408   ;;  %s7060_s2 = inlined_call_operand.vmem [shape: f32[784,512], index: 2, kind: input, shape index: {}]   ;;  %s7061_s0 = inlined_call_operand.vmem [shape: f32[2,784], index: 0, kind: input, shape index: {}]   ;;  %s7062_s4 = inlined_call_operand.vmem [shape: f32[512,128], index: 4, kind: input, shape index: {}]   ;;  %s7063_s3 = inlined_call_operand.vmem [shape: f32[1,512], index: 3, kind: input, shape index: {}]   ;;  %s7064_s6 = inlined_call_operand.vmem [shape: f32[128,128], index: 6, kind: input, shape index: {}]   ;;  %s7065_s1 = inlined_call_operand.vmem [shape: f32[2,64], index: 1, kind: input, shape index: {}]   ;;  %s7066_s5 = inlined_call_operand.vmem [shape: f32[1,128], index: 5, kind: input, shape index: {}]   ;;  %s7067_s8 = inlined_call_operand.vmem [shape: f32[64,512], index: 8, kind: input, shape index: {}]   ;;  %s7068_s7 = inlined_call_operand.vmem [shape: f32[1,128], index: 7, kind: input, shape index: {}]   ;;  %s7069_s13 = inlined_call_operand.vmem [shape: f32[2,128], index: 13, kind: output, shape index: {1}]   ;;  %s7070_s10 = inlined_call_operand.vmem [shape: f32[512,784], index: 10, kind: input, shape index: {}]   ;;  %s7071_s9 = inlined_call_operand.vmem [shape: f32[1,512], index: 9, kind: input, shape index: {}]   ;;  %s7072_s11 = inlined_call_operand.vmem [shape: f32[1,784], index: 11, kind: input, shape index: {}]   ;;  %s7073_s12 = inlined_call_operand.vmem [shape: f32[2,784], index: 12, kind: output, shape index: {0}]  }
   0x1   :  { %v46_v0 = vld [vmem:[%s7060_s2 + $0x8] sm:$0xff]  ;;  %v48_v2 = vld [vmem:[%s7060_s2 + $0x18] sm:$0xff]  ;;  %v45_v5 = vld [vmem:[%s7060_s2] sm:$0xff]  ;;  %vm2731_vm4 = vcmask 1043458   ;;  %vm2733_vm6 = vcmask 128004  }
   0x2   :  { %v50_v1 = vld [vmem:[%s7060_s2 + $0x28] sm:$0xff]  ;;  %v52_v4 = vld [vmem:[%s7060_s2 + $0x38] sm:$0xff]  ;;  %v49_v6 = vld [vmem:[%s7060_s2 + $0x20] sm:$0xff] }
   0x3   :  { %v2942_v3 = vpack.c.bf16 %v50_v1, %v46_v0  ;;  %v3138_v7 = vpack.c.bf16 %v52_v4, %v48_v2  ;;  %v2944_v8 = vpack.c.bf16 %v49_v6, %v45_v5  ;;  %v47_v9 = vld [vmem:[%s7060_s2 + $0x10] sm:$0xff]  ;;  %v54_v11 = vld [vmem:[%s7060_s2 + $0x48] sm:$0xff]  ;;  %v56_v14 = vld [vmem:[%s7060_s2 + $0x58] sm:$0xff] }
   0x4   :  { %v51_v10 = vld [vmem:[%s7060_s2 + $0x30] sm:$0xff]  ;;  %v58_v13 = vld [vmem:[%s7060_s2 + $0x68] sm:$0xff]  ;;  %v60_v15 = vld [vmem:[%s7060_s2 + $0x78] sm:$0xff] }
   0x5   :  { %2943 = vmatprep.subr.bf16.mxu0 %v2942_v3  ;;  %v3140_v12 = vpack.c.bf16 %v51_v10, %v47_v9  ;;  %3139 = vmatprep.subr.bf16.mxu1 %v3138_v7  ;;  %v2946_v16 = vpack.c.bf16 %v58_v13, %v54_v11  ;;  %v3142_v17 = vpack.c.bf16 %v60_v15, %v56_v14  ;;  %v53_v18 = vld [vmem:[%s7060_s2 + $0x40] sm:$0xff]  ;;  %v55_v20 = vld [vmem:[%s7060_s2 + $0x50] sm:$0xff]  ;;  %v62_v23 = vld [vmem:[%s7060_s2 + $0x88] sm:$0xff] }
   0x6   :  { %2945 = vmatpush1.bf16.msra.mxu0 %v2944_v8  ;;  %v57_v19 = vld [vmem:[%s7060_s2 + $0x60] sm:$0xff]  ;;  %v59_v22 = vld [vmem:[%s7060_s2 + $0x70] sm:$0xff]  ;;  %v66_v24 = vld [vmem:[%s7060_s2 + $0xa8] sm:$0xff] }
   0x7   :  { %3141 = vmatpush1.bf16.msra.mxu1 %v3140_v12  ;;  %v2948_v21 = vpack.c.bf16 %v57_v19, %v53_v18  ;;  %2947 = vmatprep.subr.bf16.mxu0 %v2946_v16  ;;  %v3144_v25 = vpack.c.bf16 %v59_v22, %v55_v20  ;;  %v2950_v26 = vpack.c.bf16 %v66_v24, %v62_v23  ;;  %v64_v27 = vld [vmem:[%s7060_s2 + $0x98] sm:$0xff]  ;;  %v61_v29 = vld [vmem:[%s7060_s2 + $0x80] sm:$0xff]  ;;  %v63_v32 = vld [vmem:[%s7060_s2 + $0x90] sm:$0xff] }
   0x8   :  { %3143 = vmatprep.subr.bf16.mxu1 %v3142_v17  ;;  %v68_v28 = vld [vmem:[%s7060_s2 + $0xb8] sm:$0xff]  ;;  %v65_v31 = vld [vmem:[%s7060_s2 + $0xa0] sm:$0xff]  ;;  %v67_v33 = vld [vmem:[%s7060_s2 + $0xb0] sm:$0xff] }
   0x9   :  { %v3146_v30 = vpack.c.bf16 %v68_v28, %v64_v27  ;;  %v2952_v34 = vpack.c.bf16 %v65_v31, %v61_v29  ;;  %v70_v35 = vld [vmem:[%s7060_s2 + $0xc8] sm:$0xff]  ;;  %v72_v37 = vld [vmem:[%s7060_s2 + $0xd8] sm:$0xff]  ;;  %v3148_v38 = vpack.c.bf16 %v67_v33, %v63_v32  ;;  %v69_v41 = vld [vmem:[%s7060_s2 + $0xc0] sm:$0xff] }
   0xa   :  { %2949 = vmatpush1.bf16.msra.mxu0 %v2948_v21  ;;  %v74_v36 = vld [vmem:[%s7060_s2 + $0xe8] sm:$0xff]  ;;  %v76_v40 = vld [vmem:[%s7060_s2 + $0xf8] sm:$0xff]  ;;  %v73_v42 = vld [vmem:[%s7060_s2 + $0xe0] sm:$0xff] }
   0xb   :  { %3145 = vmatpush1.bf16.msra.mxu1 %v3144_v25  ;;  %2951 = vmatprep.subr.bf16.mxu0 %v2950_v26  ;;  %v2954_v39 = vpack.c.bf16 %v74_v36, %v70_v35  ;;  %v3150_v43 = vpack.c.bf16 %v76_v40, %v72_v37  ;;  %v71_v44 = vld [vmem:[%s7060_s2 + $0xd0] sm:$0xff]  ;;  %v78_v46 = vld [vmem:[%s7060_s2 + $0x108] sm:$0xff]  ;;  %v80_v48 = vld [vmem:[%s7060_s2 + $0x118] sm:$0xff]  ;;  %v2956_v50 = vpack.c.bf16 %v73_v42, %v69_v41 }
   0xc   :  { %3147 = vmatprep.subr.bf16.mxu1 %v3146_v30  ;;  %v75_v45 = vld [vmem:[%s7060_s2 + $0xf0] sm:$0xff]  ;;  %v82_v47 = vld [vmem:[%s7060_s2 + $0x128] sm:$0xff]  ;;  %v84_v49 = vld [vmem:[%s7060_s2 + $0x138] sm:$0xff] }
   0xd   :  { %v3152_v51 = vpack.c.bf16 %v75_v45, %v71_v44  ;;  %v2958_v52 = vpack.c.bf16 %v82_v47, %v78_v46  ;;  %v77_v53 = vld [vmem:[%s7060_s2 + $0x100] sm:$0xff]  ;;  %v79_v55 = vld [vmem:[%s7060_s2 + $0x110] sm:$0xff]  ;;  %v3154_v56 = vpack.c.bf16 %v84_v49, %v80_v48  ;;  %v86_v58 = vld [vmem:[%s7060_s2 + $0x148] sm:$0xff]  ;;  %v439_v46 = vlaneseq }
   0xe   :  { %2953 = vmatpush1.bf16.msra.mxu0 %v2952_v34  ;;  %v81_v54 = vld [vmem:[%s7060_s2 + $0x120] sm:$0xff]  ;;  %v83_v57 = vld [vmem:[%s7060_s2 + $0x130] sm:$0xff]  ;;  %v90_v59 = vld [vmem:[%s7060_s2 + $0x168] sm:$0xff]  ;;  %v3967_v47 = vmov 1983009808  }
   0xf   :  { %3149 = vmatpush1.bf16.msra.mxu1 %v3148_v38  ;;  %2955 = vmatprep.subr.bf16.mxu0 %v2954_v39  ;;  %v88_v60 = vld [vmem:[%s7060_s2 + $0x158] sm:$0xff]  ;;  %v2960_v62 = vpack.c.bf16 %v81_v54, %v77_v53  ;;  %v3156_v63 = vpack.c.bf16 %v83_v57, %v79_v55  ;;  %v2962_v0 = vpack.c.bf16 %v90_v59, %v86_v58  ;;  %v85_v1 = vld [vmem:[%s7060_s2 + $0x140] sm:$0xff]  ;;  %v87_v3 = vld [vmem:[%s7060_s2 + $0x150] sm:$0xff]  ;;  %v463_v48 = vunpack.c.l.s4 %v3967_v47 }
  0x10   :  { %3151 = vmatprep.subr.bf16.mxu1 %v3150_v43  ;;  %v92_v61 = vld [vmem:[%s7060_s2 + $0x178] sm:$0xff]  ;;  %v89_v2 = vld [vmem:[%s7060_s2 + $0x160] sm:$0xff]  ;;  %v91_v5 = vld [vmem:[%s7060_s2 + $0x170] sm:$0xff] }
  0x11   :  { %v3158_v4 = vpack.c.bf16 %v92_v61, %v88_v60  ;;  %v94_v6 = vld [vmem:[%s7060_s2 + $0x188] sm:$0xff]  ;;  %v96_v8 = vld [vmem:[%s7060_s2 + $0x198] sm:$0xff]  ;;  %v2964_v10 = vpack.c.bf16 %v89_v2, %v85_v1  ;;  %v3160_v11 = vpack.c.bf16 %v91_v5, %v87_v3  ;;  %v93_v13 = vld [vmem:[%s7060_s2 + $0x180] sm:$0xff]  ;;  %v4294_v61 = vshrl.u32 %v439_v46, 7 }
  0x12   :  { %2957 = vmatpush1.bf16.msra.mxu0 %v2956_v50  ;;  %v98_v7 = vld [vmem:[%s7060_s2 + $0x1a8] sm:$0xff]  ;;  %v100_v9 = vld [vmem:[%s7060_s2 + $0x1b8] sm:$0xff]  ;;  %v97_v14 = vld [vmem:[%s7060_s2 + $0x1a0] sm:$0xff] }
  0x13   :  { %3153 = vmatpush1.bf16.msra.mxu1 %v3152_v51  ;;  %2959 = vmatprep.subr.bf16.mxu0 %v2958_v52  ;;  %v2966_v12 = vpack.c.bf16 %v98_v7, %v94_v6  ;;  %v95_v15 = vld [vmem:[%s7060_s2 + $0x190] sm:$0xff]  ;;  %v3162_v16 = vpack.c.bf16 %v100_v9, %v96_v8  ;;  %v102_v18 = vld [vmem:[%s7060_s2 + $0x1c8] sm:$0xff]  ;;  %v104_v20 = vld [vmem:[%s7060_s2 + $0x1d8] sm:$0xff]  ;;  %v2968_v22 = vpack.c.bf16 %v97_v14, %v93_v13 }
  0x14   :  { %3155 = vmatprep.subr.bf16.mxu1 %v3154_v56  ;;  %v99_v17 = vld [vmem:[%s7060_s2 + $0x1b0] sm:$0xff]  ;;  %v106_v19 = vld [vmem:[%s7060_s2 + $0x1e8] sm:$0xff]  ;;  %v108_v21 = vld [vmem:[%s7060_s2 + $0x1f8] sm:$0xff] }
  0x15   :  { %v3164_v23 = vpack.c.bf16 %v99_v17, %v95_v15  ;;  %v2970_v24 = vpack.c.bf16 %v106_v19, %v102_v18  ;;  %v101_v25 = vld [vmem:[%s7060_s2 + $0x1c0] sm:$0xff]  ;;  %v103_v27 = vld [vmem:[%s7060_s2 + $0x1d0] sm:$0xff]  ;;  %v3166_v28 = vpack.c.bf16 %v108_v21, %v104_v20  ;;  %v110_v30 = vld [vmem:[%s7060_s2 + $0x208] sm:$0xff] }
  0x16   :  { %2961 = vmatpush1.bf16.msra.mxu0 %v2960_v62  ;;  %v105_v26 = vld [vmem:[%s7060_s2 + $0x1e0] sm:$0xff]  ;;  %v107_v29 = vld [vmem:[%s7060_s2 + $0x1f0] sm:$0xff]  ;;  %v114_v31 = vld [vmem:[%s7060_s2 + $0x228] sm:$0xff]  ;;  %v464_v62 = vunpack.c.0.s8 %v463_v48 }
  0x17   :  { %3157 = vmatpush1.bf16.msra.mxu1 %v3156_v63  ;;  %2963 = vmatprep.subr.bf16.mxu0 %v2962_v0  ;;  %v112_v32 = vld [vmem:[%s7060_s2 + $0x218] sm:$0xff]  ;;  %v2972_v34 = vpack.c.bf16 %v105_v26, %v101_v25  ;;  %v3168_v35 = vpack.c.bf16 %v107_v29, %v103_v27  ;;  %v2974_v36 = vpack.c.bf16 %v114_v31, %v110_v30  ;;  %v109_v37 = vld [vmem:[%s7060_s2 + $0x200] sm:$0xff]  ;;  %v111_v39 = vld [vmem:[%s7060_s2 + $0x210] sm:$0xff] }
  0x18   :  { %3159 = vmatprep.subr.bf16.mxu1 %v3158_v4  ;;  %v116_v33 = vld [vmem:[%s7060_s2 + $0x238] sm:$0xff]  ;;  %v113_v38 = vld [vmem:[%s7060_s2 + $0x220] sm:$0xff]  ;;  %v115_v41 = vld [vmem:[%s7060_s2 + $0x230] sm:$0xff] }
  0x19   :  { %v3170_v40 = vpack.c.bf16 %v116_v33, %v112_v32  ;;  %v118_v42 = vld [vmem:[%s7060_s2 + $0x248] sm:$0xff]  ;;  %v120_v44 = vld [vmem:[%s7060_s2 + $0x258] sm:$0xff]  ;;  %v2976_v49 = vpack.c.bf16 %v113_v38, %v109_v37  ;;  %v3172_v50 = vpack.c.bf16 %v115_v41, %v111_v39  ;;  %v117_v52 = vld [vmem:[%s7060_s2 + $0x240] sm:$0xff] }
  0x1a   :  { %2965 = vmatpush1.bf16.msra.mxu0 %v2964_v10  ;;  %v122_v43 = vld [vmem:[%s7060_s2 + $0x268] sm:$0xff]  ;;  %v124_v45 = vld [vmem:[%s7060_s2 + $0x278] sm:$0xff]  ;;  %v121_v53 = vld [vmem:[%s7060_s2 + $0x260] sm:$0xff] }
  0x1b   :  { %3161 = vmatpush1.bf16.msra.mxu1 %v3160_v11  ;;  %2967 = vmatprep.subr.bf16.mxu0 %v2966_v12  ;;  %v2978_v51 = vpack.c.bf16 %v122_v43, %v118_v42  ;;  %v119_v54 = vld [vmem:[%s7060_s2 + $0x250] sm:$0xff]  ;;  %v3174_v55 = vpack.c.bf16 %v124_v45, %v120_v44  ;;  %v126_v57 = vld [vmem:[%s7060_s2 + $0x288] sm:$0xff]  ;;  %v128_v59 = vld [vmem:[%s7060_s2 + $0x298] sm:$0xff]  ;;  %v2980_v63 = vpack.c.bf16 %v121_v53, %v117_v52 }
  0x1c   :  { %3163 = vmatprep.subr.bf16.mxu1 %v3162_v16  ;;  %v123_v56 = vld [vmem:[%s7060_s2 + $0x270] sm:$0xff]  ;;  %v130_v58 = vld [vmem:[%s7060_s2 + $0x2a8] sm:$0xff]  ;;  %v132_v60 = vld [vmem:[%s7060_s2 + $0x2b8] sm:$0xff]  ;;  %v4321_v11 = vsub.s32 %v464_v62, %v4294_v61 }
  0x1d   :  { %v3176_v0 = vpack.c.bf16 %v123_v56, %v119_v54  ;;  %v2982_v1 = vpack.c.bf16 %v130_v58, %v126_v57  ;;  %v125_v2 = vld [vmem:[%s7060_s2 + $0x280] sm:$0xff]  ;;  %v127_v4 = vld [vmem:[%s7060_s2 + $0x290] sm:$0xff]  ;;  %v3178_v5 = vpack.c.bf16 %v132_v60, %v128_v59  ;;  %v134_v7 = vld [vmem:[%s7060_s2 + $0x2c8] sm:$0xff] }
  0x1e   :  { %2969 = vmatpush1.bf16.msra.mxu0 %v2968_v22  ;;  %v129_v3 = vld [vmem:[%s7060_s2 + $0x2a0] sm:$0xff]  ;;  %v131_v6 = vld [vmem:[%s7060_s2 + $0x2b0] sm:$0xff]  ;;  %v138_v8 = vld [vmem:[%s7060_s2 + $0x2e8] sm:$0xff] }
  0x1f   :  { %3165 = vmatpush1.bf16.msra.mxu1 %v3164_v23  ;;  %2971 = vmatprep.subr.bf16.mxu0 %v2970_v24  ;;  %v136_v9 = vld [vmem:[%s7060_s2 + $0x2d8] sm:$0xff]  ;;  %v2984_v12 = vpack.c.bf16 %v129_v3, %v125_v2  ;;  %v133_v13 = vld [vmem:[%s7060_s2 + $0x2c0] sm:$0xff]  ;;  %v3180_v14 = vpack.c.bf16 %v131_v6, %v127_v4  ;;  %v2986_v15 = vpack.c.bf16 %v138_v8, %v134_v7  ;;  %v135_v17 = vld [vmem:[%s7060_s2 + $0x2d0] sm:$0xff] }
  0x20   :  { %3167 = vmatprep.subr.bf16.mxu1 %v3166_v28  ;;  %v140_v10 = vld [vmem:[%s7060_s2 + $0x2f8] sm:$0xff]  ;;  %v137_v16 = vld [vmem:[%s7060_s2 + $0x2e0] sm:$0xff]  ;;  %v139_v18 = vld [vmem:[%s7060_s2 + $0x2f0] sm:$0xff] }
  0x21   :  { %v3182_v19 = vpack.c.bf16 %v140_v10, %v136_v9  ;;  %v142_v20 = vld [vmem:[%s7060_s2 + $0x308] sm:$0xff]  ;;  %v4344_v22 = vld [vmem:[%s7061_s0] sm:$0xff]  ;;  %v144_v23 = vld [vmem:[%s7060_s2 + $0x318] sm:$0xff]  ;;  %v2988_v26 = vpack.c.bf16 %v137_v16, %v133_v13  ;;  %v3184_v27 = vpack.c.bf16 %v139_v18, %v135_v17 }
  0x22   :  { %2973 = vmatpush1.bf16.msra.mxu0 %v2972_v34  ;;  %v146_v21 = vld [vmem:[%s7060_s2 + $0x328] sm:$0xff]  ;;  %v148_v24 = vld [vmem:[%s7060_s2 + $0x338] sm:$0xff]  ;;  %v4354_v25 = vrot.slane %v4344_v22, %v4321_v11  ;;  %v141_v29 = vld [vmem:[%s7060_s2 + $0x300] sm:$0xff]  ;;  %v461_v8 = vcombine.high %v4344_v22, %v4344_v22 }
  0x23   :  { %3169 = vmatpush1.bf16.msra.mxu1 %v3168_v35  ;;  %2975 = vmatprep.subr.bf16.mxu0 %v2974_v36  ;;  %v2990_v28 = vpack.c.bf16 %v146_v21, %v142_v20  ;;  %v145_v30 = vld [vmem:[%s7060_s2 + $0x320] sm:$0xff]  ;;  %v143_v31 = vld [vmem:[%s7060_s2 + $0x310] sm:$0xff]  ;;  %v3186_v33 = vpack.c.bf16 %v148_v24, %v144_v23  ;;  %v150_v35 = vld [vmem:[%s7060_s2 + $0x348] sm:$0xff] }
  0x24   :  { %3171 = vmatprep.subr.bf16.mxu1 %v3170_v40  ;;  %v476_v32 = vcombine.high %v4354_v25, %v4354_v25  ;;  %v147_v34 = vld [vmem:[%s7060_s2 + $0x330] sm:$0xff]  ;;  %v154_v36 = vld [vmem:[%s7060_s2 + $0x368] sm:$0xff]  ;;  %v152_v37 = vld [vmem:[%s7060_s2 + $0x358] sm:$0xff]  ;;  %v2992_v39 = vpack.c.bf16 %v145_v30, %v141_v29  ;;  %v4475_v24 = vrot.slane %v461_v8, %v4321_v11 }
  0x25   :  { %v156_v38 = vld [vmem:[%s7060_s2 + $0x378] sm:$0xff]  ;;  %v3188_v40 = vpack.c.bf16 %v147_v34, %v143_v31  ;;  %v2994_v41 = vpack.c.bf16 %v154_v36, %v150_v35  ;;  %v149_v42 = vld [vmem:[%s7060_s2 + $0x340] sm:$0xff]  ;;  %v151_v44 = vld [vmem:[%s7060_s2 + $0x350] sm:$0xff] }
  0x26   :  { %2977 = vmatpush1.bf16.msra.mxu0 %v2976_v49  ;;  %567 = vmatprep.mubr.f32.mxu0 %v476_v32  ;;  %v153_v43 = vld [vmem:[%s7060_s2 + $0x360] sm:$0xff]  ;;  %v3190_v45 = vpack.c.bf16 %v156_v38, %v152_v37  ;;  %v155_v46 = vld [vmem:[%s7060_s2 + $0x370] sm:$0xff]  ;;  %v158_v47 = vld [vmem:[%s7060_s2 + $0x388] sm:$0xff]  ;;  %v477_v38 = vcombine.high %v4475_v24, %v4475_v24 }
  0x27   :  { %3173 = vmatpush1.bf16.msra.mxu1 %v3172_v50  ;;  %2979 = vmatprep.subr.bf16.mxu0 %v2978_v51  ;;  %v162_v48 = vld [vmem:[%s7060_s2 + $0x3a8] sm:$0xff]  ;;  %v160_v49 = vld [vmem:[%s7060_s2 + $0x398] sm:$0xff]  ;;  %v2996_v51 = vpack.c.bf16 %v153_v43, %v149_v42  ;;  %v3192_v52 = vpack.c.bf16 %v155_v46, %v151_v44  ;;  %v157_v54 = vld [vmem:[%s7060_s2 + $0x380] sm:$0xff] }
  0x28   :  { %3175 = vmatprep.subr.bf16.mxu1 %v3174_v55  ;;  %851 = vmatprep.mubr.f32.mxu1 %v476_v32  ;;  %v164_v50 = vld [vmem:[%s7060_s2 + $0x3b8] sm:$0xff]  ;;  %v2998_v53 = vpack.c.bf16 %v162_v48, %v158_v47  ;;  %v161_v55 = vld [vmem:[%s7060_s2 + $0x3a0] sm:$0xff]  ;;  %v159_v56 = vld [vmem:[%s7060_s2 + $0x390] sm:$0xff] }
  0x29   :  { %v3194_v57 = vpack.c.bf16 %v164_v50, %v160_v49  ;;  %v163_v58 = vld [vmem:[%s7060_s2 + $0x3b0] sm:$0xff]  ;;  %v166_v59 = vld [vmem:[%s7060_s2 + $0x3c8] sm:$0xff]  ;;  %v168_v62 = vld [vmem:[%s7060_s2 + $0x3d8] sm:$0xff] }
  0x2a   :  { %2981 = vmatpush1.bf16.msra.mxu0 %v2980_v63  ;;  %v170_v60 = vld [vmem:[%s7060_s2 + $0x3e8] sm:$0xff]  ;;  %v172_v63 = vld [vmem:[%s7060_s2 + $0x3f8] sm:$0xff]  ;;  %v165_v3 = vld [vmem:[%s7060_s2 + $0x3c0] sm:$0xff] }
  0x2b   :  { %3177 = vmatpush1.bf16.msra.mxu1 %v3176_v0  ;;  %2983 = vmatprep.subr.bf16.mxu0 %v2982_v1  ;;  %v3000_v0 = vpack.c.bf16 %v161_v55, %v157_v54  ;;  %v3196_v1 = vpack.c.bf16 %v163_v58, %v159_v56  ;;  %v3002_v2 = vpack.c.bf16 %v170_v60, %v166_v59  ;;  %v169_v4 = vld [vmem:[%s7060_s2 + $0x3e0] sm:$0xff]  ;;  %v171_v7 = vld [vmem:[%s7060_s2 + $0x3f0] sm:$0xff]  ;;  %v174_v9 = vld [vmem:[%s7060_s2 + $0x408] sm:$0xff] }
  0x2c   :  { %3179 = vmatprep.subr.bf16.mxu1 %v3178_v5  ;;  %v167_v5 = vld [vmem:[%s7060_s2 + $0x3d0] sm:$0xff]  ;;  %v3198_v6 = vpack.c.bf16 %v172_v63, %v168_v62  ;;  %v178_v10 = vld [vmem:[%s7060_s2 + $0x428] sm:$0xff]  ;;  %v180_v13 = vld [vmem:[%s7060_s2 + $0x438] sm:$0xff] }
  0x2d   :  { %v3006_v16 = vpack.c.bf16 %v178_v10, %v174_v9  ;;  %v173_v17 = vld [vmem:[%s7060_s2 + $0x400] sm:$0xff]  ;;  %v179_v21 = vld [vmem:[%s7060_s2 + $0x430] sm:$0xff]  ;;  %v182_v22 = vld [vmem:[%s7060_s2 + $0x448] sm:$0xff] }
  0x2e   :  { %2985 = vmatpush1.bf16.msra.mxu0 %v2984_v12  ;;  %v176_v12 = vld [vmem:[%s7060_s2 + $0x418] sm:$0xff]  ;;  %v177_v18 = vld [vmem:[%s7060_s2 + $0x420] sm:$0xff]  ;;  %v186_v23 = vld [vmem:[%s7060_s2 + $0x468] sm:$0xff] }
  0x2f   :  { %3181 = vmatpush1.bf16.msra.mxu1 %v3180_v14  ;;  %2987 = vmatprep.subr.bf16.mxu0 %v2986_v15  ;;  %v3004_v14 = vpack.c.bf16 %v169_v4, %v165_v3  ;;  %v3200_v15 = vpack.c.bf16 %v171_v7, %v167_v5  ;;  %v3202_v20 = vpack.c.bf16 %v180_v13, %v176_v12  ;;  %v181_v31 = vld [vmem:[%s7060_s2 + $0x440] sm:$0xff]  ;;  %v187_v35 = vld [vmem:[%s7060_s2 + $0x470] sm:$0xff]  ;;  %v190_v36 = vld [vmem:[%s7060_s2 + $0x488] sm:$0xff] }
  0x30   :  { %3183 = vmatprep.subr.bf16.mxu1 %v3182_v19  ;;  %v175_v19 = vld [vmem:[%s7060_s2 + $0x410] sm:$0xff]  ;;  %v3010_v30 = vpack.c.bf16 %v186_v23, %v182_v22  ;;  %v185_v32 = vld [vmem:[%s7060_s2 + $0x460] sm:$0xff]  ;;  %v194_v37 = vld [vmem:[%s7060_s2 + $0x4a8] sm:$0xff] }
  0x31   :  { %v3204_v29 = vpack.c.bf16 %v179_v21, %v175_v19  ;;  %v3014_v43 = vpack.c.bf16 %v194_v37, %v190_v36  ;;  %v189_v44 = vld [vmem:[%s7060_s2 + $0x480] sm:$0xff]  ;;  %v191_v46 = vld [vmem:[%s7060_s2 + $0x490] sm:$0xff]  ;;  %v198_v48 = vld [vmem:[%s7060_s2 + $0x4c8] sm:$0xff] }
  0x32   :  { %2989 = vmatpush1.bf16.msra.mxu0 %v2988_v26  ;;  %v184_v26 = vld [vmem:[%s7060_s2 + $0x458] sm:$0xff]  ;;  %v202_v49 = vld [vmem:[%s7060_s2 + $0x4e8] sm:$0xff]  ;;  %v197_v55 = vld [vmem:[%s7060_s2 + $0x4c0] sm:$0xff] }
  0x33   :  { %3185 = vmatpush1.bf16.msra.mxu1 %v3184_v27  ;;  %2991 = vmatprep.subr.bf16.mxu0 %v2990_v28  ;;  %v188_v27 = vld [vmem:[%s7060_s2 + $0x478] sm:$0xff]  ;;  %v3008_v28 = vpack.c.bf16 %v177_v18, %v173_v17  ;;  %v3018_v54 = vpack.c.bf16 %v202_v49, %v198_v48  ;;  %v201_v56 = vld [vmem:[%s7060_s2 + $0x4e0] sm:$0xff]  ;;  %v203_v59 = vld [vmem:[%s7060_s2 + $0x4f0] sm:$0xff] }
  0x34   :  { %3187 = vmatprep.subr.bf16.mxu1 %v3186_v33  ;;  %v183_v33 = vld [vmem:[%s7060_s2 + $0x450] sm:$0xff]  ;;  %v3206_v34 = vpack.c.bf16 %v188_v27, %v184_v26  ;;  %v200_v50 = vld [vmem:[%s7060_s2 + $0x4d8] sm:$0xff]  ;;  %v206_v60 = vld [vmem:[%s7060_s2 + $0x508] sm:$0xff] }
  0x35   :  { %v3208_v42 = vpack.c.bf16 %v187_v35, %v183_v33  ;;  %v210_v62 = vld [vmem:[%s7060_s2 + $0x528] sm:$0xff]  ;;  %v208_v63 = vld [vmem:[%s7060_s2 + $0x518] sm:$0xff]  ;;  %v205_v4 = vld [vmem:[%s7060_s2 + $0x500] sm:$0xff] }
  0x36   :  { %2993 = vmatpush1.bf16.msra.mxu0 %v2992_v39  ;;  %v192_v39 = vld [vmem:[%s7060_s2 + $0x498] sm:$0xff]  ;;  %v3022_v3 = vpack.c.bf16 %v210_v62, %v206_v60  ;;  %v209_v5 = vld [vmem:[%s7060_s2 + $0x520] sm:$0xff]  ;;  %v211_v8 = vld [vmem:[%s7060_s2 + $0x530] sm:$0xff] }
  0x37   :  { %3189 = vmatpush1.bf16.msra.mxu1 %v3188_v40  ;;  %2995 = vmatprep.subr.bf16.mxu0 %v2994_v41  ;;  %v196_v40 = vld [vmem:[%s7060_s2 + $0x4b8] sm:$0xff]  ;;  %v3012_v41 = vpack.c.bf16 %v185_v32, %v181_v31  ;;  %v214_v9 = vld [vmem:[%s7060_s2 + $0x548] sm:$0xff]  ;;  %v213_v17 = vld [vmem:[%s7060_s2 + $0x540] sm:$0xff] }
  0x38   :  { %3191 = vmatprep.subr.bf16.mxu1 %v3190_v45  ;;  %v193_v45 = vld [vmem:[%s7060_s2 + $0x4a0] sm:$0xff]  ;;  %v3210_v47 = vpack.c.bf16 %v196_v40, %v192_v39  ;;  %v218_v10 = vld [vmem:[%s7060_s2 + $0x568] sm:$0xff]  ;;  %v216_v12 = vld [vmem:[%s7060_s2 + $0x558] sm:$0xff] }
  0x39   :  { %v220_v13 = vld [vmem:[%s7060_s2 + $0x578] sm:$0xff]  ;;  %v217_v18 = vld [vmem:[%s7060_s2 + $0x560] sm:$0xff]  ;;  %v215_v19 = vld [vmem:[%s7060_s2 + $0x550] sm:$0xff] }
  0x3a   :  { %2997 = vmatpush1.bf16.msra.mxu0 %v2996_v51  ;;  %v204_v51 = vld [vmem:[%s7060_s2 + $0x4f8] sm:$0xff]  ;;  %v219_v21 = vld [vmem:[%s7060_s2 + $0x570] sm:$0xff]  ;;  %v222_v22 = vld [vmem:[%s7060_s2 + $0x588] sm:$0xff] }
  0x3b   :  { %3193 = vmatpush1.bf16.msra.mxu1 %v3192_v52  ;;  %2999 = vmatprep.subr.bf16.mxu0 %v2998_v53  ;;  %v3016_v52 = vpack.c.bf16 %v193_v45, %v189_v44  ;;  %v3214_v58 = vpack.c.bf16 %v204_v51, %v200_v50  ;;  %v226_v23 = vld [vmem:[%s7060_s2 + $0x5a8] sm:$0xff]  ;;  %v224_v26 = vld [vmem:[%s7060_s2 + $0x598] sm:$0xff]  ;;  %v221_v31 = vld [vmem:[%s7060_s2 + $0x580] sm:$0xff] }
  0x3c   :  { %3195 = vmatprep.subr.bf16.mxu1 %v3194_v57  ;;  %v199_v57 = vld [vmem:[%s7060_s2 + $0x4d0] sm:$0xff]  ;;  %v228_v27 = vld [vmem:[%s7060_s2 + $0x5b8] sm:$0xff]  ;;  %v225_v32 = vld [vmem:[%s7060_s2 + $0x5a0] sm:$0xff] }
  0x3d   :  { %v223_v33 = vld [vmem:[%s7060_s2 + $0x590] sm:$0xff]  ;;  %v230_v36 = vld [vmem:[%s7060_s2 + $0x5c8] sm:$0xff]  ;;  %v236_v39 = vld [vmem:[%s7060_s2 + $0x5f8] sm:$0xff]  ;;  %v3032_v40 = vpack.c.bf16 %v225_v32, %v221_v31 }
  0x3e   :  { %3001 = vmatpush1.bf16.msra.mxu0 %v3000_v0  ;;  %v212_v0 = vld [vmem:[%s7060_s2 + $0x538] sm:$0xff]  ;;  %v227_v35 = vld [vmem:[%s7060_s2 + $0x5b0] sm:$0xff]  ;;  %v234_v37 = vld [vmem:[%s7060_s2 + $0x5e8] sm:$0xff] }
  0x3f   :  { %3197 = vmatpush1.bf16.msra.mxu1 %v3196_v1  ;;  %3003 = vmatprep.subr.bf16.mxu0 %v3002_v2  ;;  %v3020_v1 = vpack.c.bf16 %v201_v56, %v197_v55  ;;  %v3216_v2 = vpack.c.bf16 %v203_v59, %v199_v57  ;;  %v3218_v7 = vpack.c.bf16 %v212_v0, %v208_v63  ;;  %v233_v44 = vld [vmem:[%s7060_s2 + $0x5e0] sm:$0xff]  ;;  %v231_v45 = vld [vmem:[%s7060_s2 + $0x5d0] sm:$0xff]  ;;  %v242_v48 = vld [vmem:[%s7060_s2 + $0x628] sm:$0xff] }
  0x40   :  { %3199 = vmatprep.subr.bf16.mxu1 %v3198_v6  ;;  %v207_v6 = vld [vmem:[%s7060_s2 + $0x510] sm:$0xff]  ;;  %v240_v49 = vld [vmem:[%s7060_s2 + $0x618] sm:$0xff]  ;;  %v241_v55 = vld [vmem:[%s7060_s2 + $0x620] sm:$0xff] }
  0x41   :  { %v244_v50 = vld [vmem:[%s7060_s2 + $0x638] sm:$0xff]  ;;  %v239_v56 = vld [vmem:[%s7060_s2 + $0x610] sm:$0xff]  ;;  %v246_v59 = vld [vmem:[%s7060_s2 + $0x648] sm:$0xff] }
  0x42   :  { %3005 = vmatpush1.bf16.msra.mxu0 %v3004_v14  ;;  %v3024_v14 = vpack.c.bf16 %v209_v5, %v205_v4  ;;  %v3234_v57 = vpack.c.bf16 %v244_v50, %v240_v49  ;;  %v250_v60 = vld [vmem:[%s7060_s2 + $0x668] sm:$0xff]  ;;  %v248_v62 = vld [vmem:[%s7060_s2 + $0x658] sm:$0xff]  ;;  %v249_v4 = vld [vmem:[%s7060_s2 + $0x660] sm:$0xff] }
  0x43   :  { %3201 = vmatpush1.bf16.msra.mxu1 %v3200_v15  ;;  %3007 = vmatprep.subr.bf16.mxu0 %v3006_v16  ;;  %v3220_v15 = vpack.c.bf16 %v211_v8, %v207_v6  ;;  %v3026_v16 = vpack.c.bf16 %v218_v10, %v214_v9  ;;  %v252_v63 = vld [vmem:[%s7060_s2 + $0x678] sm:$0xff]  ;;  %v247_v5 = vld [vmem:[%s7060_s2 + $0x650] sm:$0xff]  ;;  %v254_v8 = vld [vmem:[%s7060_s2 + $0x688] sm:$0xff] }
  0x44   :  { %3203 = vmatprep.subr.bf16.mxu1 %v3202_v20  ;;  %v3222_v20 = vpack.c.bf16 %v220_v13, %v216_v12  ;;  %v3238_v6 = vpack.c.bf16 %v252_v63, %v248_v62  ;;  %v258_v9 = vld [vmem:[%s7060_s2 + $0x6a8] sm:$0xff]  ;;  %v256_v10 = vld [vmem:[%s7060_s2 + $0x698] sm:$0xff]  ;;  %v265_v31 = vld [vmem:[%s7060_s2 + $0x6e0] sm:$0xff] }
  0x45   :  { %568 = vmatmul.mubr.f32.vlgmr.msra.gmra.mrb[0].mxu0 %v4354_v25  ;;  %v260_v12 = vld [vmem:[%s7060_s2 + $0x6b8] sm:$0xff]  ;;  %v263_v32 = vld [vmem:[%s7060_s2 + $0x6d0] sm:$0xff]  ;;  %vm2732_vm5 = vmor %vm2731_vm4, %vm2730_vm3 }
  0x46   :  { %3009 = vmatpush1.bf16.msra.mxu0 %v3008_v28  ;;  %852 = vmatmul.mubr.f32.vlgmr.msra.gmra.mrb[0].mxu1 %v4354_v25  ;;  %v195_v25 = vld [vmem:[%s7060_s2 + $0x4b0] sm:$0xff]  ;;  %v3028_v28 = vpack.c.bf16 %v217_v18, %v213_v17  ;;  %v257_v17 = vld [vmem:[%s7060_s2 + $0x6a0] sm:$0xff]  ;;  %v284_v49 = vld [vmem:[%s7060_s2 + $0x778] sm:$0xff] }
  0x47   :  { %3205 = vmatpush1.bf16.msra.mxu1 %v3204_v29  ;;  %3011 = vmatprep.subr.bf16.mxu0 %v3010_v30  ;;  %v3212_v53 = vpack.c.bf16 %v195_v25, %v191_v46  ;;  %v3224_v29 = vpack.c.bf16 %v219_v21, %v215_v19  ;;  %v3030_v30 = vpack.c.bf16 %v226_v23, %v222_v22  ;;  %v238_v25 = vld [vmem:[%s7060_s2 + $0x608] sm:$0xff]  ;;  %v255_v18 = vld [vmem:[%s7060_s2 + $0x690] sm:$0xff]  ;;  %v264_v23 = vld [vmem:[%s7060_s2 + $0x6d8] sm:$0xff] }
  0x48   :  { %3207 = vmatprep.subr.bf16.mxu1 %v3206_v34  ;;  %638 = vmatprep.mubr.f32.mxu0 %v477_v38  ;;  %v3226_v34 = vpack.c.bf16 %v228_v27, %v224_v26  ;;  %v3242_v19 = vpack.c.bf16 %v260_v12, %v256_v10  ;;  %v262_v21 = vld [vmem:[%s7060_s2 + $0x6c8] sm:$0xff]  ;;  %v268_v26 = vld [vmem:[%s7060_s2 + $0x6f8] sm:$0xff]  ;;  %vm2734_vm7 = vmor %vm2733_vm6, %vm2732_vm5 }
  0x49   :  { %922 = vmatprep.mubr.f32.mxu1 %v477_v38  ;;  %v232_v38 = vld [vmem:[%s7060_s2 + $0x5d8] sm:$0xff]  ;;  %v266_v22 = vld [vmem:[%s7060_s2 + $0x6e8] sm:$0xff] }
  0x4a   :  { %3013 = vmatpush1.bf16.msra.mxu0 %v3012_v41  ;;  %v3228_v41 = vpack.c.bf16 %v227_v35, %v223_v33  ;;  %v3230_v46 = vpack.c.bf16 %v236_v39, %v232_v38  ;;  %v3246_v33 = vpack.c.bf16 %v268_v26, %v264_v23  ;;  %v270_v35 = vld [vmem:[%s7060_s2 + $0x708] sm:$0xff]  ;;  %v276_v38 = vld [vmem:[%s7060_s2 + $0x738] sm:$0xff] }
  0x4b   :  { %3209 = vmatpush1.bf16.msra.mxu1 %v3208_v42  ;;  %3015 = vmatprep.subr.bf16.mxu0 %v3014_v43  ;;  %v3034_v42 = vpack.c.bf16 %v234_v37, %v230_v36  ;;  %v229_v43 = vld [vmem:[%s7060_s2 + $0x5c0] sm:$0xff]  ;;  %v274_v36 = vld [vmem:[%s7060_s2 + $0x728] sm:$0xff]  ;;  %v272_v37 = vld [vmem:[%s7060_s2 + $0x718] sm:$0xff] }
  0x4c   :  { %3211 = vmatprep.subr.bf16.mxu1 %v3210_v47  ;;  %v235_v47 = vld [vmem:[%s7060_s2 + $0x5f0] sm:$0xff]  ;;  %v3036_v51 = vpack.c.bf16 %v233_v44, %v229_v43  ;;  %v273_v43 = vld [vmem:[%s7060_s2 + $0x720] sm:$0xff]  ;;  %v292_v62 = vld [vmem:[%s7060_s2 + $0x7b8] sm:$0xff] }
  0x4d   :  { %v271_v44 = vld [vmem:[%s7060_s2 + $0x710] sm:$0xff]  ;;  %v300_v10 = vld [vmem:[%s7060_s2 + $0x7f8] sm:$0xff] }
  0x4e   :  { %3017 = vmatpush1.bf16.msra.mxu0 %v3016_v52  ;;  %v3232_v52 = vpack.c.bf16 %v235_v47, %v231_v45  ;;  %v3250_v45 = vpack.c.bf16 %v276_v38, %v272_v37  ;;  %v278_v47 = vld [vmem:[%s7060_s2 + $0x748] sm:$0xff]  ;;  %v304_v23 = vld [vmem:[%s7060_s2 + $0x818] sm:$0xff] }
  0x4f   :  { %3213 = vmatpush1.bf16.msra.mxu1 %v3212_v53  ;;  %3019 = vmatprep.subr.bf16.mxu0 %v3018_v54  ;;  %v3038_v53 = vpack.c.bf16 %v242_v48, %v238_v25  ;;  %v237_v54 = vld [vmem:[%s7060_s2 + $0x600] sm:$0xff]  ;;  %v282_v25 = vld [vmem:[%s7060_s2 + $0x768] sm:$0xff]  ;;  %v280_v48 = vld [vmem:[%s7060_s2 + $0x758] sm:$0xff] }
  0x50   :  { %3215 = vmatprep.subr.bf16.mxu1 %v3214_v58  ;;  %v243_v58 = vld [vmem:[%s7060_s2 + $0x630] sm:$0xff]  ;;  %v3040_v0 = vpack.c.bf16 %v241_v55, %v237_v54  ;;  %v281_v54 = vld [vmem:[%s7060_s2 + $0x760] sm:$0xff]  ;;  %v308_v26 = vld [vmem:[%s7060_s2 + $0x838] sm:$0xff] }
  0x51   :  { %v279_v55 = vld [vmem:[%s7060_s2 + $0x750] sm:$0xff]  ;;  %v312_v38 = vld [vmem:[%s7060_s2 + $0x858] sm:$0xff] }
  0x52   :  { %3021 = vmatpush1.bf16.msra.mxu0 %v3020_v1  ;;  %v3236_v1 = vpack.c.bf16 %v243_v58, %v239_v56  ;;  %v3254_v56 = vpack.c.bf16 %v284_v49, %v280_v48  ;;  %v286_v58 = vld [vmem:[%s7060_s2 + $0x788] sm:$0xff] }
  0x53   :  { %3217 = vmatpush1.bf16.msra.mxu1 %v3216_v2  ;;  %3023 = vmatprep.subr.bf16.mxu0 %v3022_v3  ;;  %v3042_v2 = vpack.c.bf16 %v250_v60, %v246_v59  ;;  %v245_v3 = vld [vmem:[%s7060_s2 + $0x640] sm:$0xff]  ;;  %v290_v59 = vld [vmem:[%s7060_s2 + $0x7a8] sm:$0xff]  ;;  %v288_v60 = vld [vmem:[%s7060_s2 + $0x798] sm:$0xff] }
  0x54   :  { %3219 = vmatprep.subr.bf16.mxu1 %v3218_v7  ;;  %v251_v7 = vld [vmem:[%s7060_s2 + $0x670] sm:$0xff]  ;;  %v3044_v13 = vpack.c.bf16 %v249_v4, %v245_v3  ;;  %v289_v3 = vld [vmem:[%s7060_s2 + $0x7a0] sm:$0xff]  ;;  %v322_v48 = vld [vmem:[%s7060_s2 + $0x8a8] sm:$0xff] }
  0x55   :  { %v287_v4 = vld [vmem:[%s7060_s2 + $0x790] sm:$0xff] }
  0x56   :  { %3025 = vmatpush1.bf16.msra.mxu0 %v3024_v14  ;;  %v3240_v14 = vpack.c.bf16 %v251_v7, %v247_v5  ;;  %v3258_v5 = vpack.c.bf16 %v292_v62, %v288_v60  ;;  %v294_v7 = vld [vmem:[%s7060_s2 + $0x7c8] sm:$0xff]  ;;  %v328_v62 = vld [vmem:[%s7060_s2 + $0x8d8] sm:$0xff] }
  0x57   :  { %3221 = vmatpush1.bf16.msra.mxu1 %v3220_v15  ;;  %3027 = vmatprep.subr.bf16.mxu0 %v3026_v16  ;;  %v3046_v15 = vpack.c.bf16 %v258_v9, %v254_v8  ;;  %v253_v16 = vld [vmem:[%s7060_s2 + $0x680] sm:$0xff]  ;;  %v298_v8 = vld [vmem:[%s7060_s2 + $0x7e8] sm:$0xff]  ;;  %v296_v9 = vld [vmem:[%s7060_s2 + $0x7d8] sm:$0xff] }
  0x58   :  { %3223 = vmatprep.subr.bf16.mxu1 %v3222_v20  ;;  %v259_v20 = vld [vmem:[%s7060_s2 + $0x6b0] sm:$0xff]  ;;  %v3048_v27 = vpack.c.bf16 %v257_v17, %v253_v16  ;;  %v297_v16 = vld [vmem:[%s7060_s2 + $0x7e0] sm:$0xff]  ;;  %v330_v60 = vld [vmem:[%s7060_s2 + $0x8e8] sm:$0xff] }
  0x59   :  { %v295_v17 = vld [vmem:[%s7060_s2 + $0x7d0] sm:$0xff] }
  0x5a   :  { %3029 = vmatpush1.bf16.msra.mxu0 %v3028_v28  ;;  %v3244_v28 = vpack.c.bf16 %v259_v20, %v255_v18  ;;  %v3262_v18 = vpack.c.bf16 %v300_v10, %v296_v9  ;;  %v302_v20 = vld [vmem:[%s7060_s2 + $0x808] sm:$0xff]  ;;  %v336_v10 = vld [vmem:[%s7060_s2 + $0x918] sm:$0xff] }
  0x5b   :  { %3225 = vmatpush1.bf16.msra.mxu1 %v3224_v29  ;;  %3031 = vmatprep.subr.bf16.mxu0 %v3030_v30  ;;  %v3050_v29 = vpack.c.bf16 %v266_v22, %v262_v21  ;;  %v261_v30 = vld [vmem:[%s7060_s2 + $0x6c0] sm:$0xff]  ;;  %v306_v21 = vld [vmem:[%s7060_s2 + $0x828] sm:$0xff] }
  0x5c   :  { %3227 = vmatprep.subr.bf16.mxu1 %v3226_v34  ;;  %v267_v34 = vld [vmem:[%s7060_s2 + $0x6f0] sm:$0xff]  ;;  %v3052_v39 = vpack.c.bf16 %v265_v31, %v261_v30  ;;  %v4844_v22 = vld [vmem:[%s7061_s0 + $0x8] sm:$0x3f]  ;;  %v301_v30 = vld [vmem:[%s7060_s2 + $0x800] sm:$0xff] }
  0x5d   :  { %v305_v31 = vld [vmem:[%s7060_s2 + $0x820] sm:$0xff]  ;;  %v4872_v37 = vrot.slane %v4844_v22, %v4321_v11  ;;  %v338_v9 = vld [vmem:[%s7060_s2 + $0x928] sm:$0xff] }
  0x5e   :  { %3033 = vmatpush1.bf16.msra.mxu0 %v3032_v40  ;;  %v3248_v40 = vpack.c.bf16 %v267_v34, %v263_v32  ;;  %v303_v32 = vld [vmem:[%s7060_s2 + $0x810] sm:$0xff] }
  0x5f   :  { %3229 = vmatpush1.bf16.msra.mxu1 %v3228_v41  ;;  %3035 = vmatprep.subr.bf16.mxu0 %v3034_v42  ;;  %v3054_v41 = vpack.c.bf16 %v274_v36, %v270_v35  ;;  %v269_v42 = vld [vmem:[%s7060_s2 + $0x700] sm:$0xff]  ;;  %v307_v34 = vld [vmem:[%s7060_s2 + $0x830] sm:$0xff]  ;;  %v310_v35 = vld [vmem:[%s7060_s2 + $0x848] sm:$0xff]  ;;  %v493_v49 = vcombine.high %v4872_v37, %v4872_v37 }
  0x60   :  { %3231 = vmatprep.subr.bf16.mxu1 %v3230_v46  ;;  %v275_v46 = vld [vmem:[%s7060_s2 + $0x730] sm:$0xff]  ;;  %v3056_v50 = vpack.c.bf16 %v273_v43, %v269_v42  ;;  %v314_v36 = vld [vmem:[%s7060_s2 + $0x868] sm:$0xff]  ;;  %v309_v43 = vld [vmem:[%s7060_s2 + $0x840] sm:$0xff] }
  0x61   :  { %v3074_v42 = vpack.c.bf16 %v314_v36, %v310_v35  ;;  %v347_v35 = vld [vmem:[%s7060_s2 + $0x970] sm:$0xff]  ;;  %v350_v36 = vld [vmem:[%s7060_s2 + $0x988] sm:$0xff] }
  0x62   :  { %3037 = vmatpush1.bf16.msra.mxu0 %v3036_v51  ;;  %v3252_v51 = vpack.c.bf16 %v275_v46, %v271_v44  ;;  %v313_v44 = vld [vmem:[%s7060_s2 + $0x860] sm:$0xff] }
  0x63   :  { %3233 = vmatpush1.bf16.msra.mxu1 %v3232_v52  ;;  %3039 = vmatprep.subr.bf16.mxu0 %v3038_v53  ;;  %v3058_v52 = vpack.c.bf16 %v282_v25, %v278_v47  ;;  %v277_v53 = vld [vmem:[%s7060_s2 + $0x740] sm:$0xff]  ;;  %v315_v47 = vld [vmem:[%s7060_s2 + $0x870] sm:$0xff]  ;;  %v318_v25 = vld [vmem:[%s7060_s2 + $0x888] sm:$0xff] }
  0x64   :  { %3235 = vmatprep.subr.bf16.mxu1 %v3234_v57  ;;  %v283_v57 = vld [vmem:[%s7060_s2 + $0x770] sm:$0xff]  ;;  %v3060_v63 = vpack.c.bf16 %v281_v54, %v277_v53  ;;  %v3078_v54 = vpack.c.bf16 %v322_v48, %v318_v25  ;;  %v358_v48 = vld [vmem:[%s7060_s2 + $0x9c8] sm:$0xff] }
  0x65   :  { %v355_v25 = vld [vmem:[%s7060_s2 + $0x9b0] sm:$0xff] }
  0x66   :  { %3041 = vmatpush1.bf16.msra.mxu0 %v3040_v0  ;;  %v3256_v0 = vpack.c.bf16 %v283_v57, %v279_v55  ;;  %v317_v55 = vld [vmem:[%s7060_s2 + $0x880] sm:$0xff]  ;;  %v319_v57 = vld [vmem:[%s7060_s2 + $0x890] sm:$0xff] }
  0x67   :  { %3237 = vmatpush1.bf16.msra.mxu1 %v3236_v1  ;;  %3043 = vmatprep.subr.bf16.mxu0 %v3042_v2  ;;  %v3062_v1 = vpack.c.bf16 %v290_v59, %v286_v58  ;;  %v285_v2 = vld [vmem:[%s7060_s2 + $0x780] sm:$0xff]  ;;  %v326_v59 = vld [vmem:[%s7060_s2 + $0x8c8] sm:$0xff] }
  0x68   :  { %3239 = vmatprep.subr.bf16.mxu1 %v3238_v6  ;;  %v291_v6 = vld [vmem:[%s7060_s2 + $0x7b0] sm:$0xff]  ;;  %v3064_v12 = vpack.c.bf16 %v289_v3, %v285_v2  ;;  %v3082_v2 = vpack.c.bf16 %v330_v60, %v326_v59  ;;  %v325_v3 = vld [vmem:[%s7060_s2 + $0x8c0] sm:$0xff]  ;;  %v366_v59 = vld [vmem:[%s7060_s2 + $0xa08] sm:$0xff] }
  0x69   :  { %v370_v60 = vld [vmem:[%s7060_s2 + $0xa28] sm:$0xff] }
  0x6a   :  { %3045 = vmatpush1.bf16.msra.mxu0 %v3044_v13  ;;  %v3260_v13 = vpack.c.bf16 %v291_v6, %v287_v4  ;;  %v329_v4 = vld [vmem:[%s7060_s2 + $0x8e0] sm:$0xff] }
  0x6b   :  { %3241 = vmatpush1.bf16.msra.mxu1 %v3240_v14  ;;  %3047 = vmatprep.subr.bf16.mxu0 %v3046_v15  ;;  %v3066_v14 = vpack.c.bf16 %v298_v8, %v294_v7  ;;  %v293_v15 = vld [vmem:[%s7060_s2 + $0x7c0] sm:$0xff]  ;;  %v331_v7 = vld [vmem:[%s7060_s2 + $0x8f0] sm:$0xff]  ;;  %v334_v8 = vld [vmem:[%s7060_s2 + $0x908] sm:$0xff] }
  0x6c   :  { %3243 = vmatprep.subr.bf16.mxu1 %v3242_v19  ;;  %v299_v19 = vld [vmem:[%s7060_s2 + $0x7f0] sm:$0xff] }
  0x6e   :  { %3049 = vmatpush1.bf16.msra.mxu0 %v3048_v27  ;;  %v3068_v27 = vpack.c.bf16 %v297_v16, %v293_v15  ;;  %v3086_v15 = vpack.c.bf16 %v338_v9, %v334_v8  ;;  %v333_v16 = vld [vmem:[%s7060_s2 + $0x900] sm:$0xff]  ;;  %v374_v8 = vld [vmem:[%s7060_s2 + $0xa48] sm:$0xff] }
  0x6f   :  { %3245 = vmatpush1.bf16.msra.mxu1 %v3244_v28  ;;  %3051 = vmatprep.subr.bf16.mxu0 %v3050_v29  ;;  %v3264_v28 = vpack.c.bf16 %v299_v19, %v295_v17  ;;  %v3070_v29 = vpack.c.bf16 %v306_v21, %v302_v20  ;;  %v337_v17 = vld [vmem:[%s7060_s2 + $0x920] sm:$0xff]  ;;  %v339_v20 = vld [vmem:[%s7060_s2 + $0x930] sm:$0xff]  ;;  %v342_v21 = vld [vmem:[%s7060_s2 + $0x948] sm:$0xff] }
  0x70   :  { %3247 = vmatprep.subr.bf16.mxu1 %v3246_v33  ;;  %v3266_v33 = vpack.c.bf16 %v308_v26, %v304_v23  ;;  %v346_v23 = vld [vmem:[%s7060_s2 + $0x968] sm:$0xff]  ;;  %v344_v26 = vld [vmem:[%s7060_s2 + $0x958] sm:$0xff] }
  0x71   :  { %v378_v9 = vld [vmem:[%s7060_s2 + $0xa68] sm:$0xff] }
  0x72   :  { %3053 = vmatpush1.bf16.msra.mxu0 %v3052_v39  ;;  %v316_v39 = vld [vmem:[%s7060_s2 + $0x878] sm:$0xff] }
  0x73   :  { %3249 = vmatpush1.bf16.msra.mxu1 %v3248_v40  ;;  %3055 = vmatprep.subr.bf16.mxu0 %v3054_v41  ;;  %v3072_v40 = vpack.c.bf16 %v305_v31, %v301_v30  ;;  %v3268_v41 = vpack.c.bf16 %v307_v34, %v303_v32  ;;  %v3270_v46 = vpack.c.bf16 %v316_v39, %v312_v38  ;;  %v341_v31 = vld [vmem:[%s7060_s2 + $0x940] sm:$0xff]  ;;  %v354_v38 = vld [vmem:[%s7060_s2 + $0x9a8] sm:$0xff]  ;;  %v352_v39 = vld [vmem:[%s7060_s2 + $0x998] sm:$0xff] }
  0x74   :  { %3251 = vmatprep.subr.bf16.mxu1 %v3250_v45  ;;  %v311_v45 = vld [vmem:[%s7060_s2 + $0x850] sm:$0xff]  ;;  %v3090_v30 = vpack.c.bf16 %v346_v23, %v342_v21  ;;  %v345_v32 = vld [vmem:[%s7060_s2 + $0x960] sm:$0xff]  ;;  %v382_v21 = vld [vmem:[%s7060_s2 + $0xa88] sm:$0xff] }
  0x75   :  { %v3272_v53 = vpack.c.bf16 %v315_v47, %v311_v45  ;;  %v353_v45 = vld [vmem:[%s7060_s2 + $0x9a0] sm:$0xff]  ;;  %v386_v23 = vld [vmem:[%s7060_s2 + $0xaa8] sm:$0xff] }
  0x76   :  { %3057 = vmatpush1.bf16.msra.mxu0 %v3056_v50  ;;  %v320_v50 = vld [vmem:[%s7060_s2 + $0x898] sm:$0xff] }
  0x77   :  { %3253 = vmatpush1.bf16.msra.mxu1 %v3252_v51  ;;  %3059 = vmatprep.subr.bf16.mxu0 %v3058_v52  ;;  %v324_v51 = vld [vmem:[%s7060_s2 + $0x8b8] sm:$0xff]  ;;  %v3076_v52 = vpack.c.bf16 %v313_v44, %v309_v43  ;;  %v3094_v43 = vpack.c.bf16 %v354_v38, %v350_v36  ;;  %v349_v44 = vld [vmem:[%s7060_s2 + $0x980] sm:$0xff]  ;;  %v390_v36 = vld [vmem:[%s7060_s2 + $0xac8] sm:$0xff] }
  0x78   :  { %3255 = vmatprep.subr.bf16.mxu1 %v3254_v56  ;;  %v321_v56 = vld [vmem:[%s7060_s2 + $0x8a0] sm:$0xff]  ;;  %v3274_v58 = vpack.c.bf16 %v324_v51, %v320_v50  ;;  %v360_v50 = vld [vmem:[%s7060_s2 + $0x9d8] sm:$0xff]  ;;  %v394_v38 = vld [vmem:[%s7060_s2 + $0xae8] sm:$0xff] }
  0x79   :  { %v364_v51 = vld [vmem:[%s7060_s2 + $0x9f8] sm:$0xff] }
  0x7a   :  { %3061 = vmatpush1.bf16.msra.mxu0 %v3060_v63  ;;  %v332_v63 = vld [vmem:[%s7060_s2 + $0x8f8] sm:$0xff] }
  0x7b   :  { %3257 = vmatpush1.bf16.msra.mxu1 %v3256_v0  ;;  %3063 = vmatprep.subr.bf16.mxu0 %v3062_v1  ;;  %v3080_v0 = vpack.c.bf16 %v321_v56, %v317_v55  ;;  %v3278_v6 = vpack.c.bf16 %v332_v63, %v328_v62  ;;  %v357_v55 = vld [vmem:[%s7060_s2 + $0x9c0] sm:$0xff]  ;;  %v368_v62 = vld [vmem:[%s7060_s2 + $0xa18] sm:$0xff] }
  0x7c   :  { %3259 = vmatprep.subr.bf16.mxu1 %v3258_v5  ;;  %v327_v5 = vld [vmem:[%s7060_s2 + $0x8d0] sm:$0xff]  ;;  %v361_v56 = vld [vmem:[%s7060_s2 + $0x9e0] sm:$0xff]  ;;  %v372_v63 = vld [vmem:[%s7060_s2 + $0xa38] sm:$0xff] }
  0x7e   :  { %3065 = vmatpush1.bf16.msra.mxu0 %v3064_v12  ;;  %v340_v12 = vld [vmem:[%s7060_s2 + $0x938] sm:$0xff] }
  0x7f   :  { %3261 = vmatpush1.bf16.msra.mxu1 %v3260_v13  ;;  %3067 = vmatprep.subr.bf16.mxu0 %v3066_v14  ;;  %v3084_v13 = vpack.c.bf16 %v329_v4, %v325_v3  ;;  %v3280_v14 = vpack.c.bf16 %v331_v7, %v327_v5  ;;  %v3282_v19 = vpack.c.bf16 %v340_v12, %v336_v10  ;;  %v365_v3 = vld [vmem:[%s7060_s2 + $0xa00] sm:$0xff]  ;;  %v367_v5 = vld [vmem:[%s7060_s2 + $0xa10] sm:$0xff]  ;;  %v376_v10 = vld [vmem:[%s7060_s2 + $0xa58] sm:$0xff] }
  0x80   :  { %3263 = vmatprep.subr.bf16.mxu1 %v3262_v18  ;;  %v335_v18 = vld [vmem:[%s7060_s2 + $0x910] sm:$0xff]  ;;  %v369_v4 = vld [vmem:[%s7060_s2 + $0xa20] sm:$0xff]  ;;  %v380_v12 = vld [vmem:[%s7060_s2 + $0xa78] sm:$0xff] }
  0x81   :  { %v371_v7 = vld [vmem:[%s7060_s2 + $0xa30] sm:$0xff] }
  0x82   :  { %3069 = vmatpush1.bf16.msra.mxu0 %v3068_v27  ;;  %v348_v27 = vld [vmem:[%s7060_s2 + $0x978] sm:$0xff] }
  0x83   :  { %3265 = vmatpush1.bf16.msra.mxu1 %v3264_v28  ;;  %3071 = vmatprep.subr.bf16.mxu0 %v3070_v29  ;;  %v3088_v28 = vpack.c.bf16 %v337_v17, %v333_v16  ;;  %v3284_v29 = vpack.c.bf16 %v339_v20, %v335_v18  ;;  %v3286_v34 = vpack.c.bf16 %v348_v27, %v344_v26  ;;  %v373_v16 = vld [vmem:[%s7060_s2 + $0xa40] sm:$0xff]  ;;  %v375_v18 = vld [vmem:[%s7060_s2 + $0xa50] sm:$0xff]  ;;  %v384_v26 = vld [vmem:[%s7060_s2 + $0xa98] sm:$0xff] }
  0x84   :  { %3267 = vmatprep.subr.bf16.mxu1 %v3266_v33  ;;  %v343_v33 = vld [vmem:[%s7060_s2 + $0x950] sm:$0xff]  ;;  %v377_v17 = vld [vmem:[%s7060_s2 + $0xa60] sm:$0xff]  ;;  %v388_v27 = vld [vmem:[%s7060_s2 + $0xab8] sm:$0xff] }
  0x85   :  { %639 = vmatmul.mubr.f32.vlgmr.msra.gmra.mrb[0].mxu0 %v4475_v24  ;;  %v379_v20 = vld [vmem:[%s7060_s2 + $0xa70] sm:$0xff] }
  0x86   :  { %3073 = vmatpush1.bf16.msra.mxu0 %v3072_v40  ;;  %923 = vmatmul.mubr.f32.vlgmr.msra.gmra.mrb[0].mxu1 %v4475_v24  ;;  %v323_v24 = vld [vmem:[%s7060_s2 + $0x8b0] sm:$0xff]  ;;  %v356_v40 = vld [vmem:[%s7060_s2 + $0x9b8] sm:$0xff] }
  0x87   :  { %3269 = vmatpush1.bf16.msra.mxu1 %v3268_v41  ;;  %3075 = vmatprep.subr.bf16.mxu0 %v3074_v42  ;;  %v3276_v1 = vpack.c.bf16 %v323_v24, %v319_v57  ;;  %v3092_v41 = vpack.c.bf16 %v345_v32, %v341_v31  ;;  %v3288_v42 = vpack.c.bf16 %v347_v35, %v343_v33  ;;  %v359_v57 = vld [vmem:[%s7060_s2 + $0x9d0] sm:$0xff]  ;;  %v381_v31 = vld [vmem:[%s7060_s2 + $0xa80] sm:$0xff] }
  0x88   :  { %3271 = vmatprep.subr.bf16.mxu1 %v3270_v46  ;;  %709 = vmatprep.mubr.f32.mxu0 %v493_v49  ;;  %v351_v46 = vld [vmem:[%s7060_s2 + $0x990] sm:$0xff]  ;;  %v3290_v47 = vpack.c.bf16 %v356_v40, %v352_v39  ;;  %v385_v32 = vld [vmem:[%s7060_s2 + $0xaa0] sm:$0xff]  ;;  %v392_v39 = vld [vmem:[%s7060_s2 + $0xad8] sm:$0xff] }
  0x89   :  { %993 = vmatprep.mubr.f32.mxu1 %v493_v49  ;;  %v362_v49 = vld [vmem:[%s7060_s2 + $0x9e8] sm:$0xff]  ;;  %v363_v24 = vld [vmem:[%s7060_s2 + $0x9f0] sm:$0xff]  ;;  %v396_v40 = vld [vmem:[%s7060_s2 + $0xaf8] sm:$0xff] }
  0x8a   :  { %3077 = vmatpush1.bf16.msra.mxu0 %v3076_v52  ;;  %v3096_v52 = vpack.c.bf16 %v353_v45, %v349_v44  ;;  %v383_v33 = vld [vmem:[%s7060_s2 + $0xa90] sm:$0xff]  ;;  %v389_v44 = vld [vmem:[%s7060_s2 + $0xac0] sm:$0xff] }
  0x8b   :  { %3273 = vmatpush1.bf16.msra.mxu1 %v3272_v53  ;;  %3079 = vmatprep.subr.bf16.mxu0 %v3078_v54  ;;  %v3292_v53 = vpack.c.bf16 %v355_v25, %v351_v46  ;;  %v3098_v54 = vpack.c.bf16 %v362_v49, %v358_v48  ;;  %v387_v35 = vld [vmem:[%s7060_s2 + $0xab0] sm:$0xff]  ;;  %v393_v45 = vld [vmem:[%s7060_s2 + $0xae0] sm:$0xff]  ;;  %v398_v48 = vld [vmem:[%s7060_s2 + $0xb08] sm:$0xff] }
  0x8c   :  { %3275 = vmatprep.subr.bf16.mxu1 %v3274_v58  ;;  %v3294_v58 = vpack.c.bf16 %v364_v51, %v360_v50  ;;  %v391_v46 = vld [vmem:[%s7060_s2 + $0xad0] sm:$0xff]  ;;  %v402_v49 = vld [vmem:[%s7060_s2 + $0xb28] sm:$0xff]  ;;  %v400_v50 = vld [vmem:[%s7060_s2 + $0xb18] sm:$0xff] }
  0x8d   :  { %v395_v25 = vld [vmem:[%s7060_s2 + $0xaf0] sm:$0xff]  ;;  %v404_v51 = vld [vmem:[%s7060_s2 + $0xb38] sm:$0xff] }
  0x8e   :  { %3081 = vmatpush1.bf16.msra.mxu0 %v3080_v0  ;;  %v3100_v0 = vpack.c.bf16 %v361_v56, %v357_v55  ;;  %v397_v55 = vld [vmem:[%s7060_s2 + $0xb00] sm:$0xff] }
  0x8f   :  { %3277 = vmatpush1.bf16.msra.mxu1 %v3276_v1  ;;  %3083 = vmatprep.subr.bf16.mxu0 %v3082_v2  ;;  %v3296_v1 = vpack.c.bf16 %v363_v24, %v359_v57  ;;  %v3102_v2 = vpack.c.bf16 %v370_v60, %v366_v59  ;;  %v401_v56 = vld [vmem:[%s7060_s2 + $0xb20] sm:$0xff]  ;;  %v399_v57 = vld [vmem:[%s7060_s2 + $0xb10] sm:$0xff]  ;;  %v406_v59 = vld [vmem:[%s7060_s2 + $0xb48] sm:$0xff] }
  0x90   :  { %3279 = vmatprep.subr.bf16.mxu1 %v3278_v6  ;;  %v3298_v6 = vpack.c.bf16 %v372_v63, %v368_v62  ;;  %v403_v24 = vld [vmem:[%s7060_s2 + $0xb30] sm:$0xff]  ;;  %v410_v60 = vld [vmem:[%s7060_s2 + $0xb68] sm:$0xff]  ;;  %v408_v62 = vld [vmem:[%s7060_s2 + $0xb58] sm:$0xff] }
  0x91   :  { %v412_v63 = vld [vmem:[%s7060_s2 + $0xb78] sm:$0xff] }
  0x92   :  { %3085 = vmatpush1.bf16.msra.mxu0 %v3084_v13  ;;  %v3104_v13 = vpack.c.bf16 %v369_v4, %v365_v3  ;;  %v405_v3 = vld [vmem:[%s7060_s2 + $0xb40] sm:$0xff] }
  0x93   :  { %3281 = vmatpush1.bf16.msra.mxu1 %v3280_v14  ;;  %3087 = vmatprep.subr.bf16.mxu0 %v3086_v15  ;;  %v3300_v14 = vpack.c.bf16 %v371_v7, %v367_v5  ;;  %v3106_v15 = vpack.c.bf16 %v378_v9, %v374_v8  ;;  %v409_v4 = vld [vmem:[%s7060_s2 + $0xb60] sm:$0xff]  ;;  %v407_v5 = vld [vmem:[%s7060_s2 + $0xb50] sm:$0xff]  ;;  %v414_v8 = vld [vmem:[%s7060_s2 + $0xb88] sm:$0xff] }
  0x94   :  { %3283 = vmatprep.subr.bf16.mxu1 %v3282_v19  ;;  %v3302_v19 = vpack.c.bf16 %v380_v12, %v376_v10  ;;  %v411_v7 = vld [vmem:[%s7060_s2 + $0xb70] sm:$0xff]  ;;  %v418_v9 = vld [vmem:[%s7060_s2 + $0xba8] sm:$0xff]  ;;  %v416_v10 = vld [vmem:[%s7060_s2 + $0xb98] sm:$0xff] }
  0x95   :  { %v420_v12 = vld [vmem:[%s7060_s2 + $0xbb8] sm:$0xff] }
  0x96   :  { %3089 = vmatpush1.bf16.msra.mxu0 %v3088_v28  ;;  %v3108_v28 = vpack.c.bf16 %v377_v17, %v373_v16  ;;  %v413_v16 = vld [vmem:[%s7060_s2 + $0xb80] sm:$0xff] }
  0x97   :  { %3285 = vmatpush1.bf16.msra.mxu1 %v3284_v29  ;;  %3091 = vmatprep.subr.bf16.mxu0 %v3090_v30  ;;  %v3304_v29 = vpack.c.bf16 %v379_v20, %v375_v18  ;;  %v3110_v30 = vpack.c.bf16 %v386_v23, %v382_v21  ;;  %v417_v17 = vld [vmem:[%s7060_s2 + $0xba0] sm:$0xff]  ;;  %v415_v18 = vld [vmem:[%s7060_s2 + $0xb90] sm:$0xff]  ;;  %v422_v21 = vld [vmem:[%s7060_s2 + $0xbc8] sm:$0xff] }
  0x98   :  { %3287 = vmatprep.subr.bf16.mxu1 %v3286_v34  ;;  %v3306_v34 = vpack.c.bf16 %v388_v27, %v384_v26  ;;  %v419_v20 = vld [vmem:[%s7060_s2 + $0xbb0] sm:$0xff]  ;;  %v426_v23 = vld [vmem:[%s7060_s2 + $0xbe8] sm:$0xff]  ;;  %v424_v26 = vld [vmem:[%s7060_s2 + $0xbd8] sm:$0xff] }
  0x99   :  { %v428_v27 = vld [vmem:[%s7060_s2 + $0xbf8] sm:$0xff] }
  0x9a   :  { %3093 = vmatpush1.bf16.msra.mxu0 %v3092_v41  ;;  %v3112_v41 = vpack.c.bf16 %v385_v32, %v381_v31  ;;  %v421_v31 = vld [vmem:[%s7060_s2 + $0xbc0] sm:$0xff] }
  0x9b   :  { %3289 = vmatpush1.bf16.msra.mxu1 %v3288_v42  ;;  %3095 = vmatprep.subr.bf16.mxu0 %v3094_v43  ;;  %v3308_v42 = vpack.c.bf16 %v387_v35, %v383_v33  ;;  %v3114_v43 = vpack.c.bf16 %v394_v38, %v390_v36  ;;  %v425_v32 = vld [vmem:[%s7060_s2 + $0xbe0] sm:$0xff]  ;;  %v423_v33 = vld [vmem:[%s7060_s2 + $0xbd0] sm:$0xff]  ;;  %v430_v36 = vld [vmem:[%s7060_s2 + $0xc08] sm:$0xff] }
  0x9c   :  { %3291 = vmatprep.subr.bf16.mxu1 %v3290_v47  ;;  %v3310_v47 = vpack.c.bf16 %v396_v40, %v392_v39  ;;  %v427_v35 = vld [vmem:[%s7060_s2 + $0xbf0] sm:$0xff]  ;;  %v434_v38 = vld [vmem:[%s7060_s2 + $0xc28] sm:$0xff]  ;;  %v432_v39 = vld [vmem:[%s7060_s2 + $0xc18] sm:$0xff] }
  0x9d   :  { %v436_v40 = vld [vmem:[%s7060_s2 + $0xc38] sm:$0xff] }
  0x9e   :  { %3097 = vmatpush1.bf16.msra.mxu0 %v3096_v52  ;;  %v3116_v52 = vpack.c.bf16 %v393_v45, %v389_v44  ;;  %v429_v44 = vld [vmem:[%s7060_s2 + $0xc00] sm:$0xff] }
  0x9f   :  { %3293 = vmatpush1.bf16.msra.mxu1 %v3292_v53  ;;  %3099 = vmatprep.subr.bf16.mxu0 %v3098_v54  ;;  %v3312_v53 = vpack.c.bf16 %v395_v25, %v391_v46  ;;  %v3118_v54 = vpack.c.bf16 %v402_v49, %v398_v48  ;;  %v433_v45 = vld [vmem:[%s7060_s2 + $0xc20] sm:$0xff]  ;;  %v3330_v46 = vpack.c.bf16 %v436_v40, %v432_v39  ;;  %v435_v25 = vld [vmem:[%s7060_s2 + $0xc30] sm:$0xff]  ;;  %v1092_v49 = vld [vmem:[%s7062_s4 + $0x88] sm:$0xff] }
  0xa0   :  { %3295 = vmatprep.subr.bf16.mxu1 %v3294_v58  ;;  %v3314_v58 = vpack.c.bf16 %v404_v51, %v400_v50  ;;  %v1091_v48 = vld [vmem:[%s7062_s4 + $0x80] sm:$0xff]  ;;  %v3136_v50 = vpack.c.bf16 %v433_v45, %v429_v44  ;;  %v5374_v45 = vsub.s32 1, %v4294_v61 }
  0xa1   :  { %v1123_v40 = vld [vmem:[%s7062_s4 + $0x180] sm:$0xff] }
  0xa2   :  { %3101 = vmatpush1.bf16.msra.mxu0 %v3100_v0  ;;  %v3120_v0 = vpack.c.bf16 %v401_v56, %v397_v55  ;;  %v1075_v55 = vld [vmem:[%s7062_s4] sm:$0xff] }
  0xa3   :  { %3297 = vmatpush1.bf16.msra.mxu1 %v3296_v1  ;;  %3103 = vmatprep.subr.bf16.mxu0 %v3102_v2  ;;  %v3316_v1 = vpack.c.bf16 %v403_v24, %v399_v57  ;;  %v3122_v2 = vpack.c.bf16 %v410_v60, %v406_v59  ;;  %v1094_v57 = vld [vmem:[%s7062_s4 + $0x98] sm:$0xff]  ;;  %v1077_v59 = vld [vmem:[%s7062_s4 + $0x10] sm:$0xff]  ;;  %v5371_v44 = vld [vmem:[%s7063_s3] sm:$0xf] }
  0xa4   :  { %3299 = vmatprep.subr.bf16.mxu1 %v3298_v6  ;;  %v3318_v6 = vpack.c.bf16 %v412_v63, %v408_v62  ;;  %v1078_v60 = vld [vmem:[%s7062_s4 + $0x18] sm:$0xff]  ;;  %v1095_v62 = vld [vmem:[%s7062_s4 + $0xa0] sm:$0xff]  ;;  %v1096_v63 = vld [vmem:[%s7062_s4 + $0xa8] sm:$0xff] }
  0xa6   :  { %3105 = vmatpush1.bf16.msra.mxu0 %v3104_v13  ;;  %v3124_v13 = vpack.c.bf16 %v409_v4, %v405_v3  ;;  %v1080_v3 = vld [vmem:[%s7062_s4 + $0x28] sm:$0xff]  ;;  %v1097_v4 = vld [vmem:[%s7062_s4 + $0xb0] sm:$0xff] }
  0xa7   :  { %3301 = vmatpush1.bf16.msra.mxu1 %v3300_v14  ;;  %3107 = vmatprep.subr.bf16.mxu0 %v3106_v15  ;;  %v3320_v14 = vpack.c.bf16 %v411_v7, %v407_v5  ;;  %v3126_v15 = vpack.c.bf16 %v418_v9, %v414_v8  ;;  %v1098_v5 = vld [vmem:[%s7062_s4 + $0xb8] sm:$0xff]  ;;  %v1081_v8 = vld [vmem:[%s7062_s4 + $0x30] sm:$0xff] }
  0xa8   :  { %3303 = vmatprep.subr.bf16.mxu1 %v3302_v19  ;;  %v3322_v19 = vpack.c.bf16 %v420_v12, %v416_v10  ;;  %v3346_v7 = vpack.c.bf16 %v1098_v5, %v1097_v4  ;;  %v1082_v9 = vld [vmem:[%s7062_s4 + $0x38] sm:$0xff]  ;;  %v1099_v10 = vld [vmem:[%s7062_s4 + $0xc0] sm:$0xff]  ;;  %v1100_v12 = vld [vmem:[%s7062_s4 + $0xc8] sm:$0xff] }
  0xaa   :  { %3109 = vmatpush1.bf16.msra.mxu0 %v3108_v28  ;;  %v3128_v28 = vpack.c.bf16 %v417_v17, %v413_v16  ;;  %v1084_v16 = vld [vmem:[%s7062_s4 + $0x48] sm:$0xff]  ;;  %v1101_v17 = vld [vmem:[%s7062_s4 + $0xd0] sm:$0xff] }
  0xab   :  { %3305 = vmatpush1.bf16.msra.mxu1 %v3304_v29  ;;  %3111 = vmatprep.subr.bf16.mxu0 %v3110_v30  ;;  %v3324_v29 = vpack.c.bf16 %v419_v20, %v415_v18  ;;  %v3130_v30 = vpack.c.bf16 %v426_v23, %v422_v21  ;;  %v1102_v18 = vld [vmem:[%s7062_s4 + $0xd8] sm:$0xff]  ;;  %v1085_v21 = vld [vmem:[%s7062_s4 + $0x50] sm:$0xff] }
  0xac   :  { %3307 = vmatprep.subr.bf16.mxu1 %v3306_v34  ;;  %v3326_v34 = vpack.c.bf16 %v428_v27, %v424_v26  ;;  %v3354_v20 = vpack.c.bf16 %v1102_v18, %v1101_v17  ;;  %v1086_v23 = vld [vmem:[%s7062_s4 + $0x58] sm:$0xff]  ;;  %v1103_v26 = vld [vmem:[%s7062_s4 + $0xe0] sm:$0xff]  ;;  %v1104_v27 = vld [vmem:[%s7062_s4 + $0xe8] sm:$0xff] }
  0xae   :  { %3113 = vmatpush1.bf16.msra.mxu0 %v3112_v41  ;;  %v3132_v41 = vpack.c.bf16 %v425_v32, %v421_v31  ;;  %v1088_v31 = vld [vmem:[%s7062_s4 + $0x68] sm:$0xff] }
  0xaf   :  { %3309 = vmatpush1.bf16.msra.mxu1 %v3308_v42  ;;  %3115 = vmatprep.subr.bf16.mxu0 %v3114_v43  ;;  %v3328_v42 = vpack.c.bf16 %v427_v35, %v423_v33  ;;  %v3134_v43 = vpack.c.bf16 %v434_v38, %v430_v36  ;;  %v1105_v33 = vld [vmem:[%s7062_s4 + $0xf0] sm:$0xff]  ;;  %v1090_v38 = vld [vmem:[%s7062_s4 + $0x78] sm:$0xff] }
  0xb0   :  { %3311 = vmatprep.subr.bf16.mxu1 %v3310_v47  ;;  %v431_v47 = vld [vmem:[%s7060_s2 + $0xc10] sm:$0xff] }
  0xb1   :  { %v3332_v51 = vpack.c.bf16 %v435_v25, %v431_v47  ;;  %v1089_v36 = vld [vmem:[%s7062_s4 + $0x70] sm:$0xff]  ;;  %v446_v25 = vrot.slane %v5371_v44, %v5374_v45 }
  0xb2   :  { %3117 = vmatpush1.bf16.msra.mxu0 %v3116_v52  ;;  %v3334_v52 = vpack.c.bf16 %v1092_v49, %v1091_v48  ;;  %v3364_v39 = vpack.c.bf16 %v1090_v38, %v1089_v36  ;;  %v1120_v36 = vld [vmem:[%s7062_s4 + $0x168] sm:$0xff]  ;;  %v1137_v38 = vld [vmem:[%s7062_s4 + $0x1f0] sm:$0xff] }
  0xb3   :  { %3313 = vmatpush1.bf16.msra.mxu1 %v3312_v53  ;;  %3119 = vmatprep.subr.bf16.mxu0 %v3118_v54  ;;  %v478_v53 = vcombine.high %v4844_v22, %v4844_v22  ;;  %v3968_v54 = vmov 0.0   ;;  %v1076_v22 = vld [vmem:[%s7062_s4 + $0x8] sm:$0xff] }
  0xb4   :  { %3315 = vmatprep.subr.bf16.mxu1 %v3314_v58  ;;  %v3336_v58 = vpack.c.bf16 %v1076_v22, %v1075_v55  ;;  %v1108_v55 = vld [vmem:[%s7062_s4 + $0x108] sm:$0xff] }
  0xb5   :  { %v492_v56 = vrot.slane %v478_v53, %v4321_v11  ;;  %v1107_v53 = vld [vmem:[%s7062_s4 + $0x100] sm:$0xff] }
  0xb6   :  { %3121 = vmatpush1.bf16.msra.mxu0 %v3120_v0  ;;  %v3340_v0 = vpack.c.bf16 %v1078_v60, %v1077_v59  ;;  %v3368_v59 = vpack.c.bf16 %v1108_v55, %v1107_v53  ;;  %v1288_v53 = vld [vmem:[%s7064_s6 + $0x8] sm:$0xff] }
  0xb7   :  { %3317 = vmatpush1.bf16.msra.mxu1 %v3316_v1  ;;  %3123 = vmatprep.subr.bf16.mxu0 %v3122_v2  ;;  %v3342_v1 = vpack.c.bf16 %v1096_v63, %v1095_v62  ;;  %v1079_v2 = vld [vmem:[%s7062_s4 + $0x20] sm:$0xff]  ;;  %v1109_v63 = vld [vmem:[%s7062_s4 + $0x110] sm:$0xff] }
  0xb8   :  { %3319 = vmatprep.subr.bf16.mxu1 %v3318_v6  ;;  %v3344_v6 = vpack.c.bf16 %v1080_v3, %v1079_v2  ;;  %v1127_v2 = vld [vmem:[%s7062_s4 + $0x1a0] sm:$0xff]  ;;  %v1128_v3 = vld [vmem:[%s7062_s4 + $0x1a8] sm:$0xff] }
  0xb9   :  { %v3374_v5 = vpack.c.bf16 %v1128_v3, %v1127_v2  ;;  %v1298_v2 = vld [vmem:[%s7064_s6 + $0x58] sm:$0xff] }
  0xba   :  { %3125 = vmatpush1.bf16.msra.mxu0 %v3124_v13  ;;  %v3348_v13 = vpack.c.bf16 %v1082_v9, %v1081_v8  ;;  %v1129_v8 = vld [vmem:[%s7062_s4 + $0x1b0] sm:$0xff]  ;;  %v1130_v9 = vld [vmem:[%s7062_s4 + $0x1b8] sm:$0xff] }
  0xbb   :  { %3321 = vmatpush1.bf16.msra.mxu1 %v3320_v14  ;;  %3127 = vmatprep.subr.bf16.mxu0 %v3126_v15  ;;  %v3350_v14 = vpack.c.bf16 %v1100_v12, %v1099_v10  ;;  %v1083_v15 = vld [vmem:[%s7062_s4 + $0x40] sm:$0xff]  ;;  %v3378_v12 = vpack.c.bf16 %v1130_v9, %v1129_v8  ;;  %v1302_v8 = vld [vmem:[%s7064_s6 + $0x78] sm:$0xff] }
  0xbc   :  { %3323 = vmatprep.subr.bf16.mxu1 %v3322_v19  ;;  %v3352_v19 = vpack.c.bf16 %v1084_v16, %v1083_v15  ;;  %v1131_v15 = vld [vmem:[%s7062_s4 + $0x1c0] sm:$0xff]  ;;  %v1132_v16 = vld [vmem:[%s7062_s4 + $0x1c8] sm:$0xff] }
  0xbd   :  { %v3382_v18 = vpack.c.bf16 %v1132_v16, %v1131_v15  ;;  %v2746_v15 = vld [vmem:[%s7066_s5] ss:$0 sm:$0xff] }
  0xbe   :  { %3129 = vmatpush1.bf16.msra.mxu0 %v3128_v28  ;;  %v3356_v28 = vpack.c.bf16 %v1086_v23, %v1085_v21  ;;  %v1133_v21 = vld [vmem:[%s7062_s4 + $0x1d0] sm:$0xff]  ;;  %v1134_v23 = vld [vmem:[%s7062_s4 + $0x1d8] sm:$0xff] }
  0xbf   :  { %3325 = vmatpush1.bf16.msra.mxu1 %v3324_v29  ;;  %3131 = vmatprep.subr.bf16.mxu0 %v3130_v30  ;;  %v3358_v29 = vpack.c.bf16 %v1104_v27, %v1103_v26  ;;  %v1087_v30 = vld [vmem:[%s7062_s4 + $0x60] sm:$0xff]  ;;  %v3386_v27 = vpack.c.bf16 %v1134_v23, %v1133_v21  ;;  %v1396_v23 = vld [vmem:[%s7067_s8 + $0x8] sm:$0xff] }
  0xc0   :  { %3327 = vmatprep.subr.bf16.mxu1 %v3326_v34  ;;  %v3360_v32 = vpack.c.bf16 %v1088_v31, %v1087_v30  ;;  %v1106_v34 = vld [vmem:[%s7062_s4 + $0xf8] sm:$0xff]  ;;  %v1135_v30 = vld [vmem:[%s7062_s4 + $0x1e0] sm:$0xff]  ;;  %v1136_v31 = vld [vmem:[%s7062_s4 + $0x1e8] sm:$0xff] }
  0xc1   :  { %v3362_v35 = vpack.c.bf16 %v1106_v34, %v1105_v33  ;;  %v5460_v33 = vsub.s32 2, %v4294_v61  ;;  %v3390_v34 = vpack.c.bf16 %v1136_v31, %v1135_v30  ;;  %v1404_v30 = vld [vmem:[%s7067_s8 + $0x48] sm:$0xff] }
  0xc2   :  { %3133 = vmatpush1.bf16.msra.mxu0 %v3132_v41  ;;  %v1124_v41 = vld [vmem:[%s7062_s4 + $0x188] sm:$0xff] }
  0xc3   :  { %3329 = vmatpush1.bf16.msra.mxu1 %v3328_v42  ;;  %3135 = vmatprep.subr.bf16.mxu0 %v3134_v43  ;;  %v3366_v42 = vpack.c.bf16 %v1124_v41, %v1123_v40  ;;  %v5366_v43 = vsub.s32 0, %v4294_v61  ;;  %v450_v41 = vrot.slane %v5371_v44, %v5460_v33  ;;  %v1408_v31 = vld [vmem:[%s7067_s8 + $0x68] sm:$0xff] }
  0xc4   :  { %3331 = vmatprep.subr.bf16.mxu1 %v3330_v46  ;;  %v5377_v46 = vsub.s32 3, %v4294_v61 }
  0xc5   :  { %710 = vmatmul.mubr.f32.vlgmr.msra.gmra.mrb[0].mxu0 %v4872_v37  ;;  %v442_v47 = vrot.slane %v5371_v44, %v5366_v43 }
  0xc6   :  { %994 = vmatmul.mubr.f32.vlgmr.msra.gmra.mrb[0].mxu1 %v4872_v37  ;;  %3137 = vmatpush1.bf16.msra.mxu0 %v3136_v50  ;;  %v1093_v37 = vld [vmem:[%s7062_s4 + $0x90] sm:$0xff]  ;;  %v454_v48 = vrot.slane %v5371_v44, %v5377_v46  ;;  %v3969_v44 = vmov 0.0|0.0  }
  0xc7   :  { %3333 = vmatpush1.bf16.msra.mxu1 %v3332_v51  ;;  %780 = vmatprep.mubr.f32.mxu0 %v3968_v54  ;;  %v3338_v24 = vpack.c.bf16 %v1094_v57, %v1093_v37  ;;  %v1125_v37 = vld [vmem:[%s7062_s4 + $0x190] sm:$0xff]  ;;  %v1126_v57 = vld [vmem:[%s7062_s4 + $0x198] sm:$0xff] }
  0xc8   :  { %1064 = vmatprep.mubr.f32.mxu1 %v3968_v54  ;;  %3335 = vmatprep.subr.bf16.mxu1 %v3334_v52  ;;  %v3370_v62 = vpack.c.bf16 %v1126_v57, %v1125_v37  ;;  %v1291_v37 = vld [vmem:[%s7064_s6 + $0x20] sm:$0xff]  ;;  %v1292_v57 = vld [vmem:[%s7064_s6 + $0x28] sm:$0xff] }
  0xc9   :  { %3398 = vmatprep.subr.bf16.mxu0 %v3969_v44 }
  0xcd   :  { %2744 = vmatmul.mubr.msk.f32.vlgmr.msra.gmra.mrb[0].mxu0 %vm500_vm0, %v492_v56 }
  0xce   :  { %2745 = vmatmul.mubr.msk.f32.vlgmr.msra.gmra.mrb[0].mxu1 %vm500_vm0, %v492_v56  ;;  %2939 = vmatprep.mubr.msk.f32.mxu0 %vm3970_vm1, %v3968_v54 }
  0xcf   :  { %3337 = vmatpush3.bf16.msra.mxu1 %v3336_v58 }
  0xd0   :  { %3339 = vmatprep.subr.bf16.mxu1 %v3338_v24 }
  0xd3   :  { %3341 = vmatpush3.bf16.msra.mxu1 %v3340_v0  ;;  %v1110_v0 = vld [vmem:[%s7062_s4 + $0x118] sm:$0xff] }
  0xd4   :  { %3343 = vmatprep.subr.bf16.mxu1 %v3342_v1  ;;  %v3372_v4 = vpack.c.bf16 %v1110_v0, %v1109_v63  ;;  %v1296_v63 = vld [vmem:[%s7064_s6 + $0x48] sm:$0xff] }
  0xd7   :  { %3345 = vmatpush3.bf16.msra.mxu1 %v3344_v6  ;;  %v1111_v6 = vld [vmem:[%s7062_s4 + $0x120] sm:$0xff] }
  0xd8   :  { %3347 = vmatprep.subr.bf16.mxu1 %v3346_v7  ;;  %v1112_v7 = vld [vmem:[%s7062_s4 + $0x128] sm:$0xff] }
  0xd9   :  { %v3376_v10 = vpack.c.bf16 %v1112_v7, %v1111_v6  ;;  %v1301_v7 = vld [vmem:[%s7064_s6 + $0x70] sm:$0xff] }
  0xda   :  { %v3420_v9 = vpack.c.bf16 %v1302_v8, %v1301_v7  ;;  %v1616_v8 = vld [vmem:[%s7070_s10 + $0x78] sm:$0xff] }
  0xdb   :  { %3349 = vmatpush3.bf16.msra.mxu1 %v3348_v13  ;;  %v1113_v13 = vld [vmem:[%s7062_s4 + $0x130] sm:$0xff] }
  0xdc   :  { %3351 = vmatprep.subr.bf16.mxu1 %v3350_v14  ;;  %v1114_v14 = vld [vmem:[%s7062_s4 + $0x138] sm:$0xff] }
  0xdd   :  { %v3380_v17 = vpack.c.bf16 %v1114_v14, %v1113_v13 }
  0xdf   :  { %3353 = vmatpush3.bf16.msra.mxu1 %v3352_v19  ;;  %v1115_v19 = vld [vmem:[%s7062_s4 + $0x140] sm:$0xff] }
  0xe0   :  { %3355 = vmatprep.subr.bf16.mxu1 %v3354_v20  ;;  %v1116_v20 = vld [vmem:[%s7062_s4 + $0x148] sm:$0xff] }
  0xe1   :  { %v3384_v26 = vpack.c.bf16 %v1116_v20, %v1115_v19 }
  0xe3   :  { %3357 = vmatpush3.bf16.msra.mxu1 %v3356_v28  ;;  %v1117_v28 = vld [vmem:[%s7062_s4 + $0x150] sm:$0xff] }
  0xe4   :  { %3359 = vmatprep.subr.bf16.mxu1 %v3358_v29  ;;  %v1118_v29 = vld [vmem:[%s7062_s4 + $0x158] sm:$0xff] }
  0xe7   :  { %3361 = vmatpush3.bf16.msra.mxu1 %v3360_v32  ;;  %v3388_v32 = vpack.c.bf16 %v1118_v29, %v1117_v28  ;;  %v1399_v29 = vld [vmem:[%s7067_s8 + $0x20] sm:$0xff] }
  0xe8   :  { %3363 = vmatprep.subr.bf16.mxu1 %v3362_v35  ;;  %v1119_v35 = vld [vmem:[%s7062_s4 + $0x160] sm:$0xff] }
  0xe9   :  { %v3392_v40 = vpack.c.bf16 %v1120_v36, %v1119_v35  ;;  %v1403_v35 = vld [vmem:[%s7067_s8 + $0x40] sm:$0xff] }
  0xea   :  { %v1407_v36 = vld [vmem:[%s7067_s8 + $0x60] sm:$0xff] }
  0xeb   :  { %3365 = vmatpush3.bf16.msra.mxu1 %v3364_v39  ;;  %v1138_v39 = vld [vmem:[%s7062_s4 + $0x1f8] sm:$0xff] }
  0xec   :  { %3367 = vmatprep.subr.bf16.mxu1 %v3366_v42  ;;  %v3394_v42 = vpack.c.bf16 %v1138_v39, %v1137_v38  ;;  %v1412_v38 = vld [vmem:[%s7067_s8 + $0x88] sm:$0xff] }
  0xed   :  { %v1416_v39 = vld [vmem:[%s7067_s8 + $0xa8] sm:$0xff] }
 0x1a0   :  { %v782_v49 = vpop.f32.mrb[0].mxu0 }
 0x1a1   :  { %v3902_v50 = vadd.f32 %v782_v49, %v442_v47  ;;  %v5385_v51 = vpop.f32.mrb[0].mxu1  ;;  %v784_v52 = vpop.f32.mrb[1].mxu0  ;;  %v1121_v47 = vld [vmem:[%s7062_s4 + $0x170] sm:$0xff] }
 0x1a2   :  { %v3903_v22 = vadd.f32 %v784_v52, %v446_v25  ;;  %v1068_v56 = vpop.f32.mrb[1].mxu1  ;;  %v1122_v25 = vld [vmem:[%s7062_s4 + $0x178] sm:$0xff]  ;;  %v3904_v49 = vadd.f32 %v5385_v51, %v450_v41  ;;  %v1287_v52 = vld [vmem:[%s7064_s6] sm:$0xff]  ;;  %v1289_v51 = vld [vmem:[%s7064_s6 + $0x10] sm:$0xff] }
 0x1a3   :  { %v3905_v58 = vadd.f32 %v1068_v56, %v454_v48  ;;  %v1071_v60 = vmax.f32 %v3902_v50, 0.0  ;;  %v3396_v48 = vpack.c.bf16 %v1122_v25, %v1121_v47  ;;  %v3399_v55 = vpack.c.bf16 %v1288_v53, %v1287_v52  ;;  %v2747_v41 = vld [vmem:[%s7068_s7] ss:$0 sm:$0xff] }
 0x1a4   :  { %v1072_v24 = vmax.f32 %v3903_v22, 0.0  ;;  %v1073_v50 = vmax.f32 %v3904_v49, 0.0  ;;  %v1290_v22 = vld [vmem:[%s7064_s6 + $0x18] sm:$0xff]  ;;  %v1411_v47 = vld [vmem:[%s7067_s8 + $0x80] sm:$0xff]  ;;  %v1424_v49 = vld [vmem:[%s7067_s8 + $0xe8] sm:$0xff] }
 0x1a5   :  { %v1074_v1 = vmax.f32 %v3905_v58, 0.0  ;;  %3400 = vmatpush3.bf16.msra.mxu0 %v3399_v55  ;;  %v3402_v56 = vpack.c.bf16 %v1290_v22, %v1289_v51  ;;  %v3405_v58 = vpack.c.bf16 %v1292_v57, %v1291_v37  ;;  %v1415_v25 = vld [vmem:[%s7067_s8 + $0xa0] sm:$0xff]  ;;  %v1402_v37 = vld [vmem:[%s7067_s8 + $0x38] sm:$0xff] }
 0x1a6   :  { %1210 = vmatprep.mubr.f32.mxu1 %v1072_v24  ;;  %3401 = vmatprep.subr.bf16.mxu0 %v3969_v44  ;;  %v1293_v24 = vld [vmem:[%s7064_s6 + $0x30] sm:$0xff]  ;;  %v3432_v53 = vpack.c.bf16 %v1415_v25, %v1411_v47  ;;  %v1419_v55 = vld [vmem:[%s7067_s8 + $0xc0] sm:$0xff]  ;;  %v1686_v25 = vld [vmem:[%s7070_s10 + $0x2a8] sm:$0xff] }
 0x1a7   :  { %1211 = vmatmul.mubr.f32.vlgmr.msra.gmra.mrb[2].mxu1 %v1071_v60  ;;  %v1423_v22 = vld [vmem:[%s7067_s8 + $0xe0] sm:$0xff] }
 0x1a8   :  { %3369 = vmatpush3.bf16.msra.mxu1 %v3368_v59  ;;  %1280 = vmatprep.mubr.f32.mxu1 %v1074_v1  ;;  %v1294_v59 = vld [vmem:[%s7064_s6 + $0x38] sm:$0xff]  ;;  %v1297_v1 = vld [vmem:[%s7064_s6 + $0x50] sm:$0xff]  ;;  %v3436_v57 = vpack.c.bf16 %v1423_v22, %v1419_v55 }
 0x1a9   :  { %3371 = vmatprep.subr.bf16.mxu1 %v3370_v62  ;;  %3403 = vmatpush3.bf16.msra.mxu0 %v3402_v56  ;;  %v3408_v60 = vpack.c.bf16 %v1294_v59, %v1293_v24  ;;  %v1295_v62 = vld [vmem:[%s7064_s6 + $0x40] sm:$0xff]  ;;  %v3414_v3 = vpack.c.bf16 %v1298_v2, %v1297_v1  ;;  %v1398_v56 = vld [vmem:[%s7067_s8 + $0x18] sm:$0xff]  ;;  %v1602_v2 = vld [vmem:[%s7070_s10 + $0x8] sm:$0xff] }
 0x1aa   :  { %3404 = vmatprep.subr.bf16.mxu0 %v3969_v44  ;;  %v3411_v0 = vpack.c.bf16 %v1296_v63, %v1295_v62  ;;  %v1699_v22 = vld [vmem:[%s7070_s10 + $0x310] sm:$0xff] }
 0x1ac   :  { %3373 = vmatpush3.bf16.msra.mxu1 %v3372_v4  ;;  %v1299_v4 = vld [vmem:[%s7064_s6 + $0x60] sm:$0xff] }
 0x1ad   :  { %3375 = vmatprep.subr.bf16.mxu1 %v3374_v5  ;;  %3406 = vmatpush3.bf16.msra.mxu0 %v3405_v58  ;;  %v1300_v5 = vld [vmem:[%s7064_s6 + $0x68] sm:$0xff]  ;;  %v3438_v58 = vpack.c.bf16 %v1402_v37, %v1398_v56 }
 0x1ae   :  { %3407 = vmatprep.subr.bf16.mxu0 %v3969_v44  ;;  %v3417_v6 = vpack.c.bf16 %v1300_v5, %v1299_v4  ;;  %v1601_v5 = vld [vmem:[%s7070_s10] sm:$0xff]  ;;  %v1706_v56 = vld [vmem:[%s7070_s10 + $0x348] sm:$0xff] }
 0x1af   :  { %v3484_v37 = vpack.c.bf16 %v1706_v56, %v1699_v22  ;;  %v1413_v56 = vld [vmem:[%s7067_s8 + $0x90] sm:$0xff] }
 0x1b0   :  { %3377 = vmatpush3.bf16.msra.mxu1 %v3376_v10  ;;  %v1384_v10 = vld [vmem:[%s7065_s1] sm:$0x3] }
 0x1b1   :  { %3379 = vmatprep.subr.bf16.mxu1 %v3378_v12  ;;  %3409 = vmatpush3.bf16.msra.mxu0 %v3408_v60 }
 0x1b2   :  { %3410 = vmatprep.subr.bf16.mxu0 %v3969_v44  ;;  %1386 = vrot.lane.b32.xlu0 %v1384_v10, %s3971_s20 }
 0x1b4   :  { %3381 = vmatpush3.bf16.msra.mxu1 %v3380_v17 }
 0x1b5   :  { %3383 = vmatprep.subr.bf16.mxu1 %v3382_v18  ;;  %3412 = vmatpush3.bf16.msra.mxu0 %v3411_v0 }
 0x1b6   :  { %3413 = vmatprep.subr.bf16.mxu0 %v3969_v44 }
 0x1b8   :  { %3385 = vmatpush3.bf16.msra.mxu1 %v3384_v26  ;;  %v1400_v26 = vld [vmem:[%s7067_s8 + $0x28] sm:$0xff] }
 0x1b9   :  { %3387 = vmatprep.subr.bf16.mxu1 %v3386_v27  ;;  %3415 = vmatpush3.bf16.msra.mxu0 %v3414_v3  ;;  %v1395_v27 = vld [vmem:[%s7067_s8] sm:$0xff]  ;;  %v3422_v28 = vpack.c.bf16 %v1400_v26, %v1396_v23  ;;  %v1651_v23 = vld [vmem:[%s7070_s10 + $0x190] sm:$0xff] }
 0x1ba   :  { %3416 = vmatprep.subr.bf16.mxu0 %v3969_v44  ;;  %v1609_v3 = vld [vmem:[%s7070_s10 + $0x40] sm:$0xff] }
 0x1bb   :  { %v3454_v4 = vpack.c.bf16 %v1609_v3, %v1602_v2  ;;  %v1727_v2 = vld [vmem:[%s7070_s10 + $0x3f0] sm:$0xff]  ;;  %v1734_v3 = vld [vmem:[%s7070_s10 + $0x428] sm:$0xff] }
 0x1bc   :  { %3389 = vmatpush3.bf16.msra.mxu1 %v3388_v32  ;;  %v3424_v32 = vpack.c.bf16 %v1399_v29, %v1395_v27  ;;  %v1643_v27 = vld [vmem:[%s7070_s10 + $0x150] sm:$0xff] }
 0x1bd   :  { %3391 = vmatprep.subr.bf16.mxu1 %v3390_v34  ;;  %3418 = vmatpush3.bf16.msra.mxu0 %v3417_v6  ;;  %v3426_v34 = vpack.c.bf16 %v1408_v31, %v1404_v30  ;;  %v1608_v6 = vld [vmem:[%s7070_s10 + $0x38] sm:$0xff]  ;;  %v1658_v30 = vld [vmem:[%s7070_s10 + $0x1c8] sm:$0xff]  ;;  %v1665_v31 = vld [vmem:[%s7070_s10 + $0x200] sm:$0xff] }
 0x1be   :  { %3419 = vmatprep.subr.bf16.mxu0 %v3969_v44  ;;  %v3456_v7 = vpack.c.bf16 %v1608_v6, %v1601_v5  ;;  %v1742_v5 = vld [vmem:[%s7070_s10 + $0x468] sm:$0xff]  ;;  %v1749_v6 = vld [vmem:[%s7070_s10 + $0x4a0] sm:$0xff] }
 0x1c0   :  { %3393 = vmatpush3.bf16.msra.mxu1 %v3392_v40  ;;  %v3428_v40 = vpack.c.bf16 %v1407_v36, %v1403_v35  ;;  %v1664_v35 = vld [vmem:[%s7070_s10 + $0x1f8] sm:$0xff] }
 0x1c1   :  { %3395 = vmatprep.subr.bf16.mxu1 %v3394_v42  ;;  %3421 = vmatpush3.bf16.msra.mxu0 %v3420_v9  ;;  %v3430_v42 = vpack.c.bf16 %v1416_v39, %v1412_v38  ;;  %v1623_v9 = vld [vmem:[%s7070_s10 + $0xb0] sm:$0xff]  ;;  %v1672_v38 = vld [vmem:[%s7070_s10 + $0x238] sm:$0xff] }
 0x1c2   :  { %3455 = vmatprep.subr.bf16.mxu0 %v3454_v4  ;;  %v3458_v10 = vpack.c.bf16 %v1623_v9, %v1616_v8  ;;  %v1679_v39 = vld [vmem:[%s7070_s10 + $0x270] sm:$0xff]  ;;  %v3492_v4 = vpack.c.bf16 %v1734_v3, %v1727_v2  ;;  %v1741_v8 = vld [vmem:[%s7070_s10 + $0x460] sm:$0xff]  ;;  %v1748_v9 = vld [vmem:[%s7070_s10 + $0x498] sm:$0xff] }
 0x1c3   :  { %v1603_v2 = vld [vmem:[%s7070_s10 + $0x10] sm:$0xff]  ;;  %v1610_v3 = vld [vmem:[%s7070_s10 + $0x48] sm:$0xff] }
 0x1c4   :  { %3397 = vmatpush3.bf16.msra.mxu1 %v3396_v48  ;;  %v1420_v48 = vld [vmem:[%s7067_s8 + $0xc8] sm:$0xff] }
 0x1c5   :  { %3423 = vmatprep.subr.bf16.mxu1 %v3422_v28  ;;  %v3434_v51 = vpack.c.bf16 %v1424_v49, %v1420_v48  ;;  %v1650_v28 = vld [vmem:[%s7070_s10 + $0x188] sm:$0xff]  ;;  %v1693_v48 = vld [vmem:[%s7070_s10 + $0x2e0] sm:$0xff] }
 0x1c6   :  { %v3468_v29 = vpack.c.bf16 %v1650_v28, %v1643_v27  ;;  %v3478_v49 = vpack.c.bf16 %v1693_v48, %v1686_v25  ;;  %v1784_v27 = vld [vmem:[%s7070_s10 + $0x5b8] sm:$0xff]  ;;  %v1791_v28 = vld [vmem:[%s7070_s10 + $0x5f0] sm:$0xff] }
 0x1c7   :  { %1281 = vmatmul.mubr.f32.vlgmr.msra.gmra.mrb[4].mxu1 %v1073_v50  ;;  %v1410_v25 = vld [vmem:[%s7067_s8 + $0x78] sm:$0xff] }
 0x1c8   :  { %1519 = vmatprep.mubr.f32.mxu1 %v3968_v54  ;;  %3425 = vmatpush1.bf16.msra.mxu1 %v3424_v32  ;;  %v3470_v32 = vpack.c.bf16 %v1665_v31, %v1658_v30  ;;  %v1783_v30 = vld [vmem:[%s7070_s10 + $0x5b0] sm:$0xff]  ;;  %v1790_v31 = vld [vmem:[%s7070_s10 + $0x5e8] sm:$0xff] }
 0x1c9   :  { %3427 = vmatprep.subr.bf16.mxu1 %v3426_v34  ;;  %v1657_v34 = vld [vmem:[%s7070_s10 + $0x1c0] sm:$0xff] }
 0x1ca   :  { %v3472_v36 = vpack.c.bf16 %v1664_v35, %v1657_v34  ;;  %v1798_v34 = vld [vmem:[%s7070_s10 + $0x628] sm:$0xff]  ;;  %v1805_v35 = vld [vmem:[%s7070_s10 + $0x660] sm:$0xff] }
 0x1cc   :  { %3429 = vmatpush1.bf16.msra.mxu1 %v3428_v40  ;;  %v3474_v40 = vpack.c.bf16 %v1679_v39, %v1672_v38  ;;  %v1797_v38 = vld [vmem:[%s7070_s10 + $0x620] sm:$0xff]  ;;  %v1804_v39 = vld [vmem:[%s7070_s10 + $0x658] sm:$0xff] }
 0x1cd   :  { %3431 = vmatprep.subr.bf16.mxu1 %v3430_v42  ;;  %v1678_v42 = vld [vmem:[%s7070_s10 + $0x268] sm:$0xff] }
 0x1d0   :  { %3433 = vmatpush1.bf16.msra.mxu1 %v3432_v53  ;;  %v1700_v53 = vld [vmem:[%s7070_s10 + $0x318] sm:$0xff] }
 0x1d1   :  { %3435 = vmatprep.subr.bf16.mxu1 %v3434_v51  ;;  %v1707_v51 = vld [vmem:[%s7070_s10 + $0x350] sm:$0xff] }
 0x1d2   :  { %v3482_v55 = vpack.c.bf16 %v1707_v51, %v1700_v53  ;;  %v1414_v53 = vld [vmem:[%s7067_s8 + $0x98] sm:$0xff] }
 0x1d3   :  { %v1418_v51 = vld [vmem:[%s7067_s8 + $0xb8] sm:$0xff] }
 0x1d4   :  { %3437 = vmatpush1.bf16.msra.mxu1 %v3436_v57  ;;  %v1714_v57 = vld [vmem:[%s7070_s10 + $0x388] sm:$0xff]  ;;  %v3446_v22 = vpack.c.bf16 %v1418_v51, %v1414_v53  ;;  %v1701_v53 = vld [vmem:[%s7070_s10 + $0x320] sm:$0xff]  ;;  %v1708_v51 = vld [vmem:[%s7070_s10 + $0x358] sm:$0xff] }
 0x1d5   :  { %3439 = vmatprep.subr.bf16.mxu1 %v3438_v58  ;;  %v1721_v58 = vld [vmem:[%s7070_s10 + $0x3c0] sm:$0xff] }
 0x224   :  { %v1387_v62 = vpop.permute.xlu0 %1386 }
 0x27a   :  { %v2782_v12 = vpop.f32.mrb[2].mxu1 }
 0x27b   :  { %v2783_v13 = vpop.f32.mrb[3].mxu1 }
 0x27c   :  { %v2784_v14 = vadd.f32 %v2783_v13, %v2782_v12  ;;  %v1615_v12 = vld [vmem:[%s7070_s10 + $0x70] sm:$0xff]  ;;  %v1622_v13 = vld [vmem:[%s7070_s10 + $0xa8] sm:$0xff] }
 0x27e   :  { %v1213_v18 = vadd.f32 %v2784_v14, %v2746_v15  ;;  %v3460_v14 = vpack.c.bf16 %v1622_v13, %v1615_v12  ;;  %v1630_v15 = vld [vmem:[%s7070_s10 + $0xe8] sm:$0xff]  ;;  %v1756_v12 = vld [vmem:[%s7070_s10 + $0x4d8] sm:$0xff]  ;;  %v1763_v13 = vld [vmem:[%s7070_s10 + $0x510] sm:$0xff] }
 0x29a   :  { %v2817_v16 = vpop.f32.mrb[4].mxu1 }
 0x29b   :  { %v2818_v17 = vpop.f32.mrb[5].mxu1 }
 0x29c   :  { %v2819_v19 = vadd.f32 %v2818_v17, %v2817_v16  ;;  %v1637_v16 = vld [vmem:[%s7070_s10 + $0x120] sm:$0xff] }
 0x29d   :  { %v3462_v17 = vpack.c.bf16 %v1637_v16, %v1630_v15  ;;  %v1755_v15 = vld [vmem:[%s7070_s10 + $0x4d0] sm:$0xff]  ;;  %v1762_v16 = vld [vmem:[%s7070_s10 + $0x508] sm:$0xff] }
 0x29e   :  { %v1283_v20 = vadd.f32 %v2819_v19, %v1213_v18  ;;  %v1629_v18 = vld [vmem:[%s7070_s10 + $0xe0] sm:$0xff]  ;;  %v1636_v19 = vld [vmem:[%s7070_s10 + $0x118] sm:$0xff] }
 0x2a0   :  { %v1286_v21 = vmax.f32 %v1283_v20, 0.0  ;;  %v3464_v20 = vpack.c.bf16 %v1636_v19, %v1629_v18  ;;  %v1770_v18 = vld [vmem:[%s7070_s10 + $0x548] sm:$0xff]  ;;  %v1777_v19 = vld [vmem:[%s7070_s10 + $0x580] sm:$0xff] }
 0x2a2   :  { %2940 = vmatmul.mubr.f32.vlgmr.msra.gmra.mrb[2].mxu0 %v1286_v21  ;;  %v1644_v21 = vld [vmem:[%s7070_s10 + $0x158] sm:$0xff] }
 0x2a3   :  { %3457 = vmatpush1.bf16.msra.mxu0 %v3456_v7  ;;  %v3466_v26 = vpack.c.bf16 %v1651_v23, %v1644_v21  ;;  %v3494_v7 = vpack.c.bf16 %v1749_v6, %v1742_v5  ;;  %v1769_v21 = vld [vmem:[%s7070_s10 + $0x540] sm:$0xff]  ;;  %v1776_v23 = vld [vmem:[%s7070_s10 + $0x578] sm:$0xff]  ;;  %v3584_v6 = vpack.c.bf16 %v1610_v3, %v1603_v2 }
 0x2a4   :  { %3459 = vmatprep.subr.bf16.mxu0 %v3458_v10  ;;  %v3496_v10 = vpack.c.bf16 %v1748_v9, %v1741_v8  ;;  %v1625_v5 = vld [vmem:[%s7070_s10 + $0xc0] sm:$0xff]  ;;  %v1624_v9 = vld [vmem:[%s7070_s10 + $0xb8] sm:$0xff] }
 0x2a5   :  { %v1617_v8 = vld [vmem:[%s7070_s10 + $0x80] sm:$0xff] }
 0x2a7   :  { %3461 = vmatpush1.bf16.msra.mxu0 %v3460_v14  ;;  %v3498_v14 = vpack.c.bf16 %v1763_v13, %v1756_v12  ;;  %v1639_v12 = vld [vmem:[%s7070_s10 + $0x130] sm:$0xff]  ;;  %v3588_v13 = vpack.c.bf16 %v1624_v9, %v1617_v8 }
 0x2a8   :  { %3463 = vmatprep.subr.bf16.mxu0 %v3462_v17  ;;  %v3500_v17 = vpack.c.bf16 %v1762_v16, %v1755_v15  ;;  %v1631_v15 = vld [vmem:[%s7070_s10 + $0xf0] sm:$0xff]  ;;  %v1638_v16 = vld [vmem:[%s7070_s10 + $0x128] sm:$0xff] }
 0x2ab   :  { %3465 = vmatpush1.bf16.msra.mxu0 %v3464_v20  ;;  %v3502_v20 = vpack.c.bf16 %v1777_v19, %v1770_v18  ;;  %v1653_v18 = vld [vmem:[%s7070_s10 + $0x1a0] sm:$0xff]  ;;  %v3592_v19 = vpack.c.bf16 %v1638_v16, %v1631_v15 }
 0x2ac   :  { %3467 = vmatprep.subr.bf16.mxu0 %v3466_v26  ;;  %v3504_v26 = vpack.c.bf16 %v1776_v23, %v1769_v21  ;;  %v1645_v21 = vld [vmem:[%s7070_s10 + $0x160] sm:$0xff]  ;;  %v1652_v23 = vld [vmem:[%s7070_s10 + $0x198] sm:$0xff] }
 0x2af   :  { %3469 = vmatpush1.bf16.msra.mxu0 %v3468_v29  ;;  %v3506_v29 = vpack.c.bf16 %v1791_v28, %v1784_v27  ;;  %v1667_v27 = vld [vmem:[%s7070_s10 + $0x210] sm:$0xff]  ;;  %v3596_v28 = vpack.c.bf16 %v1652_v23, %v1645_v21 }
 0x2b0   :  { %3471 = vmatprep.subr.bf16.mxu0 %v3470_v32  ;;  %v3508_v32 = vpack.c.bf16 %v1790_v31, %v1783_v30  ;;  %v1659_v30 = vld [vmem:[%s7070_s10 + $0x1d0] sm:$0xff]  ;;  %v1666_v31 = vld [vmem:[%s7070_s10 + $0x208] sm:$0xff] }
 0x2b3   :  { %3473 = vmatpush1.bf16.msra.mxu0 %v3472_v36  ;;  %v3510_v36 = vpack.c.bf16 %v1805_v35, %v1798_v34  ;;  %v1681_v34 = vld [vmem:[%s7070_s10 + $0x280] sm:$0xff]  ;;  %v3600_v35 = vpack.c.bf16 %v1666_v31, %v1659_v30 }
 0x2b4   :  { %3475 = vmatprep.subr.bf16.mxu0 %v3474_v40  ;;  %v3512_v40 = vpack.c.bf16 %v1804_v39, %v1797_v38  ;;  %v1673_v38 = vld [vmem:[%s7070_s10 + $0x240] sm:$0xff]  ;;  %v1680_v39 = vld [vmem:[%s7070_s10 + $0x278] sm:$0xff] }
 0x375   :  { %v1376_v50 = vpop.f32.mrb[2].mxu0 }
 0x376   :  { %v1377_v44 = vadd.f32 %v2747_v41, %v1376_v50  ;;  %v2941_v52 = vpop.f32.mrb[3].mxu0  ;;  %v1671_v41 = vld [vmem:[%s7070_s10 + $0x230] sm:$0xff]  ;;  %v1685_v50 = vld [vmem:[%s7070_s10 + $0x2a0] sm:$0xff] }
 0x377   :  { %v3476_v47 = vpack.c.bf16 %v1678_v42, %v1671_v41  ;;  %v1397_v41 = vld [vmem:[%s7067_s8 + $0x10] sm:$0xff] }
 0x378   :  { %1380 = vst [vmem:[%s7069_s13] sm:$0x3] %v1377_v44  ;;  %1391 = vrot.lane.b32.xlu0 %v1377_v44, %s3971_s20  ;;  %v1381_v24 = vmul.f32 0.5, %v1377_v44  ;;  %v1692_v44 = vld [vmem:[%s7070_s10 + $0x2d8] sm:$0xff]  ;;  %v1401_v42 = vld [vmem:[%s7067_s8 + $0x30] sm:$0xff] }
 0x379   :  { %3477 = vmatpush1.bf16.msra.mxu0 %v3476_v47  ;;  %v3480_v52 = vpack.c.bf16 %v1692_v44, %v1685_v50  ;;  %v1406_v47 = vld [vmem:[%s7067_s8 + $0x58] sm:$0xff]  ;;  %v3440_v48 = vpack.c.bf16 %v1401_v42, %v1397_v41  ;;  %v1405_v50 = vld [vmem:[%s7067_s8 + $0x50] sm:$0xff]  ;;  %v3604_v42 = vpack.c.bf16 %v1680_v39, %v1673_v38  ;;  %v1814_v39 = vld [vmem:[%s7070_s10 + $0x6a8] sm:$0xff] }
 0x37a   :  { %v1382_v59 = vmul.f32 1.442695, %v1381_v24  ;;  %3479 = vmatprep.subr.bf16.mxu0 %v3478_v49  ;;  %v3486_v24 = vpack.c.bf16 %v1721_v58, %v1714_v57  ;;  %v3442_v49 = vpack.c.bf16 %v1410_v25, %v1406_v47  ;;  %v1409_v44 = vld [vmem:[%s7067_s8 + $0x70] sm:$0xff]  ;;  %v1422_v57 = vld [vmem:[%s7067_s8 + $0xd8] sm:$0xff] }
 0x37b   :  { %v1426_v58 = vld [vmem:[%s7067_s8 + $0xf8] sm:$0xff]  ;;  %v1695_v41 = vld [vmem:[%s7070_s10 + $0x2f0] sm:$0xff] }
 0x37c   :  { %3937 = vpow2.f32 %v1382_v59  ;;  %v1713_v59 = vld [vmem:[%s7070_s10 + $0x380] sm:$0xff]  ;;  %v1687_v25 = vld [vmem:[%s7070_s10 + $0x2b0] sm:$0xff] }
 0x37d   :  { %3481 = vmatpush1.bf16.msra.mxu0 %v3480_v52  ;;  %v1819_v38 = vld [vmem:[%s7070_s10 + $0x6d0] sm:$0xff] }
 0x37e   :  { %3483 = vmatprep.subr.bf16.mxu0 %v3482_v55  ;;  %v3444_v55 = vpack.c.bf16 %v1409_v44, %v1405_v50  ;;  %v1709_v50 = vld [vmem:[%s7070_s10 + $0x360] sm:$0xff] }
 0x381   :  { %3485 = vmatpush1.bf16.msra.mxu0 %v3484_v37  ;;  %v1417_v37 = vld [vmem:[%s7067_s8 + $0xb0] sm:$0xff] }
 0x382   :  { %3487 = vmatprep.subr.bf16.mxu0 %v3486_v24  ;;  %v3450_v24 = vpack.c.bf16 %v1426_v58, %v1422_v57  ;;  %v1715_v57 = vld [vmem:[%s7070_s10 + $0x390] sm:$0xff]  ;;  %v1722_v58 = vld [vmem:[%s7070_s10 + $0x3c8] sm:$0xff] }
 0x386   :  { %v3938_v60 = vpop.eup %3937 }
 0x387   :  { %v1389_v63 = vmul.f32 %v3938_v60, %v1387_v62  ;;  %v1720_v60 = vld [vmem:[%s7070_s10 + $0x3b8] sm:$0xff] }
 0x388   :  { %v3488_v62 = vpack.c.bf16 %v1720_v60, %v1713_v59  ;;  %v1421_v59 = vld [vmem:[%s7067_s8 + $0xd0] sm:$0xff] }
 0x389   :  { %v1425_v60 = vld [vmem:[%s7067_s8 + $0xf0] sm:$0xff] }
 0x38a   :  { %3489 = vmatpush1.bf16.msra.mxu0 %v3488_v62  ;;  %v1604_v62 = vld [vmem:[%s7070_s10 + $0x18] sm:$0xff] }
 0x3ea   :  { %v1392_v0 = vpop.permute.xlu0 %1391 }
 0x3eb   :  { %v1394_v1 = vadd.f32 %v1392_v0, %v1389_v63  ;;  %v1728_v63 = vld [vmem:[%s7070_s10 + $0x3f8] sm:$0xff]  ;;  %v1735_v0 = vld [vmem:[%s7070_s10 + $0x430] sm:$0xff] }
 0x3ed   :  { %1450 = vrot.lane.b32.xlu1 %v1394_v1, %s3971_s20  ;;  %v3490_v1 = vpack.c.bf16 %v1735_v0, %v1728_v63  ;;  %v1611_v63 = vld [vmem:[%s7070_s10 + $0x50] sm:$0xff]  ;;  %v3452_v0 = vpack.c.bf16 %v1425_v60, %v1421_v59  ;;  %v3616_v59 = vpack.c.bf16 %v1722_v58, %v1715_v57 }
 0x3ef   :  { %3491 = vmatprep.subr.bf16.mxu0 %v3490_v1  ;;  %v3582_v1 = vpack.c.bf16 %v1611_v63, %v1604_v62  ;;  %v1729_v62 = vld [vmem:[%s7070_s10 + $0x400] sm:$0xff]  ;;  %v1736_v63 = vld [vmem:[%s7070_s10 + $0x438] sm:$0xff] }
 0x3f0   :  { %3493 = vmatpush1.bf16.msra.mxu0 %v3492_v4  ;;  %v1618_v4 = vld [vmem:[%s7070_s10 + $0x88] sm:$0xff]  ;;  %v3620_v2 = vpack.c.bf16 %v1736_v63, %v1729_v62  ;;  %v1827_v63 = vld [vmem:[%s7070_s10 + $0x710] sm:$0xff] }
 0x3f1   :  { %3495 = vmatprep.subr.bf16.mxu0 %v3494_v7  ;;  %v3586_v7 = vpack.c.bf16 %v1625_v5, %v1618_v4  ;;  %v1743_v4 = vld [vmem:[%s7070_s10 + $0x470] sm:$0xff]  ;;  %v1750_v5 = vld [vmem:[%s7070_s10 + $0x4a8] sm:$0xff] }
 0x3f2   :  { %v3624_v8 = vpack.c.bf16 %v1750_v5, %v1743_v4  ;;  %v1842_v4 = vld [vmem:[%s7070_s10 + $0x788] sm:$0xff]  ;;  %v1849_v5 = vld [vmem:[%s7070_s10 + $0x7c0] sm:$0xff] }
 0x3f4   :  { %3497 = vmatpush1.bf16.msra.mxu0 %v3496_v10  ;;  %v1632_v10 = vld [vmem:[%s7070_s10 + $0xf8] sm:$0xff] }
 0x3f5   :  { %3499 = vmatprep.subr.bf16.mxu0 %v3498_v14  ;;  %v3590_v14 = vpack.c.bf16 %v1639_v12, %v1632_v10  ;;  %v1757_v10 = vld [vmem:[%s7070_s10 + $0x4e0] sm:$0xff]  ;;  %v1764_v12 = vld [vmem:[%s7070_s10 + $0x518] sm:$0xff] }
 0x3f6   :  { %v3628_v15 = vpack.c.bf16 %v1764_v12, %v1757_v10  ;;  %v1846_v10 = vld [vmem:[%s7070_s10 + $0x7a8] sm:$0xff] }
 0x3f8   :  { %3501 = vmatpush1.bf16.msra.mxu0 %v3500_v17  ;;  %v1646_v17 = vld [vmem:[%s7070_s10 + $0x168] sm:$0xff] }
 0x3f9   :  { %3503 = vmatprep.subr.bf16.mxu0 %v3502_v20  ;;  %v3594_v20 = vpack.c.bf16 %v1653_v18, %v1646_v17  ;;  %v1771_v17 = vld [vmem:[%s7070_s10 + $0x550] sm:$0xff]  ;;  %v1778_v18 = vld [vmem:[%s7070_s10 + $0x588] sm:$0xff] }
 0x3fa   :  { %v3632_v21 = vpack.c.bf16 %v1778_v18, %v1771_v17  ;;  %v1854_v17 = vld [vmem:[%s7070_s10 + $0x7e8] sm:$0xff]  ;;  %v1861_v18 = vld [vmem:[%s7070_s10 + $0x820] sm:$0xff] }
 0x3fc   :  { %3505 = vmatpush1.bf16.msra.mxu0 %v3504_v26  ;;  %v1660_v26 = vld [vmem:[%s7070_s10 + $0x1d8] sm:$0xff] }
 0x3fd   :  { %3507 = vmatprep.subr.bf16.mxu0 %v3506_v29  ;;  %v3598_v29 = vpack.c.bf16 %v1667_v27, %v1660_v26  ;;  %v1785_v26 = vld [vmem:[%s7070_s10 + $0x5c0] sm:$0xff]  ;;  %v1792_v27 = vld [vmem:[%s7070_s10 + $0x5f8] sm:$0xff] }
 0x3fe   :  { %v3636_v30 = vpack.c.bf16 %v1792_v27, %v1785_v26  ;;  %v1853_v26 = vld [vmem:[%s7070_s10 + $0x7e0] sm:$0xff]  ;;  %v1860_v27 = vld [vmem:[%s7070_s10 + $0x818] sm:$0xff] }
 0x400   :  { %3509 = vmatpush1.bf16.msra.mxu0 %v3508_v32  ;;  %v1674_v32 = vld [vmem:[%s7070_s10 + $0x248] sm:$0xff] }
 0x401   :  { %3511 = vmatprep.subr.bf16.mxu0 %v3510_v36  ;;  %v3602_v36 = vpack.c.bf16 %v1681_v34, %v1674_v32  ;;  %v1799_v32 = vld [vmem:[%s7070_s10 + $0x630] sm:$0xff]  ;;  %v1806_v34 = vld [vmem:[%s7070_s10 + $0x668] sm:$0xff] }
 0x404   :  { %3513 = vmatpush1.bf16.msra.mxu0 %v3512_v40  ;;  %v1688_v40 = vld [vmem:[%s7070_s10 + $0x2b8] sm:$0xff] }
 0x405   :  { %v3606_v47 = vpack.c.bf16 %v1695_v41, %v1688_v40  ;;  %v1821_v41 = vld [vmem:[%s7070_s10 + $0x6e0] sm:$0xff] }
 0x45f   :  { %v1451_v52 = vpop.permute.xlu1 %1450 }
 0x460   :  { %2748 = vmatmul.mubr.msk.f32.vlgmr.msra.gmra.mrb[6].mxu1 %vm1452_vm2, %v1451_v52 }
 0x461   :  { %3441 = vmatpush1.bf16.msra.mxu1 %v3440_v48  ;;  %1590 = vmatprep.mubr.f32.mxu1 %v3968_v54  ;;  %v3448_v54 = vpack.c.bf16 %v1417_v37, %v1413_v56  ;;  %v1694_v48 = vld [vmem:[%s7070_s10 + $0x2e8] sm:$0xff]  ;;  %v3612_v56 = vpack.c.bf16 %v1708_v51, %v1701_v53  ;;  %v1833_v53 = vld [vmem:[%s7070_s10 + $0x740] sm:$0xff]  ;;  %v1828_v51 = vld [vmem:[%s7070_s10 + $0x718] sm:$0xff] }
 0x462   :  { %3443 = vmatprep.subr.bf16.mxu1 %v3442_v49  ;;  %v1702_v49 = vld [vmem:[%s7070_s10 + $0x328] sm:$0xff]  ;;  %v3608_v44 = vpack.c.bf16 %v1694_v48, %v1687_v25  ;;  %v3642_v25 = vpack.c.bf16 %v1821_v41, %v1814_v39 }
 0x463   :  { %v1874_v41 = vld [vmem:[%s7070_s10 + $0x888] sm:$0xff] }
 0x465   :  { %3445 = vmatpush1.bf16.msra.mxu1 %v3444_v55  ;;  %v1716_v55 = vld [vmem:[%s7070_s10 + $0x398] sm:$0xff] }
 0x466   :  { %3447 = vmatprep.subr.bf16.mxu1 %v3446_v22  ;;  %v1723_v22 = vld [vmem:[%s7070_s10 + $0x3d0] sm:$0xff] }
 0x467   :  { %v3614_v37 = vpack.c.bf16 %v1723_v22, %v1716_v55  ;;  %v1835_v22 = vld [vmem:[%s7070_s10 + $0x750] sm:$0xff] }
 0x469   :  { %3449 = vmatpush1.bf16.msra.mxu1 %v3448_v54  ;;  %v1730_v54 = vld [vmem:[%s7070_s10 + $0x408] sm:$0xff] }
 0x46a   :  { %3451 = vmatprep.subr.bf16.mxu1 %v3450_v24  ;;  %v1737_v24 = vld [vmem:[%s7070_s10 + $0x440] sm:$0xff] }
 0x46b   :  { %v3618_v60 = vpack.c.bf16 %v1737_v24, %v1730_v54  ;;  %v1825_v24 = vld [vmem:[%s7070_s10 + $0x700] sm:$0xff] }
 0x46d   :  { %3453 = vmatpush1.bf16.msra.mxu1 %v3452_v0  ;;  %v1744_v0 = vld [vmem:[%s7070_s10 + $0x478] sm:$0xff] }
 0x46e   :  { %3583 = vmatprep.subr.bf16.mxu1 %v3582_v1  ;;  %v1751_v1 = vld [vmem:[%s7070_s10 + $0x4b0] sm:$0xff] }
 0x46f   :  { %v3622_v3 = vpack.c.bf16 %v1751_v1, %v1744_v0  ;;  %v1834_v0 = vld [vmem:[%s7070_s10 + $0x748] sm:$0xff]  ;;  %v1840_v1 = vld [vmem:[%s7070_s10 + $0x778] sm:$0xff] }
 0x470   :  { %2749 = vmatmul.mubr.msk.f32.vlgmr.msra.gmra.mrb[8].mxu1 %vm1452_vm2, %v1451_v52  ;;  %v3610_v52 = vpack.c.bf16 %v1709_v50, %v1702_v49  ;;  %v1813_v49 = vld [vmem:[%s7070_s10 + $0x6a0] sm:$0xff]  ;;  %v1820_v50 = vld [vmem:[%s7070_s10 + $0x6d8] sm:$0xff] }
 0x471   :  { %3585 = vmatpush1.bf16.msra.mxu1 %v3584_v6  ;;  %v1758_v6 = vld [vmem:[%s7070_s10 + $0x4e8] sm:$0xff] }
 0x472   :  { %3587 = vmatprep.subr.bf16.mxu1 %v3586_v7  ;;  %v1765_v7 = vld [vmem:[%s7070_s10 + $0x520] sm:$0xff] }
 0x473   :  { %v3626_v9 = vpack.c.bf16 %v1765_v7, %v1758_v6 }
 0x475   :  { %3589 = vmatpush1.bf16.msra.mxu1 %v3588_v13  ;;  %v1772_v13 = vld [vmem:[%s7070_s10 + $0x558] sm:$0xff] }
 0x476   :  { %3591 = vmatprep.subr.bf16.mxu1 %v3590_v14  ;;  %v1779_v14 = vld [vmem:[%s7070_s10 + $0x590] sm:$0xff] }
 0x477   :  { %v3630_v16 = vpack.c.bf16 %v1779_v14, %v1772_v13  ;;  %v3650_v14 = vpack.c.bf16 %v1849_v5, %v1842_v4 }
 0x479   :  { %3593 = vmatpush1.bf16.msra.mxu1 %v3592_v19  ;;  %v1786_v19 = vld [vmem:[%s7070_s10 + $0x5c8] sm:$0xff] }
 0x47a   :  { %3595 = vmatprep.subr.bf16.mxu1 %v3594_v20  ;;  %v1793_v20 = vld [vmem:[%s7070_s10 + $0x600] sm:$0xff] }
 0x47b   :  { %v3634_v23 = vpack.c.bf16 %v1793_v20, %v1786_v19  ;;  %v1856_v19 = vld [vmem:[%s7070_s10 + $0x7f8] sm:$0xff]  ;;  %v1863_v20 = vld [vmem:[%s7070_s10 + $0x830] sm:$0xff] }
 0x47d   :  { %3597 = vmatpush1.bf16.msra.mxu1 %v3596_v28  ;;  %v1800_v28 = vld [vmem:[%s7070_s10 + $0x638] sm:$0xff] }
 0x47e   :  { %3599 = vmatprep.subr.bf16.mxu1 %v3598_v29  ;;  %v1807_v29 = vld [vmem:[%s7070_s10 + $0x670] sm:$0xff] }
 0x47f   :  { %v3638_v31 = vpack.c.bf16 %v1807_v29, %v1800_v28  ;;  %v3526_v28 = vpack.c.bf16 %v1861_v18, %v1854_v17  ;;  %v3654_v29 = vpack.c.bf16 %v1863_v20, %v1856_v19  ;;  %v1912_v17 = vld [vmem:[%s7070_s10 + $0x9b8] sm:$0xff]  ;;  %v1919_v18 = vld [vmem:[%s7070_s10 + $0x9f0] sm:$0xff] }
 0x481   :  { %3601 = vmatpush1.bf16.msra.mxu1 %v3600_v35  ;;  %v3640_v35 = vpack.c.bf16 %v1806_v34, %v1799_v32  ;;  %v1868_v32 = vld [vmem:[%s7070_s10 + $0x858] sm:$0xff]  ;;  %v1875_v34 = vld [vmem:[%s7070_s10 + $0x890] sm:$0xff] }
 0x482   :  { %3603 = vmatprep.subr.bf16.mxu1 %v3602_v36  ;;  %v1812_v36 = vld [vmem:[%s7070_s10 + $0x698] sm:$0xff] }
 0x483   :  { %v3514_v40 = vpack.c.bf16 %v1819_v38, %v1812_v36  ;;  %v1877_v36 = vld [vmem:[%s7070_s10 + $0x8a0] sm:$0xff]  ;;  %v3528_v38 = vpack.c.bf16 %v1860_v27, %v1853_v26  ;;  %v3670_v27 = vpack.c.bf16 %v1919_v18, %v1912_v17  ;;  %v1972_v17 = vld [vmem:[%s7070_s10 + $0xb98] sm:$0xff] }
 0x485   :  { %3605 = vmatpush1.bf16.msra.mxu1 %v3604_v42  ;;  %v1811_v42 = vld [vmem:[%s7070_s10 + $0x690] sm:$0xff]  ;;  %3515 = vmatprep.subr.bf16.mxu0 %v3514_v40 }
 0x486   :  { %3607 = vmatprep.subr.bf16.mxu1 %v3606_v47  ;;  %v1818_v47 = vld [vmem:[%s7070_s10 + $0x6c8] sm:$0xff]  ;;  %v1867_v40 = vld [vmem:[%s7070_s10 + $0x850] sm:$0xff] }
 0x487   :  { %v3516_v48 = vpack.c.bf16 %v1818_v47, %v1811_v42  ;;  %v3530_v42 = vpack.c.bf16 %v1875_v34, %v1868_v32  ;;  %v1926_v32 = vld [vmem:[%s7070_s10 + $0xa28] sm:$0xff]  ;;  %v1933_v34 = vld [vmem:[%s7070_s10 + $0xa60] sm:$0xff] }
 0x489   :  { %3609 = vmatpush1.bf16.msra.mxu1 %v3608_v44  ;;  %v3644_v44 = vpack.c.bf16 %v1820_v50, %v1813_v49  ;;  %3517 = vmatpush1.bf16.msra.mxu0 %v3516_v48  ;;  %v1876_v48 = vld [vmem:[%s7070_s10 + $0x898] sm:$0xff]  ;;  %v1882_v49 = vld [vmem:[%s7070_s10 + $0x8c8] sm:$0xff] }
 0x48a   :  { %3611 = vmatprep.subr.bf16.mxu1 %v3610_v52  ;;  %v1826_v52 = vld [vmem:[%s7070_s10 + $0x708] sm:$0xff] }
 0x48b   :  { %v3518_v55 = vpack.c.bf16 %v1833_v53, %v1826_v52  ;;  %v1884_v52 = vld [vmem:[%s7070_s10 + $0x8d8] sm:$0xff]  ;;  %v1891_v53 = vld [vmem:[%s7070_s10 + $0x910] sm:$0xff] }
 0x48d   :  { %3613 = vmatpush1.bf16.msra.mxu1 %v3612_v56  ;;  %v3646_v56 = vpack.c.bf16 %v1835_v22, %v1828_v51  ;;  %3519 = vmatprep.subr.bf16.mxu0 %v3518_v55  ;;  %v3532_v55 = vpack.c.bf16 %v1874_v41, %v1867_v40  ;;  %v3674_v41 = vpack.c.bf16 %v1933_v34, %v1926_v32  ;;  %v1986_v32 = vld [vmem:[%s7070_s10 + $0xc08] sm:$0xff] }
 0x48e   :  { %3615 = vmatprep.subr.bf16.mxu1 %v3614_v37  ;;  %v6046_v37 = vld [vmem:[%s7071_s9] sm:$0xf] }
 0x48f   :  { %v1432_v57 = vrot.slane %v6046_v37, %v5366_v43  ;;  %v1436_v58 = vrot.slane %v6046_v37, %v5374_v45  ;;  %v1444_v50 = vrot.slane %v6046_v37, %v5377_v46 }
 0x491   :  { %3617 = vmatpush1.bf16.msra.mxu1 %v3616_v59  ;;  %v1832_v59 = vld [vmem:[%s7070_s10 + $0x738] sm:$0xff] }
 0x492   :  { %3619 = vmatprep.subr.bf16.mxu1 %v3618_v60  ;;  %v3520_v7 = vpack.c.bf16 %v1832_v59, %v1825_v24  ;;  %v3662_v24 = vpack.c.bf16 %v1891_v53, %v1884_v52  ;;  %v1883_v59 = vld [vmem:[%s7070_s10 + $0x8d0] sm:$0xff]  ;;  %v1937_v53 = vld [vmem:[%s7070_s10 + $0xa80] sm:$0xff] }
 0x495   :  { %3621 = vmatpush1.bf16.msra.mxu1 %v3620_v2 }
 0x496   :  { %3623 = vmatprep.subr.bf16.mxu1 %v3622_v3  ;;  %v1847_v3 = vld [vmem:[%s7070_s10 + $0x7b0] sm:$0xff] }
 0x497   :  { %v3522_v13 = vpack.c.bf16 %v1847_v3, %v1840_v1  ;;  %v1898_v1 = vld [vmem:[%s7070_s10 + $0x948] sm:$0xff] }
 0x499   :  { %3625 = vmatpush1.bf16.msra.mxu1 %v3624_v8  ;;  %v3648_v8 = vpack.c.bf16 %v1834_v0, %v1827_v63  ;;  %v1903_v0 = vld [vmem:[%s7070_s10 + $0x970] sm:$0xff] }
 0x49a   :  { %3627 = vmatprep.subr.bf16.mxu1 %v3626_v9  ;;  %v1839_v9 = vld [vmem:[%s7070_s10 + $0x770] sm:$0xff] }
 0x49d   :  { %3629 = vmatpush1.bf16.msra.mxu1 %v3628_v15  ;;  %v1841_v15 = vld [vmem:[%s7070_s10 + $0x780] sm:$0xff] }
 0x49e   :  { %3631 = vmatprep.subr.bf16.mxu1 %v3630_v16  ;;  %v1848_v16 = vld [vmem:[%s7070_s10 + $0x7b8] sm:$0xff] }
 0x4a1   :  { %3633 = vmatpush1.bf16.msra.mxu1 %v3632_v21  ;;  %v3524_v21 = vpack.c.bf16 %v1846_v10, %v1839_v9 }
 0x4a2   :  { %3635 = vmatprep.subr.bf16.mxu1 %v3634_v23  ;;  %v3652_v23 = vpack.c.bf16 %v1848_v16, %v1841_v15  ;;  %v1910_v15 = vld [vmem:[%s7070_s10 + $0x9a8] sm:$0xff]  ;;  %v1917_v16 = vld [vmem:[%s7070_s10 + $0x9e0] sm:$0xff] }
 0x4a3   :  { %v3542_v26 = vpack.c.bf16 %v1917_v16, %v1910_v15  ;;  %v1965_v16 = vld [vmem:[%s7070_s10 + $0xb60] sm:$0xff] }
 0x4a5   :  { %3637 = vmatpush1.bf16.msra.mxu1 %v3636_v30  ;;  %v1855_v30 = vld [vmem:[%s7070_s10 + $0x7f0] sm:$0xff] }
 0x4a6   :  { %3639 = vmatprep.subr.bf16.mxu1 %v3638_v31  ;;  %v1862_v31 = vld [vmem:[%s7070_s10 + $0x828] sm:$0xff] }
 0x4a7   :  { %v3656_v39 = vpack.c.bf16 %v1862_v31, %v1855_v30  ;;  %v1924_v30 = vld [vmem:[%s7070_s10 + $0xa18] sm:$0xff]  ;;  %v1931_v31 = vld [vmem:[%s7070_s10 + $0xa50] sm:$0xff] }
 0x4a8   :  { %v3546_v40 = vpack.c.bf16 %v1931_v31, %v1924_v30  ;;  %v1979_v31 = vld [vmem:[%s7070_s10 + $0xbd0] sm:$0xff] }
 0x4a9   :  { %3641 = vmatpush1.bf16.msra.mxu1 %v3640_v35  ;;  %v1870_v35 = vld [vmem:[%s7070_s10 + $0x868] sm:$0xff] }
 0x4aa   :  { %3643 = vmatprep.subr.bf16.mxu1 %v3642_v25  ;;  %v3658_v47 = vpack.c.bf16 %v1877_v36, %v1870_v35  ;;  %v1869_v25 = vld [vmem:[%s7070_s10 + $0x860] sm:$0xff] }
 0x4ab   :  { %v3660_v22 = vpack.c.bf16 %v1876_v48, %v1869_v25  ;;  %v1938_v25 = vld [vmem:[%s7070_s10 + $0xa88] sm:$0xff]  ;;  %v1945_v48 = vld [vmem:[%s7070_s10 + $0xac0] sm:$0xff] }
 0x4ad   :  { %3645 = vmatpush1.bf16.msra.mxu1 %v3644_v44  ;;  %v1889_v44 = vld [vmem:[%s7070_s10 + $0x900] sm:$0xff] }
 0x4ae   :  { %3647 = vmatprep.subr.bf16.mxu1 %v3646_v56  ;;  %v1881_v56 = vld [vmem:[%s7070_s10 + $0x8c0] sm:$0xff] }
 0x533   :  { %v1521_v54 = vpop.f32.mrb[6].mxu1 }
 0x534   :  { %v1522_v60 = vadd.f32 %v1521_v54, %v1432_v57  ;;  %v1523_v62 = vpop.f32.mrb[7].mxu1  ;;  %v1888_v57 = vld [vmem:[%s7070_s10 + $0x8f8] sm:$0xff]  ;;  %v3534_v54 = vpack.c.bf16 %v1889_v44, %v1882_v49 }
 0x535   :  { %v1524_v2 = vadd.f32 %v1523_v62, %v1436_v58  ;;  %v1896_v62 = vld [vmem:[%s7070_s10 + $0x938] sm:$0xff]  ;;  %v3536_v4 = vpack.c.bf16 %v1888_v57, %v1881_v56  ;;  %v1939_v57 = vld [vmem:[%s7070_s10 + $0xa90] sm:$0xff] }
 0x536   :  { %v6084_v12 = vmax.f32 %v1522_v60, 0.0  ;;  %v1890_v60 = vld [vmem:[%s7070_s10 + $0x908] sm:$0xff]  ;;  %v3538_v9 = vpack.c.bf16 %v1903_v0, %v1896_v62  ;;  %v1940_v49 = vld [vmem:[%s7070_s10 + $0xa98] sm:$0xff]  ;;  %v1951_v0 = vld [vmem:[%s7070_s10 + $0xaf0] sm:$0xff] }
 0x537   :  { %v6076_v6 = vmax.f32 %v1524_v2, 0.0  ;;  %v1905_v2 = vld [vmem:[%s7070_s10 + $0x980] sm:$0xff]  ;;  %v3664_v5 = vpack.c.bf16 %v1890_v60, %v1883_v59  ;;  %v1954_v59 = vld [vmem:[%s7070_s10 + $0xb08] sm:$0xff] }
 0x538   :  { %v3666_v10 = vpack.c.bf16 %v1905_v2, %v1898_v1  ;;  %v1961_v60 = vld [vmem:[%s7070_s10 + $0xb40] sm:$0xff]  ;;  %v1958_v1 = vld [vmem:[%s7070_s10 + $0xb28] sm:$0xff] }
 0x539   :  { %2150 = vmatprep.mubr.f32.mxu0 %v6076_v6  ;;  %2292 = vmatprep.mubr.f32.mxu1 %v6076_v6 }
 0x53a   :  { %2151 = vmatmul.mubr.f32.vlgmr.msra.gmra.mrb[4].mxu0 %v6084_v12  ;;  %2293 = vmatmul.mubr.f32.vlgmr.msra.gmra.mrb[10].mxu1 %v6084_v12 }
 0x53b   :  { %3521 = vmatpush1.bf16.msra.mxu0 %v3520_v7  ;;  %3649 = vmatpush1.bf16.msra.mxu1 %v3648_v8  ;;  %v1895_v7 = vld [vmem:[%s7070_s10 + $0x930] sm:$0xff]  ;;  %v1902_v8 = vld [vmem:[%s7070_s10 + $0x968] sm:$0xff] }
 0x53c   :  { %3523 = vmatprep.subr.bf16.mxu0 %v3522_v13  ;;  %3651 = vmatprep.subr.bf16.mxu1 %v3650_v14  ;;  %v1897_v13 = vld [vmem:[%s7070_s10 + $0x940] sm:$0xff]  ;;  %v1904_v14 = vld [vmem:[%s7070_s10 + $0x978] sm:$0xff]  ;;  %v3540_v19 = vpack.c.bf16 %v1902_v8, %v1895_v7  ;;  %v1966_v8 = vld [vmem:[%s7070_s10 + $0xb68] sm:$0xff] }
 0x53d   :  { %v3668_v20 = vpack.c.bf16 %v1904_v14, %v1897_v13  ;;  %v1960_v7 = vld [vmem:[%s7070_s10 + $0xb38] sm:$0xff]  ;;  %v1975_v13 = vld [vmem:[%s7070_s10 + $0xbb0] sm:$0xff]  ;;  %v3556_v14 = vpack.c.bf16 %v1958_v1, %v1951_v0  ;;  %v2022_v1 = vld [vmem:[%s7070_s10 + $0xd28] sm:$0xff] }
 0x53e   :  { %v2016_v0 = vld [vmem:[%s7070_s10 + $0xcf8] sm:$0xff] }
 0x53f   :  { %3525 = vmatpush1.bf16.msra.mxu0 %v3524_v21  ;;  %3653 = vmatpush1.bf16.msra.mxu1 %v3652_v23  ;;  %v1909_v21 = vld [vmem:[%s7070_s10 + $0x9a0] sm:$0xff]  ;;  %v1916_v23 = vld [vmem:[%s7070_s10 + $0x9d8] sm:$0xff] }
 0x540   :  { %3527 = vmatprep.subr.bf16.mxu0 %v3526_v28  ;;  %3655 = vmatprep.subr.bf16.mxu1 %v3654_v29  ;;  %v1911_v28 = vld [vmem:[%s7070_s10 + $0x9b0] sm:$0xff]  ;;  %v1918_v29 = vld [vmem:[%s7070_s10 + $0x9e8] sm:$0xff]  ;;  %v3544_v35 = vpack.c.bf16 %v1916_v23, %v1909_v21  ;;  %v1980_v23 = vld [vmem:[%s7070_s10 + $0xbd8] sm:$0xff] }
 0x541   :  { %v3672_v36 = vpack.c.bf16 %v1918_v29, %v1911_v28  ;;  %v1974_v21 = vld [vmem:[%s7070_s10 + $0xba8] sm:$0xff]  ;;  %v1989_v28 = vld [vmem:[%s7070_s10 + $0xc20] sm:$0xff]  ;;  %v3560_v29 = vpack.c.bf16 %v1972_v17, %v1965_v16  ;;  %v2036_v17 = vld [vmem:[%s7070_s10 + $0xd98] sm:$0xff] }
 0x542   :  { %v2030_v16 = vld [vmem:[%s7070_s10 + $0xd68] sm:$0xff] }
 0x543   :  { %v6158_v51 = vpop.f32.mrb[8].mxu1  ;;  %3529 = vmatpush1.bf16.msra.mxu0 %v3528_v38  ;;  %3657 = vmatpush1.bf16.msra.mxu1 %v3656_v39  ;;  %v1923_v38 = vld [vmem:[%s7070_s10 + $0xa10] sm:$0xff]  ;;  %v1930_v39 = vld [vmem:[%s7070_s10 + $0xa48] sm:$0xff] }
 0x544   :  { %v1594_v58 = vpop.f32.mrb[9].mxu1  ;;  %3531 = vmatprep.subr.bf16.mxu0 %v3530_v42  ;;  %3659 = vmatprep.subr.bf16.mxu1 %v3658_v47  ;;  %v1925_v42 = vld [vmem:[%s7070_s10 + $0xa20] sm:$0xff]  ;;  %v1932_v47 = vld [vmem:[%s7070_s10 + $0xa58] sm:$0xff]  ;;  %v3548_v44 = vpack.c.bf16 %v1930_v39, %v1923_v38  ;;  %v1994_v39 = vld [vmem:[%s7070_s10 + $0xc48] sm:$0xff] }
 0x545   :  { %v1595_v63 = vadd.f32 %v1594_v58, %v1444_v50  ;;  %v1947_v50 = vld [vmem:[%s7070_s10 + $0xad0] sm:$0xff]  ;;  %v3676_v52 = vpack.c.bf16 %v1932_v47, %v1925_v42  ;;  %v1946_v58 = vld [vmem:[%s7070_s10 + $0xac8] sm:$0xff]  ;;  %v1988_v38 = vld [vmem:[%s7070_s10 + $0xc18] sm:$0xff]  ;;  %v3564_v47 = vpack.c.bf16 %v1986_v32, %v1979_v31 }
 0x546   :  { %v3678_v56 = vpack.c.bf16 %v1947_v50, %v1940_v49  ;;  %v2003_v42 = vld [vmem:[%s7070_s10 + $0xc90] sm:$0xff]  ;;  %v2000_v49 = vld [vmem:[%s7070_s10 + $0xc78] sm:$0xff]  ;;  %v2037_v31 = vld [vmem:[%s7070_s10 + $0xda0] sm:$0xff] }
 0x547   :  { %v6184_v3 = vmax.f32 %v1595_v63, 0.0  ;;  %3533 = vmatpush1.bf16.msra.mxu0 %v3532_v55  ;;  %3661 = vmatpush1.bf16.msra.mxu1 %v3660_v22  ;;  %v1944_v55 = vld [vmem:[%s7070_s10 + $0xab8] sm:$0xff]  ;;  %v3550_v22 = vpack.c.bf16 %v1945_v48, %v1938_v25  ;;  %v3680_v63 = vpack.c.bf16 %v1946_v58, %v1939_v57  ;;  %v1993_v48 = vld [vmem:[%s7070_s10 + $0xc40] sm:$0xff] }
 0x548   :  { %3535 = vmatprep.subr.bf16.mxu0 %v3534_v54  ;;  %3663 = vmatprep.subr.bf16.mxu1 %v3662_v24  ;;  %v1952_v54 = vld [vmem:[%s7070_s10 + $0xaf8] sm:$0xff]  ;;  %v1959_v24 = vld [vmem:[%s7070_s10 + $0xb30] sm:$0xff]  ;;  %v3552_v62 = vpack.c.bf16 %v1944_v55, %v1937_v53  ;;  %v2002_v53 = vld [vmem:[%s7070_s10 + $0xc88] sm:$0xff]  ;;  %v3568_v58 = vpack.c.bf16 %v2000_v49, %v1993_v48 }
 0x549   :  { %2221 = vmatprep.mubr.f32.mxu0 %v6184_v3  ;;  %2363 = vmatprep.mubr.f32.mxu1 %v6184_v3  ;;  %v3554_v2 = vpack.c.bf16 %v1959_v24, %v1952_v54  ;;  %v2008_v55 = vld [vmem:[%s7070_s10 + $0xcb8] sm:$0xff]  ;;  %v2017_v57 = vld [vmem:[%s7070_s10 + $0xd00] sm:$0xff]  ;;  %v2007_v24 = vld [vmem:[%s7070_s10 + $0xcb0] sm:$0xff] }
 0x54a   :  { %v2044_v32 = vld [vmem:[%s7070_s10 + $0xdd8] sm:$0xff]  ;;  %v1607_v48 = vld [vmem:[%s7070_s10 + $0x30] sm:$0xff] }
 0x54b   :  { %3537 = vmatpush1.bf16.msra.mxu0 %v3536_v4  ;;  %3665 = vmatpush1.bf16.msra.mxu1 %v3664_v5  ;;  %v3682_v4 = vpack.c.bf16 %v1961_v60, %v1954_v59  ;;  %v1953_v5 = vld [vmem:[%s7070_s10 + $0xb00] sm:$0xff]  ;;  %v2014_v59 = vld [vmem:[%s7070_s10 + $0xce8] sm:$0xff]  ;;  %v1620_v49 = vld [vmem:[%s7070_s10 + $0x98] sm:$0xff] }
 0x54c   :  { %3539 = vmatprep.subr.bf16.mxu0 %v3538_v9  ;;  %3667 = vmatprep.subr.bf16.mxu1 %v3666_v10  ;;  %v1973_v9 = vld [vmem:[%s7070_s10 + $0xba0] sm:$0xff]  ;;  %v1968_v10 = vld [vmem:[%s7070_s10 + $0xb78] sm:$0xff]  ;;  %v3684_v15 = vpack.c.bf16 %v1960_v7, %v1953_v5  ;;  %v2031_v5 = vld [vmem:[%s7070_s10 + $0xd70] sm:$0xff]  ;;  %v3572_v7 = vpack.c.bf16 %v2014_v59, %v2007_v24 }
 0x54d   :  { %v3558_v18 = vpack.c.bf16 %v1973_v9, %v1966_v8  ;;  %v2021_v9 = vld [vmem:[%s7070_s10 + $0xd20] sm:$0xff]  ;;  %v1628_v59 = vld [vmem:[%s7070_s10 + $0xd8] sm:$0xff] }
 0x54f   :  { %3541 = vmatpush1.bf16.msra.mxu0 %v3540_v19  ;;  %3669 = vmatpush1.bf16.msra.mxu1 %v3668_v20  ;;  %v3686_v19 = vpack.c.bf16 %v1975_v13, %v1968_v10  ;;  %v1967_v20 = vld [vmem:[%s7070_s10 + $0xb70] sm:$0xff]  ;;  %v2028_v10 = vld [vmem:[%s7070_s10 + $0xd58] sm:$0xff] }
 0x550   :  { %3543 = vmatprep.subr.bf16.mxu0 %v3542_v26  ;;  %3671 = vmatprep.subr.bf16.mxu1 %v3670_v27  ;;  %v1987_v26 = vld [vmem:[%s7070_s10 + $0xc10] sm:$0xff]  ;;  %v1982_v27 = vld [vmem:[%s7070_s10 + $0xbe8] sm:$0xff]  ;;  %v3688_v30 = vpack.c.bf16 %v1974_v21, %v1967_v20  ;;  %v2045_v20 = vld [vmem:[%s7070_s10 + $0xde0] sm:$0xff]  ;;  %v3576_v21 = vpack.c.bf16 %v2028_v10, %v2021_v9 }
 0x551   :  { %v3562_v34 = vpack.c.bf16 %v1987_v26, %v1980_v23  ;;  %v2035_v26 = vld [vmem:[%s7070_s10 + $0xd90] sm:$0xff]  ;;  %v1648_v10 = vld [vmem:[%s7070_s10 + $0x178] sm:$0xff] }
 0x553   :  { %3545 = vmatpush1.bf16.msra.mxu0 %v3544_v35  ;;  %3673 = vmatpush1.bf16.msra.mxu1 %v3672_v36  ;;  %v3690_v35 = vpack.c.bf16 %v1989_v28, %v1982_v27  ;;  %v1981_v36 = vld [vmem:[%s7070_s10 + $0xbe0] sm:$0xff]  ;;  %v2042_v27 = vld [vmem:[%s7070_s10 + $0xdc8] sm:$0xff]  ;;  %v1440_v28 = vrot.slane %v6046_v37, %v5460_v33 }
 0x554   :  { %3547 = vmatprep.subr.bf16.mxu0 %v3546_v40  ;;  %3675 = vmatprep.subr.bf16.mxu1 %v3674_v41  ;;  %v2001_v40 = vld [vmem:[%s7070_s10 + $0xc80] sm:$0xff]  ;;  %v1996_v41 = vld [vmem:[%s7070_s10 + $0xc58] sm:$0xff]  ;;  %v3692_v25 = vpack.c.bf16 %v1988_v38, %v1981_v36  ;;  %v1726_v36 = vld [vmem:[%s7070_s10 + $0x3e8] sm:$0xff]  ;;  %v3580_v38 = vpack.c.bf16 %v2042_v27, %v2035_v26 }
 0x555   :  { %v3566_v50 = vpack.c.bf16 %v2001_v40, %v1994_v39  ;;  %v1613_v37 = vld [vmem:[%s7070_s10 + $0x60] sm:$0xff]  ;;  %v3708_v39 = vpack.c.bf16 %v2044_v32, %v2037_v31  ;;  %v1593_v40 = vadd.f32 %v6158_v51, %v1440_v28  ;;  %v1614_v51 = vld [vmem:[%s7070_s10 + $0x68] sm:$0xff]  ;;  %v1656_v26 = vld [vmem:[%s7070_s10 + $0x1b8] sm:$0xff] }
 0x556   :  { %v1662_v27 = vld [vmem:[%s7070_s10 + $0x1e8] sm:$0xff]  ;;  %v1669_v28 = vld [vmem:[%s7070_s10 + $0x220] sm:$0xff] }
 0x557   :  { %3549 = vmatpush1.bf16.msra.mxu0 %v3548_v44  ;;  %3677 = vmatpush1.bf16.msra.mxu1 %v3676_v52  ;;  %v3694_v44 = vpack.c.bf16 %v2003_v42, %v1996_v41  ;;  %v1995_v52 = vld [vmem:[%s7070_s10 + $0xc50] sm:$0xff] }
 0x558   :  { %3551 = vmatprep.subr.bf16.mxu0 %v3550_v22  ;;  %3679 = vmatprep.subr.bf16.mxu1 %v3678_v56  ;;  %v2015_v22 = vld [vmem:[%s7070_s10 + $0xcf0] sm:$0xff]  ;;  %v2010_v56 = vld [vmem:[%s7070_s10 + $0xcc8] sm:$0xff]  ;;  %v3696_v54 = vpack.c.bf16 %v2002_v53, %v1995_v52  ;;  %v1740_v52 = vld [vmem:[%s7070_s10 + $0x458] sm:$0xff] }
 0x559   :  { %v3570_v60 = vpack.c.bf16 %v2015_v22, %v2008_v55  ;;  %v6479_v55 = vmax.f32 %v1593_v40, 0.0  ;;  %v3840_v22 = vpack.c.bf16 %v1614_v51, %v1607_v48  ;;  %v1676_v40 = vld [vmem:[%s7070_s10 + $0x258] sm:$0xff] }
 0x55b   :  { %3553 = vmatpush1.bf16.msra.mxu0 %v3552_v62  ;;  %3681 = vmatpush1.bf16.msra.mxu1 %v3680_v63  ;;  %v3698_v62 = vpack.c.bf16 %v2017_v57, %v2010_v56  ;;  %v2009_v63 = vld [vmem:[%s7070_s10 + $0xcc0] sm:$0xff]  ;;  %v1619_v56 = vld [vmem:[%s7070_s10 + $0x90] sm:$0xff]  ;;  %v1626_v57 = vld [vmem:[%s7070_s10 + $0xc8] sm:$0xff] }
 0x55c   :  { %3555 = vmatprep.subr.bf16.mxu0 %v3554_v2  ;;  %3683 = vmatprep.subr.bf16.mxu1 %v3682_v4  ;;  %v2029_v2 = vld [vmem:[%s7070_s10 + $0xd60] sm:$0xff]  ;;  %v2024_v4 = vld [vmem:[%s7070_s10 + $0xd38] sm:$0xff]  ;;  %v3700_v8 = vpack.c.bf16 %v2016_v0, %v2009_v63  ;;  %v1747_v63 = vld [vmem:[%s7070_s10 + $0x490] sm:$0xff] }
 0x55d   :  { %v3574_v13 = vpack.c.bf16 %v2029_v2, %v2022_v1  ;;  %v1754_v0 = vld [vmem:[%s7070_s10 + $0x4c8] sm:$0xff]  ;;  %v3716_v1 = vpack.c.bf16 %v1626_v57, %v1619_v56  ;;  %v1697_v56 = vld [vmem:[%s7070_s10 + $0x300] sm:$0xff]  ;;  %v1803_v57 = vld [vmem:[%s7070_s10 + $0x650] sm:$0xff] }
 0x55e   :  { %v3846_v9 = vpack.c.bf16 %v1754_v0, %v1747_v63  ;;  %v1691_v63 = vld [vmem:[%s7070_s10 + $0x2d0] sm:$0xff] }
 0x55f   :  { %3557 = vmatpush1.bf16.msra.mxu0 %v3556_v14  ;;  %3685 = vmatpush1.bf16.msra.mxu1 %v3684_v15  ;;  %v3702_v14 = vpack.c.bf16 %v2031_v5, %v2024_v4  ;;  %v2023_v15 = vld [vmem:[%s7070_s10 + $0xd30] sm:$0xff]  ;;  %v1633_v5 = vld [vmem:[%s7070_s10 + $0x100] sm:$0xff] }
 0x560   :  { %3559 = vmatprep.subr.bf16.mxu0 %v3558_v18  ;;  %3687 = vmatprep.subr.bf16.mxu1 %v3686_v19  ;;  %v2043_v18 = vld [vmem:[%s7070_s10 + $0xdd0] sm:$0xff]  ;;  %v2038_v19 = vld [vmem:[%s7070_s10 + $0xda8] sm:$0xff]  ;;  %v3704_v23 = vpack.c.bf16 %v2030_v16, %v2023_v15  ;;  %v1768_v15 = vld [vmem:[%s7070_s10 + $0x538] sm:$0xff] }
 0x563   :  { %3561 = vmatpush1.bf16.msra.mxu0 %v3560_v29  ;;  %3689 = vmatpush1.bf16.msra.mxu1 %v3688_v30  ;;  %v3578_v29 = vpack.c.bf16 %v2043_v18, %v2036_v17  ;;  %v3706_v30 = vpack.c.bf16 %v2045_v20, %v2038_v19  ;;  %v1647_v19 = vld [vmem:[%s7070_s10 + $0x170] sm:$0xff]  ;;  %v1654_v20 = vld [vmem:[%s7070_s10 + $0x1a8] sm:$0xff] }
 0x564   :  { %3563 = vmatprep.subr.bf16.mxu0 %v3562_v34  ;;  %3691 = vmatprep.subr.bf16.mxu1 %v3690_v35  ;;  %v1606_v34 = vld [vmem:[%s7070_s10 + $0x28] sm:$0xff]  ;;  %v1719_v35 = vld [vmem:[%s7070_s10 + $0x3b0] sm:$0xff]  ;;  %v3724_v31 = vpack.c.bf16 %v1654_v20, %v1647_v19 }
 0x565   :  { %v3710_v41 = vpack.c.bf16 %v1613_v37, %v1606_v34  ;;  %v3838_v42 = vpack.c.bf16 %v1726_v36, %v1719_v35  ;;  %v3726_v34 = vpack.c.bf16 %v1669_v28, %v1662_v27  ;;  %v1661_v37 = vld [vmem:[%s7070_s10 + $0x1e0] sm:$0xff]  ;;  %v1668_v35 = vld [vmem:[%s7070_s10 + $0x218] sm:$0xff]  ;;  %v1663_v36 = vld [vmem:[%s7070_s10 + $0x1f0] sm:$0xff] }
 0x566   :  { %v1943_v19 = vld [vmem:[%s7070_s10 + $0xab0] sm:$0xff]  ;;  %v1950_v20 = vld [vmem:[%s7070_s10 + $0xae8] sm:$0xff]  ;;  %v1717_v27 = vld [vmem:[%s7070_s10 + $0x3a0] sm:$0xff] }
 0x567   :  { %3565 = vmatpush1.bf16.msra.mxu0 %v3564_v47  ;;  %3693 = vmatpush1.bf16.msra.mxu1 %v3692_v25  ;;  %v1605_v47 = vld [vmem:[%s7070_s10 + $0x20] sm:$0xff]  ;;  %v1612_v25 = vld [vmem:[%s7070_s10 + $0x58] sm:$0xff] }
 0x568   :  { %3567 = vmatprep.subr.bf16.mxu0 %v3566_v50  ;;  %3695 = vmatprep.subr.bf16.mxu1 %v3694_v44  ;;  %v1627_v50 = vld [vmem:[%s7070_s10 + $0xd0] sm:$0xff]  ;;  %v1733_v44 = vld [vmem:[%s7070_s10 + $0x420] sm:$0xff]  ;;  %v3712_v53 = vpack.c.bf16 %v1612_v25, %v1605_v47  ;;  %v1796_v47 = vld [vmem:[%s7070_s10 + $0x618] sm:$0xff]  ;;  %v3728_v25 = vpack.c.bf16 %v1668_v35, %v1661_v37 }
 0x569   :  { %v3842_v24 = vpack.c.bf16 %v1740_v52, %v1733_v44  ;;  %v1677_v44 = vld [vmem:[%s7070_s10 + $0x260] sm:$0xff]  ;;  %v1724_v28 = vld [vmem:[%s7070_s10 + $0x3d8] sm:$0xff] }
 0x56a   :  { %v1957_v37 = vld [vmem:[%s7070_s10 + $0xb20] sm:$0xff]  ;;  %v1964_v35 = vld [vmem:[%s7070_s10 + $0xb58] sm:$0xff] }
 0x56b   :  { %3569 = vmatpush1.bf16.msra.mxu0 %v3568_v58  ;;  %3697 = vmatpush1.bf16.msra.mxu1 %v3696_v54  ;;  %v1621_v58 = vld [vmem:[%s7070_s10 + $0xa0] sm:$0xff]  ;;  %v3714_v54 = vpack.c.bf16 %v1627_v50, %v1620_v49  ;;  %v1675_v49 = vld [vmem:[%s7070_s10 + $0x250] sm:$0xff]  ;;  %v1682_v50 = vld [vmem:[%s7070_s10 + $0x288] sm:$0xff] }
 0x56c   :  { %3571 = vmatprep.subr.bf16.mxu0 %v3570_v60  ;;  %3699 = vmatprep.subr.bf16.mxu1 %v3698_v62  ;;  %v1634_v60 = vld [vmem:[%s7070_s10 + $0x108] sm:$0xff]  ;;  %v1641_v62 = vld [vmem:[%s7070_s10 + $0x140] sm:$0xff]  ;;  %v3844_v2 = vpack.c.bf16 %v1628_v59, %v1621_v58 }
 0x56d   :  { %v3718_v4 = vpack.c.bf16 %v1641_v62, %v1634_v60  ;;  %v1810_v58 = vld [vmem:[%s7070_s10 + $0x688] sm:$0xff]  ;;  %v1689_v60 = vld [vmem:[%s7070_s10 + $0x2c0] sm:$0xff]  ;;  %v1696_v62 = vld [vmem:[%s7070_s10 + $0x2f8] sm:$0xff] }
 0x56e   :  { %v3862_v0 = vpack.c.bf16 %v1810_v58, %v1803_v57  ;;  %v1859_v57 = vld [vmem:[%s7070_s10 + $0x810] sm:$0xff] }
 0x56f   :  { %3573 = vmatpush1.bf16.msra.mxu0 %v3572_v7  ;;  %3701 = vmatpush1.bf16.msra.mxu1 %v3700_v8  ;;  %v1640_v7 = vld [vmem:[%s7070_s10 + $0x138] sm:$0xff]  ;;  %v1635_v8 = vld [vmem:[%s7070_s10 + $0x110] sm:$0xff] }
 0x570   :  { %3575 = vmatprep.subr.bf16.mxu0 %v3574_v13  ;;  %3703 = vmatprep.subr.bf16.mxu1 %v3702_v14  ;;  %v1655_v13 = vld [vmem:[%s7070_s10 + $0x1b0] sm:$0xff]  ;;  %v1761_v14 = vld [vmem:[%s7070_s10 + $0x500] sm:$0xff]  ;;  %v3720_v16 = vpack.c.bf16 %v1640_v7, %v1633_v5  ;;  %v1824_v7 = vld [vmem:[%s7070_s10 + $0x6f8] sm:$0xff] }
 0x571   :  { %v3722_v18 = vpack.c.bf16 %v1655_v13, %v1648_v10  ;;  %v1817_v5 = vld [vmem:[%s7070_s10 + $0x6c0] sm:$0xff]  ;;  %v1703_v10 = vld [vmem:[%s7070_s10 + $0x330] sm:$0xff]  ;;  %v1710_v13 = vld [vmem:[%s7070_s10 + $0x368] sm:$0xff] }
 0x573   :  { %3577 = vmatpush1.bf16.msra.mxu0 %v3576_v21  ;;  %3705 = vmatpush1.bf16.msra.mxu1 %v3704_v23  ;;  %v1649_v21 = vld [vmem:[%s7070_s10 + $0x180] sm:$0xff]  ;;  %v3850_v23 = vpack.c.bf16 %v1768_v15, %v1761_v14  ;;  %v3866_v15 = vpack.c.bf16 %v1824_v7, %v1817_v5 }
 0x574   :  { %3579 = vmatprep.subr.bf16.mxu0 %v3578_v29  ;;  %3707 = vmatprep.subr.bf16.mxu1 %v3706_v30  ;;  %v1775_v29 = vld [vmem:[%s7070_s10 + $0x570] sm:$0xff]  ;;  %v1782_v30 = vld [vmem:[%s7070_s10 + $0x5a8] sm:$0xff]  ;;  %v3852_v32 = vpack.c.bf16 %v1656_v26, %v1649_v21  ;;  %v1705_v14 = vld [vmem:[%s7070_s10 + $0x340] sm:$0xff]  ;;  %v3740_v21 = vpack.c.bf16 %v1710_v13, %v1703_v10 }
 0x575   :  { %v1873_v5 = vld [vmem:[%s7070_s10 + $0x880] sm:$0xff]  ;;  %v1999_v10 = vld [vmem:[%s7070_s10 + $0xc70] sm:$0xff]  ;;  %v2006_v13 = vld [vmem:[%s7070_s10 + $0xca8] sm:$0xff] }
 0x577   :  { %3581 = vmatpush1.bf16.msra.mxu0 %v3580_v38  ;;  %3709 = vmatpush1.bf16.msra.mxu1 %v3708_v39  ;;  %v3854_v38 = vpack.c.bf16 %v1782_v30, %v1775_v29  ;;  %v1670_v39 = vld [vmem:[%s7070_s10 + $0x228] sm:$0xff]  ;;  %v3870_v29 = vpack.c.bf16 %v1950_v20, %v1943_v19  ;;  %v1831_v30 = vld [vmem:[%s7070_s10 + $0x730] sm:$0xff]  ;;  %v3886_v20 = vpack.c.bf16 %v2006_v13, %v1999_v10 }
 0x578   :  { %3711 = vmatprep.subr.bf16.mxu0 %v3710_v41  ;;  %3839 = vmatprep.subr.bf16.mxu1 %v3838_v42  ;;  %v1683_v41 = vld [vmem:[%s7070_s10 + $0x290] sm:$0xff]  ;;  %v1789_v42 = vld [vmem:[%s7070_s10 + $0x5e0] sm:$0xff]  ;;  %v3856_v48 = vpack.c.bf16 %v1670_v39, %v1663_v36  ;;  %v3744_v36 = vpack.c.bf16 %v1724_v28, %v1717_v27  ;;  %v2020_v28 = vld [vmem:[%s7070_s10 + $0xd18] sm:$0xff] }
 0x579   :  { %v3730_v51 = vpack.c.bf16 %v1683_v41, %v1676_v40  ;;  %v3858_v52 = vpack.c.bf16 %v1796_v47, %v1789_v42  ;;  %v1731_v39 = vld [vmem:[%s7070_s10 + $0x410] sm:$0xff]  ;;  %v1738_v40 = vld [vmem:[%s7070_s10 + $0x448] sm:$0xff]  ;;  %v1845_v41 = vld [vmem:[%s7070_s10 + $0x7a0] sm:$0xff]  ;;  %v3874_v47 = vpack.c.bf16 %v1964_v35, %v1957_v37 }
 0x57a   :  { %2222 = vmatmul.mubr.f32.vlgmr.msra.gmra.mrb[4].mxu0 %v6479_v55  ;;  %2364 = vmatmul.mubr.f32.vlgmr.msra.gmra.mrb[10].mxu1 %v6479_v55  ;;  %v1887_v19 = vld [vmem:[%s7070_s10 + $0x8f0] sm:$0xff]  ;;  %v2013_v27 = vld [vmem:[%s7070_s10 + $0xce0] sm:$0xff] }
 0x57b   :  { %3713 = vmatpush1.bf16.msra.mxu0 %v3712_v53  ;;  %2434 = vmatprep.mubr.f32.mxu0 %v6076_v6  ;;  %v1684_v53 = vld [vmem:[%s7070_s10 + $0x298] sm:$0xff]  ;;  %v1901_v37 = vld [vmem:[%s7070_s10 + $0x960] sm:$0xff]  ;;  %v3890_v35 = vpack.c.bf16 %v2020_v28, %v2013_v27  ;;  %v1871_v27 = vld [vmem:[%s7070_s10 + $0x870] sm:$0xff] }
 0x57c   :  { %3841 = vmatpush3.bf16.msra.mxu1 %v3840_v22  ;;  %2576 = vmatprep.mubr.f32.mxu1 %v6076_v6  ;;  %v1642_v6 = vld [vmem:[%s7070_s10 + $0x148] sm:$0xff] }
 0x57d   :  { %3715 = vmatprep.subr.bf16.mxu0 %v3714_v54  ;;  %3843 = vmatprep.subr.bf16.mxu1 %v3842_v24  ;;  %v3848_v17 = vpack.c.bf16 %v1642_v6, %v1635_v8  ;;  %v1690_v22 = vld [vmem:[%s7070_s10 + $0x2c8] sm:$0xff]  ;;  %v3732_v54 = vpack.c.bf16 %v1682_v50, %v1675_v49  ;;  %v3860_v24 = vpack.c.bf16 %v1684_v53, %v1677_v44  ;;  %v1971_v49 = vld [vmem:[%s7070_s10 + $0xb90] sm:$0xff] }
 0x57e   :  { %v3734_v59 = vpack.c.bf16 %v1697_v56, %v1690_v22  ;;  %v3736_v8 = vpack.c.bf16 %v1696_v62, %v1689_v60  ;;  %v1978_v50 = vld [vmem:[%s7070_s10 + $0xbc8] sm:$0xff]  ;;  %v3748_v44 = vpack.c.bf16 %v1738_v40, %v1731_v39  ;;  %v1745_v22 = vld [vmem:[%s7070_s10 + $0x480] sm:$0xff]  ;;  %v1752_v56 = vld [vmem:[%s7070_s10 + $0x4b8] sm:$0xff] }
 0x57f   :  { %3717 = vmatpush1.bf16.msra.mxu0 %v3716_v1  ;;  %v1698_v1 = vld [vmem:[%s7070_s10 + $0x308] sm:$0xff]  ;;  %v3878_v58 = vpack.c.bf16 %v1978_v50, %v1971_v49  ;;  %v1985_v60 = vld [vmem:[%s7070_s10 + $0xc00] sm:$0xff]  ;;  %v1992_v62 = vld [vmem:[%s7070_s10 + $0xc38] sm:$0xff] }
 0x580   :  { %3845 = vmatpush3.bf16.msra.mxu1 %v3844_v2  ;;  %3719 = vmatprep.subr.bf16.mxu0 %v3718_v4  ;;  %v1704_v2 = vld [vmem:[%s7070_s10 + $0x338] sm:$0xff]  ;;  %v1711_v4 = vld [vmem:[%s7070_s10 + $0x370] sm:$0xff]  ;;  %v3882_v7 = vpack.c.bf16 %v1992_v62, %v1985_v60  ;;  %v1809_v39 = vld [vmem:[%s7070_s10 + $0x680] sm:$0xff] }
 0x581   :  { %3847 = vmatprep.subr.bf16.mxu1 %v3846_v9  ;;  %v3864_v9 = vpack.c.bf16 %v1698_v1, %v1691_v63  ;;  %v3738_v6 = vpack.c.bf16 %v1711_v4, %v1704_v2  ;;  %v3752_v63 = vpack.c.bf16 %v1752_v56, %v1745_v22  ;;  %v1759_v2 = vld [vmem:[%s7070_s10 + $0x4f0] sm:$0xff]  ;;  %v1766_v4 = vld [vmem:[%s7070_s10 + $0x528] sm:$0xff]  ;;  %v2041_v22 = vld [vmem:[%s7070_s10 + $0xdc0] sm:$0xff] }
 0x582   :  { %v2027_v40 = vld [vmem:[%s7070_s10 + $0xd50] sm:$0xff]  ;;  %v2048_v56 = vld [vmem:[%s7070_s10 + $0xdf8] sm:$0xff]  ;;  %v1929_v60 = vld [vmem:[%s7070_s10 + $0xa40] sm:$0xff] }
 0x583   :  { %3721 = vmatpush1.bf16.msra.mxu0 %v3720_v16  ;;  %v1712_v16 = vld [vmem:[%s7070_s10 + $0x378] sm:$0xff]  ;;  %v1915_v49 = vld [vmem:[%s7070_s10 + $0x9d0] sm:$0xff]  ;;  %v3898_v62 = vpack.c.bf16 %v2048_v56, %v2041_v22  ;;  %v1878_v28 = vld [vmem:[%s7070_s10 + $0x8a8] sm:$0xff] }
 0x584   :  { %3849 = vmatpush3.bf16.msra.mxu1 %v3848_v17  ;;  %3723 = vmatprep.subr.bf16.mxu0 %v3722_v18  ;;  %v1718_v17 = vld [vmem:[%s7070_s10 + $0x3a8] sm:$0xff]  ;;  %v1725_v18 = vld [vmem:[%s7070_s10 + $0x3e0] sm:$0xff]  ;;  %v1927_v22 = vld [vmem:[%s7070_s10 + $0xa30] sm:$0xff] }
 0x585   :  { %3851 = vmatprep.subr.bf16.mxu1 %v3850_v23  ;;  %v3868_v23 = vpack.c.bf16 %v1712_v16, %v1705_v14  ;;  %v3742_v26 = vpack.c.bf16 %v1725_v18, %v1718_v17  ;;  %v3756_v14 = vpack.c.bf16 %v1766_v4, %v1759_v2  ;;  %v1773_v17 = vld [vmem:[%s7070_s10 + $0x560] sm:$0xff]  ;;  %v1780_v18 = vld [vmem:[%s7070_s10 + $0x598] sm:$0xff]  ;;  %v1934_v56 = vld [vmem:[%s7070_s10 + $0xa68] sm:$0xff] }
 0x587   :  { %3725 = vmatpush1.bf16.msra.mxu0 %v3724_v31  ;;  %v1838_v31 = vld [vmem:[%s7070_s10 + $0x768] sm:$0xff] }
 0x588   :  { %3853 = vmatpush3.bf16.msra.mxu1 %v3852_v32  ;;  %3727 = vmatprep.subr.bf16.mxu0 %v3726_v34  ;;  %v1732_v32 = vld [vmem:[%s7070_s10 + $0x418] sm:$0xff]  ;;  %v1739_v34 = vld [vmem:[%s7070_s10 + $0x450] sm:$0xff] }
 0x589   :  { %3855 = vmatprep.subr.bf16.mxu1 %v3854_v38  ;;  %v3872_v38 = vpack.c.bf16 %v1838_v31, %v1831_v30  ;;  %v3746_v42 = vpack.c.bf16 %v1739_v34, %v1732_v32  ;;  %v1787_v32 = vld [vmem:[%s7070_s10 + $0x5d0] sm:$0xff]  ;;  %v1794_v34 = vld [vmem:[%s7070_s10 + $0x608] sm:$0xff] }
 0x58b   :  { %3729 = vmatpush1.bf16.msra.mxu0 %v3728_v25  ;;  %v1852_v25 = vld [vmem:[%s7070_s10 + $0x7d8] sm:$0xff] }
 0x58c   :  { %3857 = vmatpush3.bf16.msra.mxu1 %v3856_v48  ;;  %3731 = vmatprep.subr.bf16.mxu0 %v3730_v51  ;;  %v1746_v48 = vld [vmem:[%s7070_s10 + $0x488] sm:$0xff]  ;;  %v1753_v51 = vld [vmem:[%s7070_s10 + $0x4c0] sm:$0xff] }
 0x58d   :  { %3859 = vmatprep.subr.bf16.mxu1 %v3858_v52  ;;  %v3876_v52 = vpack.c.bf16 %v1852_v25, %v1845_v41  ;;  %v3750_v53 = vpack.c.bf16 %v1753_v51, %v1746_v48  ;;  %v2034_v41 = vld [vmem:[%s7070_s10 + $0xd88] sm:$0xff]  ;;  %v1801_v48 = vld [vmem:[%s7070_s10 + $0x640] sm:$0xff]  ;;  %v1808_v51 = vld [vmem:[%s7070_s10 + $0x678] sm:$0xff] }
 0x58e   :  { %v3894_v50 = vpack.c.bf16 %v2034_v41, %v2027_v40  ;;  %v1899_v40 = vld [vmem:[%s7070_s10 + $0x950] sm:$0xff]  ;;  %v1906_v41 = vld [vmem:[%s7070_s10 + $0x988] sm:$0xff] }
 0x58f   :  { %3733 = vmatpush1.bf16.msra.mxu0 %v3732_v54  ;;  %v1866_v54 = vld [vmem:[%s7070_s10 + $0x848] sm:$0xff] }
 0x590   :  { %3861 = vmatpush3.bf16.msra.mxu1 %v3860_v24  ;;  %3735 = vmatprep.subr.bf16.mxu0 %v3734_v59  ;;  %v1760_v24 = vld [vmem:[%s7070_s10 + $0x4f8] sm:$0xff]  ;;  %v1767_v59 = vld [vmem:[%s7070_s10 + $0x530] sm:$0xff] }
 0x591   :  { %3863 = vmatprep.subr.bf16.mxu1 %v3862_v0  ;;  %v3880_v0 = vpack.c.bf16 %v1866_v54, %v1859_v57  ;;  %v3754_v1 = vpack.c.bf16 %v1767_v59, %v1760_v24  ;;  %v3768_v57 = vpack.c.bf16 %v1808_v51, %v1801_v48  ;;  %v1815_v24 = vld [vmem:[%s7070_s10 + $0x6b0] sm:$0xff]  ;;  %v1822_v59 = vld [vmem:[%s7070_s10 + $0x6e8] sm:$0xff]  ;;  %v1913_v51 = vld [vmem:[%s7070_s10 + $0x9c0] sm:$0xff] }
 0x592   :  { %v3772_v2 = vpack.c.bf16 %v1822_v59, %v1815_v24  ;;  %v1941_v59 = vld [vmem:[%s7070_s10 + $0xaa0] sm:$0xff] }
 0x593   :  { %3737 = vmatpush1.bf16.msra.mxu0 %v3736_v8  ;;  %v1880_v8 = vld [vmem:[%s7070_s10 + $0x8b8] sm:$0xff] }
 0x594   :  { %3865 = vmatpush3.bf16.msra.mxu1 %v3864_v9  ;;  %3739 = vmatprep.subr.bf16.mxu0 %v3738_v6  ;;  %v1774_v9 = vld [vmem:[%s7070_s10 + $0x568] sm:$0xff]  ;;  %v1781_v6 = vld [vmem:[%s7070_s10 + $0x5a0] sm:$0xff] }
 0x595   :  { %3867 = vmatprep.subr.bf16.mxu1 %v3866_v15  ;;  %v3884_v15 = vpack.c.bf16 %v1880_v8, %v1873_v5  ;;  %v3758_v16 = vpack.c.bf16 %v1781_v6, %v1774_v9  ;;  %v1836_v8 = vld [vmem:[%s7070_s10 + $0x758] sm:$0xff]  ;;  %v1851_v6 = vld [vmem:[%s7070_s10 + $0x7d0] sm:$0xff] }
 0x596   :  { %v1844_v9 = vld [vmem:[%s7070_s10 + $0x798] sm:$0xff] }
 0x597   :  { %3741 = vmatpush1.bf16.msra.mxu0 %v3740_v21  ;;  %v1894_v21 = vld [vmem:[%s7070_s10 + $0x928] sm:$0xff]  ;;  %v3778_v13 = vpack.c.bf16 %v1851_v6, %v1844_v9  ;;  %v1969_v6 = vld [vmem:[%s7070_s10 + $0xb80] sm:$0xff] }
 0x598   :  { %3869 = vmatpush3.bf16.msra.mxu1 %v3868_v23  ;;  %3743 = vmatprep.subr.bf16.mxu0 %v3742_v26  ;;  %v1788_v23 = vld [vmem:[%s7070_s10 + $0x5d8] sm:$0xff]  ;;  %v1795_v26 = vld [vmem:[%s7070_s10 + $0x610] sm:$0xff]  ;;  %v3888_v30 = vpack.c.bf16 %v1894_v21, %v1887_v19 }
 0x599   :  { %3871 = vmatprep.subr.bf16.mxu1 %v3870_v29  ;;  %v3760_v29 = vpack.c.bf16 %v1780_v18, %v1773_v17  ;;  %v3762_v31 = vpack.c.bf16 %v1795_v26, %v1788_v23  ;;  %v1865_v17 = vld [vmem:[%s7070_s10 + $0x840] sm:$0xff]  ;;  %v1864_v21 = vld [vmem:[%s7070_s10 + $0x838] sm:$0xff]  ;;  %v1879_v23 = vld [vmem:[%s7070_s10 + $0x8b0] sm:$0xff] }
 0x59b   :  { %2577 = vmatmul.mubr.f32.vlgmr.msra.gmra.mrb[12].mxu1 %v6084_v12  ;;  %3745 = vmatpush1.bf16.msra.mxu0 %v3744_v36  ;;  %v1908_v36 = vld [vmem:[%s7070_s10 + $0x998] sm:$0xff] }
 0x59c   :  { %3873 = vmatpush3.bf16.msra.mxu1 %v3872_v38  ;;  %2646 = vmatprep.mubr.f32.mxu1 %v6184_v3  ;;  %v1802_v38 = vld [vmem:[%s7070_s10 + $0x648] sm:$0xff] }
 0x59d   :  { %3747 = vmatprep.subr.bf16.mxu0 %v3746_v42  ;;  %3875 = vmatprep.subr.bf16.mxu1 %v3874_v47  ;;  %v3764_v42 = vpack.c.bf16 %v1794_v34, %v1787_v32  ;;  %v3892_v47 = vpack.c.bf16 %v1908_v36, %v1901_v37  ;;  %v3766_v25 = vpack.c.bf16 %v1809_v39, %v1802_v38  ;;  %v1885_v34 = vld [vmem:[%s7070_s10 + $0x8e0] sm:$0xff]  ;;  %v1892_v37 = vld [vmem:[%s7070_s10 + $0x918] sm:$0xff]  ;;  %v1907_v36 = vld [vmem:[%s7070_s10 + $0x990] sm:$0xff] }
 0x59e   :  { %v3792_v38 = vpack.c.bf16 %v1892_v37, %v1885_v34  ;;  %v2033_v34 = vld [vmem:[%s7070_s10 + $0xd80] sm:$0xff] }
 0x59f   :  { %3749 = vmatpush1.bf16.msra.mxu0 %v3748_v44  ;;  %v1922_v44 = vld [vmem:[%s7070_s10 + $0xa08] sm:$0xff] }
 0x5a0   :  { %3877 = vmatpush3.bf16.msra.mxu1 %v3876_v52  ;;  %3751 = vmatprep.subr.bf16.mxu0 %v3750_v53  ;;  %v1816_v52 = vld [vmem:[%s7070_s10 + $0x6b8] sm:$0xff]  ;;  %v1823_v53 = vld [vmem:[%s7070_s10 + $0x6f0] sm:$0xff] }
 0x5a1   :  { %3879 = vmatprep.subr.bf16.mxu1 %v3878_v58  ;;  %v3896_v58 = vpack.c.bf16 %v1922_v44, %v1915_v49  ;;  %v3770_v54 = vpack.c.bf16 %v1823_v53, %v1816_v52  ;;  %v1920_v49 = vld [vmem:[%s7070_s10 + $0x9f8] sm:$0xff]  ;;  %v1935_v44 = vld [vmem:[%s7070_s10 + $0xa70] sm:$0xff] }
 0x5a2   :  { %v3800_v52 = vpack.c.bf16 %v1920_v49, %v1913_v51  ;;  %v7034_v51 = vld [vmem:[%s7072_s11] sm:$0x7f] }
 0x5a3   :  { %3753 = vmatpush1.bf16.msra.mxu0 %v3752_v63  ;;  %v1936_v63 = vld [vmem:[%s7070_s10 + $0xa78] sm:$0xff]  ;;  %v2054_v49 = vrot.slane %v7034_v51, %v5366_v43 }
 0x5a4   :  { %3881 = vmatpush3.bf16.msra.mxu1 %v3880_v0  ;;  %3755 = vmatprep.subr.bf16.mxu0 %v3754_v1  ;;  %v1830_v0 = vld [vmem:[%s7070_s10 + $0x728] sm:$0xff]  ;;  %v1837_v1 = vld [vmem:[%s7070_s10 + $0x760] sm:$0xff]  ;;  %v3900_v4 = vpack.c.bf16 %v1936_v63, %v1929_v60  ;;  %v1948_v60 = vld [vmem:[%s7070_s10 + $0xad8] sm:$0xff] }
 0x5a5   :  { %3883 = vmatprep.subr.bf16.mxu1 %v3882_v7  ;;  %v3774_v5 = vpack.c.bf16 %v1837_v1, %v1830_v0  ;;  %v1829_v7 = vld [vmem:[%s7070_s10 + $0x720] sm:$0xff]  ;;  %v1963_v63 = vld [vmem:[%s7070_s10 + $0xb50] sm:$0xff]  ;;  %v3808_v0 = vpack.c.bf16 %v1948_v60, %v1941_v59 }
 0x5a6   :  { %v3776_v10 = vpack.c.bf16 %v1836_v8, %v1829_v7  ;;  %v1977_v7 = vld [vmem:[%s7070_s10 + $0xbc0] sm:$0xff] }
 0x5a7   :  { %3757 = vmatpush1.bf16.msra.mxu0 %v3756_v14  ;;  %v1843_v14 = vld [vmem:[%s7070_s10 + $0x790] sm:$0xff] }
 0x5a8   :  { %3885 = vmatpush3.bf16.msra.mxu1 %v3884_v15  ;;  %3759 = vmatprep.subr.bf16.mxu0 %v3758_v16  ;;  %v1850_v15 = vld [vmem:[%s7070_s10 + $0x7c8] sm:$0xff] }
 0x5a9   :  { %3887 = vmatprep.subr.bf16.mxu1 %v3886_v20  ;;  %v1858_v16 = vld [vmem:[%s7070_s10 + $0x808] sm:$0xff]  ;;  %v3780_v18 = vpack.c.bf16 %v1850_v15, %v1843_v14  ;;  %v1857_v20 = vld [vmem:[%s7070_s10 + $0x800] sm:$0xff]  ;;  %v1991_v14 = vld [vmem:[%s7070_s10 + $0xc30] sm:$0xff] }
 0x5aa   :  { %v3782_v19 = vpack.c.bf16 %v1865_v17, %v1858_v16  ;;  %v1983_v17 = vld [vmem:[%s7070_s10 + $0xbf0] sm:$0xff] }
 0x5ab   :  { %3761 = vmatpush1.bf16.msra.mxu0 %v3760_v29  ;;  %v1886_v29 = vld [vmem:[%s7070_s10 + $0x8e8] sm:$0xff] }
 0x5ac   :  { %3889 = vmatpush3.bf16.msra.mxu1 %v3888_v30  ;;  %3763 = vmatprep.subr.bf16.mxu0 %v3762_v31  ;;  %v1893_v30 = vld [vmem:[%s7070_s10 + $0x920] sm:$0xff]  ;;  %v3788_v31 = vpack.c.bf16 %v1878_v28, %v1871_v27  ;;  %v2019_v27 = vld [vmem:[%s7070_s10 + $0xd10] sm:$0xff] }
 0x5ad   :  { %3891 = vmatprep.subr.bf16.mxu1 %v3890_v35  ;;  %v3790_v32 = vpack.c.bf16 %v1893_v30, %v1886_v29  ;;  %v1900_v35 = vld [vmem:[%s7070_s10 + $0x958] sm:$0xff]  ;;  %v2011_v30 = vld [vmem:[%s7070_s10 + $0xcd0] sm:$0xff] }
 0x5ae   :  { %v3794_v39 = vpack.c.bf16 %v1907_v36, %v1900_v35  ;;  %v2025_v36 = vld [vmem:[%s7070_s10 + $0xd40] sm:$0xff] }
 0x5af   :  { %3765 = vmatpush1.bf16.msra.mxu0 %v3764_v42  ;;  %v1914_v42 = vld [vmem:[%s7070_s10 + $0x9c8] sm:$0xff] }
 0x5b0   :  { %3893 = vmatpush3.bf16.msra.mxu1 %v3892_v47  ;;  %3767 = vmatprep.subr.bf16.mxu0 %v3766_v25  ;;  %v1921_v47 = vld [vmem:[%s7070_s10 + $0xa00] sm:$0xff]  ;;  %v3796_v25 = vpack.c.bf16 %v1906_v41, %v1899_v40  ;;  %v2047_v40 = vld [vmem:[%s7070_s10 + $0xdf0] sm:$0xff] }
 0x5b1   :  { %3895 = vmatprep.subr.bf16.mxu1 %v3894_v50  ;;  %v3798_v48 = vpack.c.bf16 %v1921_v47, %v1914_v42  ;;  %v1928_v50 = vld [vmem:[%s7070_s10 + $0xa38] sm:$0xff]  ;;  %v2039_v47 = vld [vmem:[%s7070_s10 + $0xdb0] sm:$0xff] }
 0x5b2   :  { %v3802_v53 = vpack.c.bf16 %v1935_v44, %v1928_v50  ;;  %v2062_v50 = vrot.slane %v7034_v51, %v5460_v33  ;;  %v2058_v44 = vrot.slane %v7034_v51, %v5374_v45 }
 0x5b3   :  { %3769 = vmatpush1.bf16.msra.mxu0 %v3768_v57  ;;  %v1942_v57 = vld [vmem:[%s7070_s10 + $0xaa8] sm:$0xff] }
 0x5b4   :  { %3897 = vmatpush3.bf16.msra.mxu1 %v3896_v58  ;;  %3771 = vmatprep.subr.bf16.mxu0 %v3770_v54  ;;  %v1949_v58 = vld [vmem:[%s7070_s10 + $0xae0] sm:$0xff]  ;;  %v3804_v54 = vpack.c.bf16 %v1934_v56, %v1927_v22 }
 0x5b5   :  { %3899 = vmatprep.subr.bf16.mxu1 %v3898_v62  ;;  %v3806_v24 = vpack.c.bf16 %v1949_v58, %v1942_v57  ;;  %v1956_v62 = vld [vmem:[%s7070_s10 + $0xb18] sm:$0xff] }
 0x5b6   :  { %v3810_v1 = vpack.c.bf16 %v1963_v63, %v1956_v62 }
 0x5b7   :  { %3773 = vmatpush1.bf16.msra.mxu0 %v3772_v2  ;;  %v1955_v2 = vld [vmem:[%s7070_s10 + $0xb10] sm:$0xff] }
 0x5b8   :  { %3901 = vmatpush3.bf16.msra.mxu1 %v3900_v4  ;;  %3775 = vmatprep.subr.bf16.mxu0 %v3774_v5  ;;  %v1962_v4 = vld [vmem:[%s7070_s10 + $0xb48] sm:$0xff] }
 0x5b9   :  { %v1970_v5 = vld [vmem:[%s7070_s10 + $0xb88] sm:$0xff]  ;;  %v3812_v8 = vpack.c.bf16 %v1962_v4, %v1955_v2 }
 0x5ba   :  { %2435 = vmatmul.mubr.f32.vlgmr.msra.gmra.mrb[6].mxu0 %v6084_v12  ;;  %v1872_v12 = vld [vmem:[%s7070_s10 + $0x878] sm:$0xff]  ;;  %v3814_v9 = vpack.c.bf16 %v1977_v7, %v1970_v5 }
 0x5bb   :  { %2647 = vmatmul.mubr.f32.vlgmr.msra.gmra.mrb[14].mxu1 %v6479_v55  ;;  %3777 = vmatpush1.bf16.msra.mxu0 %v3776_v10  ;;  %v3786_v26 = vpack.c.bf16 %v1879_v23, %v1872_v12  ;;  %v1976_v10 = vld [vmem:[%s7070_s10 + $0xbb8] sm:$0xff]  ;;  %v1997_v23 = vld [vmem:[%s7070_s10 + $0xc60] sm:$0xff] }
 0x5bc   :  { %2505 = vmatprep.mubr.f32.mxu0 %v6184_v3  ;;  %3779 = vmatprep.subr.bf16.mxu0 %v3778_v13  ;;  %v3784_v3 = vpack.c.bf16 %v1864_v21, %v1857_v20  ;;  %v1984_v13 = vld [vmem:[%s7070_s10 + $0xbf8] sm:$0xff]  ;;  %v3816_v15 = vpack.c.bf16 %v1976_v10, %v1969_v6  ;;  %v2005_v20 = vld [vmem:[%s7070_s10 + $0xca0] sm:$0xff] }
 0x5bd   :  { %v3818_v16 = vpack.c.bf16 %v1991_v14, %v1984_v13 }
 0x5bf   :  { %3781 = vmatpush1.bf16.msra.mxu0 %v3780_v18  ;;  %v1990_v18 = vld [vmem:[%s7070_s10 + $0xc28] sm:$0xff] }
 0x5c0   :  { %3783 = vmatprep.subr.bf16.mxu0 %v3782_v19  ;;  %v1998_v19 = vld [vmem:[%s7070_s10 + $0xc68] sm:$0xff]  ;;  %v3820_v21 = vpack.c.bf16 %v1990_v18, %v1983_v17 }
 0x5c1   :  { %v3822_v12 = vpack.c.bf16 %v2005_v20, %v1998_v19 }
 0x5c3   :  { %3785 = vmatpush1.bf16.msra.mxu0 %v3784_v3  ;;  %v2004_v3 = vld [vmem:[%s7070_s10 + $0xc98] sm:$0xff] }
 0x5c4   :  { %3787 = vmatprep.subr.bf16.mxu0 %v3786_v26  ;;  %v2012_v26 = vld [vmem:[%s7070_s10 + $0xcd8] sm:$0xff]  ;;  %v3824_v28 = vpack.c.bf16 %v2004_v3, %v1997_v23  ;;  %v2077_v23 = vsub.s32 6, %v4294_v61 }
 0x5c5   :  { %v3826_v29 = vpack.c.bf16 %v2019_v27, %v2012_v26 }
 0x5c6   :  { %v2078_v3 = vrot.slane %v7034_v51, %v2077_v23 }
 0x5c7   :  { %3789 = vmatpush1.bf16.msra.mxu0 %v3788_v31  ;;  %v2018_v31 = vld [vmem:[%s7070_s10 + $0xd08] sm:$0xff] }
 0x5c8   :  { %3791 = vmatprep.subr.bf16.mxu0 %v3790_v32  ;;  %v2026_v32 = vld [vmem:[%s7070_s10 + $0xd48] sm:$0xff]  ;;  %v3828_v37 = vpack.c.bf16 %v2018_v31, %v2011_v30  ;;  %v2069_v31 = vsub.s32 4, %v4294_v61 }
 0x5c9   :  { %v3830_v35 = vpack.c.bf16 %v2033_v34, %v2026_v32  ;;  %v2073_v34 = vsub.s32 5, %v4294_v61 }
 0x5cb   :  { %3793 = vmatpush1.bf16.msra.mxu0 %v3792_v38  ;;  %v2032_v38 = vld [vmem:[%s7070_s10 + $0xd78] sm:$0xff] }
 0x5cc   :  { %3795 = vmatprep.subr.bf16.mxu0 %v3794_v39  ;;  %v2040_v39 = vld [vmem:[%s7070_s10 + $0xdb8] sm:$0xff]  ;;  %v3832_v41 = vpack.c.bf16 %v2032_v38, %v2025_v36  ;;  %v2074_v36 = vrot.slane %v7034_v51, %v2073_v34 }
 0x5cd   :  { %v3834_v42 = vpack.c.bf16 %v2047_v40, %v2040_v39 }
 0x5cf   :  { %3797 = vmatpush1.bf16.msra.mxu0 %v3796_v25  ;;  %v2046_v25 = vld [vmem:[%s7070_s10 + $0xde8] sm:$0xff] }
 0x5d0   :  { %3799 = vmatprep.subr.bf16.mxu0 %v3798_v48  ;;  %v3836_v48 = vpack.c.bf16 %v2046_v25, %v2039_v47 }
 0x5d3   :  { %3801 = vmatpush1.bf16.msra.mxu0 %v3800_v52  ;;  %v2066_v52 = vrot.slane %v7034_v51, %v5377_v46 }
 0x5d4   :  { %3803 = vmatprep.subr.bf16.mxu0 %v3802_v53 }
 0x5d7   :  { %3805 = vmatpush1.bf16.msra.mxu0 %v3804_v54 }
 0x5d8   :  { %3807 = vmatprep.subr.bf16.mxu0 %v3806_v24 }
 0x5db   :  { %3809 = vmatpush1.bf16.msra.mxu0 %v3808_v0 }
 0x5dc   :  { %3811 = vmatprep.subr.bf16.mxu0 %v3810_v1 }
 0x5df   :  { %3813 = vmatpush1.bf16.msra.mxu0 %v3812_v8 }
 0x5e0   :  { %3815 = vmatprep.subr.bf16.mxu0 %v3814_v9 }
 0x5e3   :  { %3817 = vmatpush1.bf16.msra.mxu0 %v3816_v15 }
 0x5e4   :  { %3819 = vmatprep.subr.bf16.mxu0 %v3818_v16 }
 0x5e7   :  { %3821 = vmatpush1.bf16.msra.mxu0 %v3820_v21 }
 0x5e8   :  { %3823 = vmatprep.subr.bf16.mxu0 %v3822_v12 }
 0x5eb   :  { %3825 = vmatpush1.bf16.msra.mxu0 %v3824_v28 }
 0x5ec   :  { %3827 = vmatprep.subr.bf16.mxu0 %v3826_v29 }
 0x5ef   :  { %3829 = vmatpush1.bf16.msra.mxu0 %v3828_v37  ;;  %v2070_v37 = vrot.slane %v7034_v51, %v2069_v31 }
 0x5f0   :  { %3831 = vmatprep.subr.bf16.mxu0 %v3830_v35 }
 0x5f3   :  { %3833 = vmatpush1.bf16.msra.mxu0 %v3832_v41 }
 0x5f4   :  { %3835 = vmatprep.subr.bf16.mxu0 %v3834_v42 }
 0x5f7   :  { %3837 = vmatpush1.bf16.msra.mxu0 %v3836_v48 }
 0x5fa   :  { %2506 = vmatmul.mubr.f32.vlgmr.msra.gmra.mrb[6].mxu0 %v6479_v55 }
 0x64d   :  { %v2223_v53 = vpop.f32.mrb[4].mxu0  ;;  %v2365_v22 = vpop.f32.mrb[10].mxu1 }
 0x64e   :  { %v3906_v55 = vadd.f32 %v2223_v53, %v2054_v49  ;;  %v3908_v56 = vadd.f32 %v2365_v22, %v2062_v50  ;;  %v2225_v57 = vpop.f32.mrb[5].mxu0  ;;  %v2367_v58 = vpop.f32.mrb[11].mxu1 }
 0x64f   :  { %v3907_v54 = vadd.f32 %v2225_v57, %v2058_v44  ;;  %v3909_v24 = vadd.f32 %v2367_v58, %v2066_v52 }
 0x650   :  { %v2652_v59 = vsub.f32 0.0, %v3906_v55  ;;  %v2654_v60 = vsub.f32 0.0, %v3908_v56 }
 0x651   :  { %v2653_v43 = vsub.f32 0.0, %v3907_v54  ;;  %v2655_v62 = vsub.f32 0.0, %v3909_v24 }
 0x652   :  { %v2659_v63 = vmul.f32 1.442695, %v2652_v59  ;;  %v2663_v33 = vmul.f32 1.442695, %v2654_v60 }
 0x653   :  { %v2661_v0 = vmul.f32 1.442695, %v2653_v43  ;;  %v2665_v1 = vmul.f32 1.442695, %v2655_v62 }
 0x654   :  { %3939 = vpow2.f32 %v2659_v63 }
 0x655   :  { %3941 = vpow2.f32 %v2663_v33 }
 0x656   :  { %3943 = vpow2.f32 %v2661_v0 }
 0x657   :  { %3945 = vpow2.f32 %v2665_v1 }
 0x65e   :  { %v3940_v45 = vpop.eup %3939 }
 0x65f   :  { %v3942_v46 = vpop.eup %3941  ;;  %v2673_v2 = vadd.f32 1.0, %v3940_v45 }
 0x660   :  { %v3944_v4 = vpop.eup %3943  ;;  %v2675_v5 = vadd.f32 1.0, %v3942_v46 }
 0x661   :  { %v3946_v7 = vpop.eup %3945  ;;  %3947 = vrcp.f32 %v2673_v2  ;;  %v2674_v8 = vadd.f32 1.0, %v3944_v4 }
 0x662   :  { %3949 = vrcp.f32 %v2675_v5  ;;  %v2676_v9 = vadd.f32 1.0, %v3946_v7 }
 0x663   :  { %3951 = vrcp.f32 %v2674_v8 }
 0x664   :  { %3953 = vrcp.f32 %v2676_v9 }
 0x66b   :  { %v3948_v6 = vpop.eup %3947 }
 0x66c   :  { %v3950_v10 = vpop.eup %3949 }
 0x66d   :  { %v3952_v13 = vpop.eup %3951 }
 0x66e   :  { %v3954_v14 = vpop.eup %3953  ;;  %v2694_v15 = vcombine.low %v3948_v6, %v3952_v13  ;;  %v2869_v16 = vpop.f32.mrb[12].mxu1 }
 0x66f   :  { %v2695_v17 = vcombine.low %v3950_v10, %v3954_v14  ;;  %v2870_v18 = vpop.f32.mrb[13].mxu1 }
 0x670   :  { %v2702_v19 = vrot.slane %v2694_v15, %v4321_v11  ;;  %v2871_v20 = vadd.f32 %v2870_v18, %v2869_v16 }
 0x671   :  { %v2709_v21 = vrot.slane %v2695_v17, %v4321_v11 }
 0x672   :  { %v2579_v28 = vadd.f32 %v2871_v20, %v2078_v3 }
 0x673   :  { %v2710_v12 = vcombine.low %v2702_v19, %v2709_v21 }
 0x675   :  { %2729 = vst [vmem:[%s7073_s12] sm:$0xff] %v2710_v12 }
 0x68e   :  { %v2904_v26 = vpop.f32.mrb[14].mxu1 }
 0x68f   :  { %v2905_v27 = vpop.f32.mrb[15].mxu1 }
 0x690   :  { %v2906_v29 = vadd.f32 %v2905_v27, %v2904_v26 }
 0x692   :  { %v2649_v30 = vadd.f32 %v2906_v29, %v2579_v28 }
 0x694   :  { %v2658_v32 = vsub.f32 0.0, %v2649_v30 }
 0x696   :  { %v2671_v35 = vmul.f32 1.442695, %v2658_v32 }
 0x698   :  { %3955 = vpow2.f32 %v2671_v35 }
 0x6a2   :  { %v3956_v49 = vpop.eup %3955 }
 0x6a3   :  { %v2679_v50 = vadd.f32 1.0, %v3956_v49 }
 0x6cd   :  { %v2507_v38 = vpop.f32.mrb[6].mxu0 }
 0x6ce   :  { %v3910_v39 = vadd.f32 %v2507_v38, %v2070_v37  ;;  %v2509_v40 = vpop.f32.mrb[7].mxu0 }
 0x6cf   :  { %v3911_v41 = vadd.f32 %v2509_v40, %v2074_v36 }
 0x6d0   :  { %v2656_v42 = vsub.f32 0.0, %v3910_v39 }
 0x6d1   :  { %v2657_v47 = vsub.f32 0.0, %v3911_v41 }
 0x6d2   :  { %v2667_v25 = vmul.f32 1.442695, %v2656_v42 }
 0x6d3   :  { %v2669_v48 = vmul.f32 1.442695, %v2657_v47 }
 0x6d4   :  { %3957 = vpow2.f32 %v2667_v25 }
 0x6d5   :  { %3959 = vpow2.f32 %v2669_v48 }
 0x6d6   :  { %3961 = vrcp.f32 %v2679_v50 }
 0x6de   :  { %v3958_v44 = vpop.eup %3957 }
 0x6df   :  { %v3960_v61 = vpop.eup %3959  ;;  %v2677_v52 = vadd.f32 1.0, %v3958_v44 }
 0x6e0   :  { %v2678_v53 = vadd.f32 1.0, %v3960_v61  ;;  %v3962_v51 = vpop.eup %3961 }
 0x6e1   :  { %3963 = vrcp.f32 %v2677_v52  ;;  %v2725_v57 = vrot.slane %v3962_v51, %v4321_v11 }
 0x6e2   :  { %3965 = vrcp.f32 %v2678_v53 }
 0x6eb   :  { %v3964_v22 = vpop.eup %3963 }
 0x6ec   :  { %v3966_v55 = vpop.eup %3965 }
 0x6ed   :  { %v2711_v56 = vcombine.low %v3964_v22, %v3966_v55 }
 0x6ef   :  { %v2718_v58 = vrot.slane %v2711_v56, %v4321_v11 }
 0x6f1   :  { %v2726_v54 = vcombine.low %v2718_v58, %v2725_v57 }
 0x6f3   :  { %2735 = vst.msk [vmem:[%s7073_s12 + $0x8] sm:$0x3f] %vm2734_vm7, %v2726_v54 }

</bundles_post_ra>
